<compile_context>
chip_gen: v5e
topology: v5e:2x2
jax: 0.10.0
libtpu: 0.0.40
codegen_flags: <defaults>
</compile_context>

<pallas_src>
import functools
import math

import jax
import jax.numpy as jnp
from jax.experimental import pallas as pl
from jax.experimental.pallas import tpu as pltpu

EPS = 1e-5        # torch.nn.BatchNorm2d default
TILE_H = 8        # output rows per grid step; Cout*TILE_H = 256 = v6e/v7x MXU width


def _conv_tile(slab_ref, wt_ref, *, k, w_out):
    """Accumulating per-kw block-Toeplitz matmuls for one row-block tile.

    slab_ref: ((tile_h+k-1)*Cin, Wp) bf16, slab[h*Cin+ci, w] = x_dil_pad[ci, r0+h, w]
    wt_ref:   (k, Cout*tile_h, (tile_h+k-1)*Cin) f32,
              wt[kw, co*tile_h+l, h*Cin+ci] = w_flip[h-l, kw, ci, co] (0 outside [0,k))
    returns:  (Cout*tile_h, w_out) f32, rows ordered co*tile_h + l, width on lanes.
    """
    acc = jnp.dot(wt_ref[0], slab_ref[:, 0:w_out].astype(jnp.float32),
                  preferred_element_type=jnp.float32)
    for kw in range(1, k):
        acc += jnp.dot(wt_ref[kw], slab_ref[:, kw:kw + w_out].astype(jnp.float32),
                       preferred_element_type=jnp.float32)
    return acc


def _stats_kernel(slab_ref, wt_ref, o_ref, *, tile_h, cout, k, w_out):
    """Pass 1: per-block partial sum and sum-of-squares of the (bias-free) conv."""
    acc = _conv_tile(slab_ref, wt_ref, k=k, w_out=w_out)
    a3 = acc.reshape(cout, tile_h, w_out)                       # free leading-dim split
    s1 = jnp.sum(jnp.sum(a3, axis=2), axis=1, keepdims=True)    # (cout, 1)
    s2 = jnp.sum(jnp.sum(a3 * a3, axis=2), axis=1, keepdims=True)
    o_ref[:, 0:1] = s1
    o_ref[:, 1:2] = s2


def _apply_kernel(slab_ref, wt_ref, scale_ref, shift_ref, o_ref, *, tile_h, cout, k, w_out):
    """Pass 2: recompute conv tile, fused BN scale/shift + sigmoid, NCHW lane-dense store."""
    acc = _conv_tile(slab_ref, wt_ref, k=k, w_out=w_out)
    y = acc * scale_ref[...] + shift_ref[...]                   # folded BN affine
    y = 1.0 / (1.0 + jnp.exp(-y))                               # sigmoid in f32
    o_ref[...] = y.reshape(cout, tile_h, w_out)                 # (Cout, tile_h, W_out)


def model_forward(x, w_t, bias, gamma, beta, *, stride=2, padding=0, tile_h=TILE_H):
    """x: (N, Cin, H, W) f32 NCHW -> (N, Cout, H_out, W_out) f32.

    `bias` is accepted for API parity but unused: with training-mode BatchNorm the
    per-channel conv bias is exactly cancelled by the mean subtraction.
    """
    del bias
    assert padding == 0, "kernel assumes padding=0 (matches the module)"
    N, Cin, H, W = x.shape
    Cin_w, Cout, K, K2 = w_t.shape
    assert Cin_w == Cin and K == K2
    s = stride
    H_out = (H - 1) * s + K
    W_out = (W - 1) * s + K
    p = K - 1                           # conv-side padding of the dilated input
    Hd, Wd = (H - 1) * s + 1, (W - 1) * s + 1
    Wp = W_out + K - 1
    H_loc = tile_h + K - 1
    G = pl.cdiv(H_out, tile_h)
    Hp = G * tile_h + K - 1             # zero rows past H_out keep edge blocks exact

    # ---- glue: dilated+padded input -> bf16 halo'ed row slabs (N, G, H_loc*Cin, Wp) ----
    xdp = jnp.zeros((N, Cin, Hp, Wp), jnp.bfloat16)
    xdp = xdp.at[:, :, p:p + Hd:s, p:p + Wd:s].set(x.astype(jnp.bfloat16))
    xt = xdp.transpose(0, 2, 1, 3)                                    # (N, Hp, Cin, Wp)
    rows = jnp.arange(G)[:, None] * tile_h + jnp.arange(H_loc)[None, :]
    slabs = xt[:, rows].reshape(N, G, H_loc * Cin, Wp)

    # ---- per-kw block-Toeplitz direct-conv weight (K, Cout*tile_h, H_loc*Cin), f32 ----
    w_flip = jnp.flip(w_t, axis=(2, 3)).astype(jnp.float32)           # (Cin, Cout, K, K)
    wperm = w_flip.transpose(2, 3, 0, 1)                              # (kh, kw, ci, co)
    kh = jnp.arange(H_loc)[None, :] - jnp.arange(tile_h)[:, None]     # (tile_h, H_loc)
    valid = (kh >= 0) & (kh < K)
    wsel = wperm[jnp.clip(kh, 0, K - 1)]                              # (tile_h, H_loc, K, Cin, Cout)
    wsel = jnp.where(valid[:, :, None, None, None], wsel, 0.0)
    wt = wsel.transpose(2, 4, 0, 1, 3).reshape(K, Cout * tile_h, H_loc * Cin)

    slab_cols = H_loc * Cin
    mxu_flops = 2 * N * G * K * (Cout * tile_h) * slab_cols * W_out

    cparams = pltpu.CompilerParams(
        dimension_semantics=("parallel", "parallel"),
        vmem_limit_bytes=32 * 1024 * 1024,     # ample for the ~6 MB per-step working set
    )

    slab_spec = pl.BlockSpec((None, None, slab_cols, Wp), lambda n, g: (n, g, 0, 0))
    wt_spec = pl.BlockSpec((K, Cout * tile_h, slab_cols), lambda n, g: (0, 0, 0))

    # ---- pass 1: BN batch statistics (per-block partials, reduced in f32 below) ----
    stats_kernel = functools.partial(_stats_kernel, tile_h=tile_h, cout=Cout, k=K, w_out=W_out)
    partials = pl.pallas_call(
        stats_kernel,
        out_shape=jax.ShapeDtypeStruct((N, G, Cout, 2), jnp.float32),
        grid_spec=pltpu.PrefetchScalarGridSpec(
            num_scalar_prefetch=0,
            grid=(N, G),
            in_specs=[slab_spec, wt_spec],
            out_specs=pl.BlockSpec((None, None, Cout, 2), lambda n, g: (n, g, 0, 0)),
        ),
        compiler_params=cparams,
        cost_estimate=pl.CostEstimate(
            flops=mxu_flops, transcendentals=0,
            bytes_accessed=slabs.size * 2 + wt.size * 4 + N * G * Cout * 2 * 4),
    )(slabs, wt)

    # Output rows >= H_out in the last block read only the zero padding of xdp, so
    # they contribute exactly 0 to both partials; divide by the true element count.
    m_count = N * H_out * W_out
    s1 = jnp.sum(partials[..., 0], axis=(0, 1))
    s2 = jnp.sum(partials[..., 1], axis=(0, 1))
    mean = s1 / m_count
    var = jnp.maximum(s2 / m_count - mean * mean, 0.0)
    scale = gamma * jax.lax.rsqrt(var + EPS)
    shift = beta - mean * scale
    scale_rows = jnp.repeat(scale, tile_h).reshape(Cout * tile_h, 1).astype(jnp.float32)
    shift_rows = jnp.repeat(shift, tile_h).reshape(Cout * tile_h, 1).astype(jnp.float32)

    # ---- pass 2: recompute conv tile, fused BN + sigmoid, lane-dense NCHW store ----
    apply_kernel = functools.partial(_apply_kernel, tile_h=tile_h, cout=Cout, k=K, w_out=W_out)
    out = pl.pallas_call(
        apply_kernel,
        out_shape=jax.ShapeDtypeStruct((N, Cout, H_out, W_out), jnp.float32),
        grid_spec=pltpu.PrefetchScalarGridSpec(
            num_scalar_prefetch=0,
            grid=(N, G),
            in_specs=[
                slab_spec,
                wt_spec,
                pl.BlockSpec((Cout * tile_h, 1), lambda n, g: (0, 0)),
                pl.BlockSpec((Cout * tile_h, 1), lambda n, g: (0, 0)),
            ],
            out_specs=pl.BlockSpec((None, Cout, tile_h, W_out), lambda n, g: (n, 0, g, 0)),
        ),
        compiler_params=cparams,
        cost_estimate=pl.CostEstimate(
            flops=mxu_flops + 4 * N * H_out * W_out * Cout,
            transcendentals=N * H_out * W_out * Cout,
            bytes_accessed=slabs.size * 2 + wt.size * 4 + N * Cout * H_out * W_out * 4),
    )(slabs, wt, scale_rows, shift_rows)

    return out


if __name__ == "__main__":
    # Small shapes consistent with the module (real input is (1, 6, 319, 507)).
    # H=W=16 -> H_out=W_out=37, which is NOT a multiple of TILE_H, so the partial
    # last row block (masked store + zero-padding stats assumption) is exercised.
    N, Cin, H, W = 1, 6, 16, 16
    Cout, K = 32, 7

    key = jax.random.PRNGKey(0)
    kx, kw, kb, kg, kbe = jax.random.split(key, 5)
    x1 = jax.random.normal(kx, (N, Cin, H, W), jnp.float32)

    fan_in = Cout * K * K                       # PyTorch ConvTranspose2d fan_in
    bound = 1.0 / math.sqrt(fan_in)
    w_t = jax.random.uniform(kw, (Cin, Cout, K, K), jnp.float32, -bound, bound)
    bias = jax.random.uniform(kb, (Cout,), jnp.float32, -bound, bound)
    gamma = 1.0 + 0.1 * jax.random.normal(kg, (Cout,), jnp.float32)
    beta = 0.1 * jax.random.normal(kbe, (Cout,), jnp.float32)

    fwd = jax.jit(model_forward)
    out = jax.block_until_ready(fwd(x1, w_t, bias, gamma, beta))

    # Pure-JAX reference (lhs-dilated conv == ConvTranspose2d).  x is bf16-rounded to
    # match the kernel's bf16 slab storage; the matmul itself is f32 in both.
    xb = x1.astype(jnp.bfloat16).astype(jnp.float32)
    w_conv = jnp.flip(w_t, axis=(2, 3)).transpose(1, 0, 2, 3)          # (Cout, Cin, K, K)
    conv = jax.lax.conv_general_dilated(
        xb, w_conv, window_strides=(1, 1),
        padding=((K - 1, K - 1), (K - 1, K - 1)),
        lhs_dilation=(2, 2),
        dimension_numbers=("NCHW", "OIHW", "NCHW"),
        precision=jax.lax.Precision.HIGHEST,
    ) + bias[None, :, None, None]
    m = conv.mean(axis=(0, 2, 3), keepdims=True)
    v = ((conv - m) ** 2).mean(axis=(0, 2, 3), keepdims=True)
    ref = jax.nn.sigmoid((conv - m) * jax.lax.rsqrt(v + EPS) * gamma[None, :, None, None]
                         + beta[None, :, None, None])

    H_out = (H - 1) * 2 + K
    W_out = (W - 1) * 2 + K
    assert out.shape == (N, Cout, H_out, W_out), out.shape
    max_err = float(jnp.max(jnp.abs(out - ref)))
    assert max_err < 2e-2, f"mismatch vs reference, max abs err = {max_err}"

    print("KERNEL_OK")
</pallas_src>

<mosaic_0001>
module attributes {stable_mosaic.version = 11 : i64} {
  func.func @_stats_kernel(%arg0: i32, %arg1: i32, %arg2: memref<1x1x84x43xbf16, #tpu.memory_space<vmem>>, %arg3: memref<7x256x84xf32, #tpu.memory_space<vmem>>, %arg4: memref<1x1x32x2xf32, #tpu.memory_space<vmem>>) attributes {dimension_semantics = [#tpu.dimension_semantics<parallel>, #tpu.dimension_semantics<parallel>], iteration_bounds = array<i64: 1, 5>, scalar_prefetch = 0 : i64, scratch_operands = 0 : i64, tpu.core_type = #tpu.core_type<tc>, window_params = [{transform_indices = @transform_0, window_bounds = array<i64: 1, 1, 84, 43>}, {pipeline_mode = #tpu.pipeline_mode<synchronous>, transform_indices = @transform_1, window_bounds = array<i64: 7, 256, 84>}, {transform_indices = @transform_2, window_bounds = array<i64: 1, 1, 32, 2>}]} {
    %c0 = arith.constant 0 : index
    %c0_0 = arith.constant 0 : index
    %c0_1 = arith.constant 0 : index
    %0 = vector.load %arg3[%c0, %c0_0, %c0_1] : memref<7x256x84xf32, #tpu.memory_space<vmem>>, vector<1x256x84xf32>
    %1 = vector.shape_cast %0 : vector<1x256x84xf32> to vector<256x84xf32>
    %c0_2 = arith.constant 0 : index
    %c0_3 = arith.constant 0 : index
    %c0_4 = arith.constant 0 : index
    %c0_5 = arith.constant 0 : index
    %2 = vector.load %arg2[%c0_2, %c0_3, %c0_4, %c0_5] : memref<1x1x84x43xbf16, #tpu.memory_space<vmem>>, vector<1x1x84x37xbf16>
    %3 = vector.shape_cast %2 : vector<1x1x84x37xbf16> to vector<84x37xbf16>
    %4 = arith.extf %3 : vector<84x37xbf16> to vector<84x37xf32>
    %cst = arith.constant dense<0.000000e+00> : vector<256x37xf32>
    %5 = tpu.matmul %1, %4, %cst {dimension_numbers = #tpu.dot_dimension_numbers<[1], [0], [0], [1], [0, 0, 1, 1], [], []>} : vector<256x84xf32>, vector<84x37xf32>, vector<256x37xf32> -> vector<256x37xf32>
    %c1 = arith.constant 1 : index
    %c0_6 = arith.constant 0 : index
    %c0_7 = arith.constant 0 : index
    %6 = vector.load %arg3[%c1, %c0_6, %c0_7] : memref<7x256x84xf32, #tpu.memory_space<vmem>>, vector<1x256x84xf32>
    %7 = vector.shape_cast %6 : vector<1x256x84xf32> to vector<256x84xf32>
    %c0_8 = arith.constant 0 : index
    %c0_9 = arith.constant 0 : index
    %c0_10 = arith.constant 0 : index
    %c1_11 = arith.constant 1 : index
    %8 = vector.load %arg2[%c0_8, %c0_9, %c0_10, %c1_11] : memref<1x1x84x43xbf16, #tpu.memory_space<vmem>>, vector<1x1x84x37xbf16>
    %9 = vector.shape_cast %8 : vector<1x1x84x37xbf16> to vector<84x37xbf16>
    %10 = arith.extf %9 : vector<84x37xbf16> to vector<84x37xf32>
    %cst_12 = arith.constant dense<0.000000e+00> : vector<256x37xf32>
    %11 = tpu.matmul %7, %10, %cst_12 {dimension_numbers = #tpu.dot_dimension_numbers<[1], [0], [0], [1], [0, 0, 1, 1], [], []>} : vector<256x84xf32>, vector<84x37xf32>, vector<256x37xf32> -> vector<256x37xf32>
    %12 = arith.addf %5, %11 : vector<256x37xf32>
    %c2 = arith.constant 2 : index
    %c0_13 = arith.constant 0 : index
    %c0_14 = arith.constant 0 : index
    %13 = vector.load %arg3[%c2, %c0_13, %c0_14] : memref<7x256x84xf32, #tpu.memory_space<vmem>>, vector<1x256x84xf32>
    %14 = vector.shape_cast %13 : vector<1x256x84xf32> to vector<256x84xf32>
    %c0_15 = arith.constant 0 : index
    %c0_16 = arith.constant 0 : index
    %c0_17 = arith.constant 0 : index
    %c2_18 = arith.constant 2 : index
    %15 = vector.load %arg2[%c0_15, %c0_16, %c0_17, %c2_18] : memref<1x1x84x43xbf16, #tpu.memory_space<vmem>>, vector<1x1x84x37xbf16>
    %16 = vector.shape_cast %15 : vector<1x1x84x37xbf16> to vector<84x37xbf16>
    %17 = arith.extf %16 : vector<84x37xbf16> to vector<84x37xf32>
    %cst_19 = arith.constant dense<0.000000e+00> : vector<256x37xf32>
    %18 = tpu.matmul %14, %17, %cst_19 {dimension_numbers = #tpu.dot_dimension_numbers<[1], [0], [0], [1], [0, 0, 1, 1], [], []>} : vector<256x84xf32>, vector<84x37xf32>, vector<256x37xf32> -> vector<256x37xf32>
    %19 = arith.addf %12, %18 : vector<256x37xf32>
    %c3 = arith.constant 3 : index
    %c0_20 = arith.constant 0 : index
    %c0_21 = arith.constant 0 : index
    %20 = vector.load %arg3[%c3, %c0_20, %c0_21] : memref<7x256x84xf32, #tpu.memory_space<vmem>>, vector<1x256x84xf32>
    %21 = vector.shape_cast %20 : vector<1x256x84xf32> to vector<256x84xf32>
    %c0_22 = arith.constant 0 : index
    %c0_23 = arith.constant 0 : index
    %c0_24 = arith.constant 0 : index
    %c3_25 = arith.constant 3 : index
    %22 = vector.load %arg2[%c0_22, %c0_23, %c0_24, %c3_25] : memref<1x1x84x43xbf16, #tpu.memory_space<vmem>>, vector<1x1x84x37xbf16>
    %23 = vector.shape_cast %22 : vector<1x1x84x37xbf16> to vector<84x37xbf16>
    %24 = arith.extf %23 : vector<84x37xbf16> to vector<84x37xf32>
    %cst_26 = arith.constant dense<0.000000e+00> : vector<256x37xf32>
    %25 = tpu.matmul %21, %24, %cst_26 {dimension_numbers = #tpu.dot_dimension_numbers<[1], [0], [0], [1], [0, 0, 1, 1], [], []>} : vector<256x84xf32>, vector<84x37xf32>, vector<256x37xf32> -> vector<256x37xf32>
    %26 = arith.addf %19, %25 : vector<256x37xf32>
    %c4 = arith.constant 4 : index
    %c0_27 = arith.constant 0 : index
    %c0_28 = arith.constant 0 : index
    %27 = vector.load %arg3[%c4, %c0_27, %c0_28] : memref<7x256x84xf32, #tpu.memory_space<vmem>>, vector<1x256x84xf32>
    %28 = vector.shape_cast %27 : vector<1x256x84xf32> to vector<256x84xf32>
    %c0_29 = arith.constant 0 : index
    %c0_30 = arith.constant 0 : index
    %c0_31 = arith.constant 0 : index
    %c4_32 = arith.constant 4 : index
    %29 = vector.load %arg2[%c0_29, %c0_30, %c0_31, %c4_32] : memref<1x1x84x43xbf16, #tpu.memory_space<vmem>>, vector<1x1x84x37xbf16>
    %30 = vector.shape_cast %29 : vector<1x1x84x37xbf16> to vector<84x37xbf16>
    %31 = arith.extf %30 : vector<84x37xbf16> to vector<84x37xf32>
    %cst_33 = arith.constant dense<0.000000e+00> : vector<256x37xf32>
    %32 = tpu.matmul %28, %31, %cst_33 {dimension_numbers = #tpu.dot_dimension_numbers<[1], [0], [0], [1], [0, 0, 1, 1], [], []>} : vector<256x84xf32>, vector<84x37xf32>, vector<256x37xf32> -> vector<256x37xf32>
    %33 = arith.addf %26, %32 : vector<256x37xf32>
    %c5 = arith.constant 5 : index
    %c0_34 = arith.constant 0 : index
    %c0_35 = arith.constant 0 : index
    %34 = vector.load %arg3[%c5, %c0_34, %c0_35] : memref<7x256x84xf32, #tpu.memory_space<vmem>>, vector<1x256x84xf32>
    %35 = vector.shape_cast %34 : vector<1x256x84xf32> to vector<256x84xf32>
    %c0_36 = arith.constant 0 : index
    %c0_37 = arith.constant 0 : index
    %c0_38 = arith.constant 0 : index
    %c5_39 = arith.constant 5 : index
    %36 = vector.load %arg2[%c0_36, %c0_37, %c0_38, %c5_39] : memref<1x1x84x43xbf16, #tpu.memory_space<vmem>>, vector<1x1x84x37xbf16>
    %37 = vector.shape_cast %36 : vector<1x1x84x37xbf16> to vector<84x37xbf16>
    %38 = arith.extf %37 : vector<84x37xbf16> to vector<84x37xf32>
    %cst_40 = arith.constant dense<0.000000e+00> : vector<256x37xf32>
    %39 = tpu.matmul %35, %38, %cst_40 {dimension_numbers = #tpu.dot_dimension_numbers<[1], [0], [0], [1], [0, 0, 1, 1], [], []>} : vector<256x84xf32>, vector<84x37xf32>, vector<256x37xf32> -> vector<256x37xf32>
    %40 = arith.addf %33, %39 : vector<256x37xf32>
    %c6 = arith.constant 6 : index
    %c0_41 = arith.constant 0 : index
    %c0_42 = arith.constant 0 : index
    %41 = vector.load %arg3[%c6, %c0_41, %c0_42] : memref<7x256x84xf32, #tpu.memory_space<vmem>>, vector<1x256x84xf32>
    %42 = vector.shape_cast %41 : vector<1x256x84xf32> to vector<256x84xf32>
    %c0_43 = arith.constant 0 : index
    %c0_44 = arith.constant 0 : index
    %c0_45 = arith.constant 0 : index
    %c6_46 = arith.constant 6 : index
    %43 = vector.load %arg2[%c0_43, %c0_44, %c0_45, %c6_46] : memref<1x1x84x43xbf16, #tpu.memory_space<vmem>>, vector<1x1x84x37xbf16>
    %44 = vector.shape_cast %43 : vector<1x1x84x37xbf16> to vector<84x37xbf16>
    %45 = arith.extf %44 : vector<84x37xbf16> to vector<84x37xf32>
    %cst_47 = arith.constant dense<0.000000e+00> : vector<256x37xf32>
    %46 = tpu.matmul %42, %45, %cst_47 {dimension_numbers = #tpu.dot_dimension_numbers<[1], [0], [0], [1], [0, 0, 1, 1], [], []>} : vector<256x84xf32>, vector<84x37xf32>, vector<256x37xf32> -> vector<256x37xf32>
    %47 = arith.addf %40, %46 : vector<256x37xf32>
    %48 = vector.shape_cast %47 : vector<256x37xf32> to vector<32x8x37xf32>
    %cst_48 = arith.constant dense<0.000000e+00> : vector<32x8xf32>
    %49 = vector.multi_reduction <add>, %48, %cst_48 [2] : vector<32x8x37xf32> to vector<32x8xf32>
    %cst_49 = arith.constant dense<0.000000e+00> : vector<32xf32>
    %50 = vector.multi_reduction <add>, %49, %cst_49 [1] : vector<32x8xf32> to vector<32xf32>
    %51 = vector.shape_cast %50 : vector<32xf32> to vector<32x1xf32>
    %52 = arith.mulf %48, %48 : vector<32x8x37xf32>
    %cst_50 = arith.constant dense<0.000000e+00> : vector<32x8xf32>
    %53 = vector.multi_reduction <add>, %52, %cst_50 [2] : vector<32x8x37xf32> to vector<32x8xf32>
    %cst_51 = arith.constant dense<0.000000e+00> : vector<32xf32>
    %54 = vector.multi_reduction <add>, %53, %cst_51 [1] : vector<32x8xf32> to vector<32xf32>
    %55 = vector.shape_cast %54 : vector<32xf32> to vector<32x1xf32>
    %c0_52 = arith.constant 0 : index
    %c0_53 = arith.constant 0 : index
    %c0_54 = arith.constant 0 : index
    %c0_55 = arith.constant 0 : index
    %56 = vector.load %arg4[%c0_52, %c0_53, %c0_54, %c0_55] : memref<1x1x32x2xf32, #tpu.memory_space<vmem>>, vector<1x1x32x1xf32>
    %57 = vector.shape_cast %56 : vector<1x1x32x1xf32> to vector<32x1xf32>
    %58 = vector.shape_cast %51 : vector<32x1xf32> to vector<1x1x32x1xf32>
    tpu.vector_store %arg4[%c0_52, %c0_53, %c0_54, %c0_55], %58 {strides = array<i32>} : memref<1x1x32x2xf32, #tpu.memory_space<vmem>>, vector<1x1x32x1xf32>,
    %c0_56 = arith.constant 0 : index
    %c0_57 = arith.constant 0 : index
    %c0_58 = arith.constant 0 : index
    %c1_59 = arith.constant 1 : index
    %59 = vector.load %arg4[%c0_56, %c0_57, %c0_58, %c1_59] : memref<1x1x32x2xf32, #tpu.memory_space<vmem>>, vector<1x1x32x1xf32>
    %60 = vector.shape_cast %59 : vector<1x1x32x1xf32> to vector<32x1xf32>
    %61 = vector.shape_cast %55 : vector<32x1xf32> to vector<1x1x32x1xf32>
    tpu.vector_store %arg4[%c0_56, %c0_57, %c0_58, %c1_59], %61 {strides = array<i32>} : memref<1x1x32x2xf32, #tpu.memory_space<vmem>>, vector<1x1x32x1xf32>,
    return
  }
  func.func @transform_0(%arg0: i32, %arg1: i32) -> (i32, i32, i32, i32) {
    %c0_i32 = arith.constant 0 : i32
    %c0_i32_0 = arith.constant 0 : i32
    %c0_i32_1 = arith.constant 0 : i32
    return %arg0, %arg1, %c0_i32, %c0_i32_0 : i32, i32, i32, i32
  }
  func.func @transform_1(%arg0: i32, %arg1: i32) -> (i32, i32, i32) {
    %c0_i32 = arith.constant 0 : i32
    %c0_i32_0 = arith.constant 0 : i32
    %c0_i32_1 = arith.constant 0 : i32
    %c0_i32_2 = arith.constant 0 : i32
    return %c0_i32, %c0_i32_0, %c0_i32_1 : i32, i32, i32
  }
  func.func @transform_2(%arg0: i32, %arg1: i32) -> (i32, i32, i32, i32) {
    %c0_i32 = arith.constant 0 : i32
    %c0_i32_0 = arith.constant 0 : i32
    %c0_i32_1 = arith.constant 0 : i32
    return %arg0, %arg1, %c0_i32, %c0_i32_0 : i32, i32, i32, i32
  }
}

module attributes {stable_mosaic.version = 11 : i64} {
  func.func @_apply_kernel(%arg0: i32, %arg1: i32, %arg2: memref<1x1x84x43xbf16, #tpu.memory_space<vmem>>, %arg3: memref<7x256x84xf32, #tpu.memory_space<vmem>>, %arg4: memref<256x1xf32, #tpu.memory_space<vmem>>, %arg5: memref<256x1xf32, #tpu.memory_space<vmem>>, %arg6: memref<1x32x8x37xf32, #tpu.memory_space<vmem>>) attributes {dimension_semantics = [#tpu.dimension_semantics<parallel>, #tpu.dimension_semantics<parallel>], iteration_bounds = array<i64: 1, 5>, scalar_prefetch = 0 : i64, scratch_operands = 0 : i64, tpu.core_type = #tpu.core_type<tc>, window_params = [{transform_indices = @transform_0, window_bounds = array<i64: 1, 1, 84, 43>}, {pipeline_mode = #tpu.pipeline_mode<synchronous>, transform_indices = @transform_1, window_bounds = array<i64: 7, 256, 84>}, {pipeline_mode = #tpu.pipeline_mode<synchronous>, transform_indices = @transform_2, window_bounds = array<i64: 256, 1>}, {pipeline_mode = #tpu.pipeline_mode<synchronous>, transform_indices = @transform_3, window_bounds = array<i64: 256, 1>}, {transform_indices = @transform_4, window_bounds = array<i64: 1, 32, 8, 37>}]} {
    %c0 = arith.constant 0 : index
    %c0_0 = arith.constant 0 : index
    %c0_1 = arith.constant 0 : index
    %0 = vector.load %arg3[%c0, %c0_0, %c0_1] : memref<7x256x84xf32, #tpu.memory_space<vmem>>, vector<1x256x84xf32>
    %1 = vector.shape_cast %0 : vector<1x256x84xf32> to vector<256x84xf32>
    %c0_2 = arith.constant 0 : index
    %c0_3 = arith.constant 0 : index
    %c0_4 = arith.constant 0 : index
    %c0_5 = arith.constant 0 : index
    %2 = vector.load %arg2[%c0_2, %c0_3, %c0_4, %c0_5] : memref<1x1x84x43xbf16, #tpu.memory_space<vmem>>, vector<1x1x84x37xbf16>
    %3 = vector.shape_cast %2 : vector<1x1x84x37xbf16> to vector<84x37xbf16>
    %4 = arith.extf %3 : vector<84x37xbf16> to vector<84x37xf32>
    %cst = arith.constant dense<0.000000e+00> : vector<256x37xf32>
    %5 = tpu.matmul %1, %4, %cst {dimension_numbers = #tpu.dot_dimension_numbers<[1], [0], [0], [1], [0, 0, 1, 1], [], []>} : vector<256x84xf32>, vector<84x37xf32>, vector<256x37xf32> -> vector<256x37xf32>
    %c1 = arith.constant 1 : index
    %c0_6 = arith.constant 0 : index
    %c0_7 = arith.constant 0 : index
    %6 = vector.load %arg3[%c1, %c0_6, %c0_7] : memref<7x256x84xf32, #tpu.memory_space<vmem>>, vector<1x256x84xf32>
    %7 = vector.shape_cast %6 : vector<1x256x84xf32> to vector<256x84xf32>
    %c0_8 = arith.constant 0 : index
    %c0_9 = arith.constant 0 : index
    %c0_10 = arith.constant 0 : index
    %c1_11 = arith.constant 1 : index
    %8 = vector.load %arg2[%c0_8, %c0_9, %c0_10, %c1_11] : memref<1x1x84x43xbf16, #tpu.memory_space<vmem>>, vector<1x1x84x37xbf16>
    %9 = vector.shape_cast %8 : vector<1x1x84x37xbf16> to vector<84x37xbf16>
    %10 = arith.extf %9 : vector<84x37xbf16> to vector<84x37xf32>
    %cst_12 = arith.constant dense<0.000000e+00> : vector<256x37xf32>
    %11 = tpu.matmul %7, %10, %cst_12 {dimension_numbers = #tpu.dot_dimension_numbers<[1], [0], [0], [1], [0, 0, 1, 1], [], []>} : vector<256x84xf32>, vector<84x37xf32>, vector<256x37xf32> -> vector<256x37xf32>
    %12 = arith.addf %5, %11 : vector<256x37xf32>
    %c2 = arith.constant 2 : index
    %c0_13 = arith.constant 0 : index
    %c0_14 = arith.constant 0 : index
    %13 = vector.load %arg3[%c2, %c0_13, %c0_14] : memref<7x256x84xf32, #tpu.memory_space<vmem>>, vector<1x256x84xf32>
    %14 = vector.shape_cast %13 : vector<1x256x84xf32> to vector<256x84xf32>
    %c0_15 = arith.constant 0 : index
    %c0_16 = arith.constant 0 : index
    %c0_17 = arith.constant 0 : index
    %c2_18 = arith.constant 2 : index
    %15 = vector.load %arg2[%c0_15, %c0_16, %c0_17, %c2_18] : memref<1x1x84x43xbf16, #tpu.memory_space<vmem>>, vector<1x1x84x37xbf16>
    %16 = vector.shape_cast %15 : vector<1x1x84x37xbf16> to vector<84x37xbf16>
    %17 = arith.extf %16 : vector<84x37xbf16> to vector<84x37xf32>
    %cst_19 = arith.constant dense<0.000000e+00> : vector<256x37xf32>
    %18 = tpu.matmul %14, %17, %cst_19 {dimension_numbers = #tpu.dot_dimension_numbers<[1], [0], [0], [1], [0, 0, 1, 1], [], []>} : vector<256x84xf32>, vector<84x37xf32>, vector<256x37xf32> -> vector<256x37xf32>
    %19 = arith.addf %12, %18 : vector<256x37xf32>
    %c3 = arith.constant 3 : index
    %c0_20 = arith.constant 0 : index
    %c0_21 = arith.constant 0 : index
    %20 = vector.load %arg3[%c3, %c0_20, %c0_21] : memref<7x256x84xf32, #tpu.memory_space<vmem>>, vector<1x256x84xf32>
    %21 = vector.shape_cast %20 : vector<1x256x84xf32> to vector<256x84xf32>
    %c0_22 = arith.constant 0 : index
    %c0_23 = arith.constant 0 : index
    %c0_24 = arith.constant 0 : index
    %c3_25 = arith.constant 3 : index
    %22 = vector.load %arg2[%c0_22, %c0_23, %c0_24, %c3_25] : memref<1x1x84x43xbf16, #tpu.memory_space<vmem>>, vector<1x1x84x37xbf16>
    %23 = vector.shape_cast %22 : vector<1x1x84x37xbf16> to vector<84x37xbf16>
    %24 = arith.extf %23 : vector<84x37xbf16> to vector<84x37xf32>
    %cst_26 = arith.constant dense<0.000000e+00> : vector<256x37xf32>
    %25 = tpu.matmul %21, %24, %cst_26 {dimension_numbers = #tpu.dot_dimension_numbers<[1], [0], [0], [1], [0, 0, 1, 1], [], []>} : vector<256x84xf32>, vector<84x37xf32>, vector<256x37xf32> -> vector<256x37xf32>
    %26 = arith.addf %19, %25 : vector<256x37xf32>
    %c4 = arith.constant 4 : index
    %c0_27 = arith.constant 0 : index
    %c0_28 = arith.constant 0 : index
    %27 = vector.load %arg3[%c4, %c0_27, %c0_28] : memref<7x256x84xf32, #tpu.memory_space<vmem>>, vector<1x256x84xf32>
    %28 = vector.shape_cast %27 : vector<1x256x84xf32> to vector<256x84xf32>
    %c0_29 = arith.constant 0 : index
    %c0_30 = arith.constant 0 : index
    %c0_31 = arith.constant 0 : index
    %c4_32 = arith.constant 4 : index
    %29 = vector.load %arg2[%c0_29, %c0_30, %c0_31, %c4_32] : memref<1x1x84x43xbf16, #tpu.memory_space<vmem>>, vector<1x1x84x37xbf16>
    %30 = vector.shape_cast %29 : vector<1x1x84x37xbf16> to vector<84x37xbf16>
    %31 = arith.extf %30 : vector<84x37xbf16> to vector<84x37xf32>
    %cst_33 = arith.constant dense<0.000000e+00> : vector<256x37xf32>
    %32 = tpu.matmul %28, %31, %cst_33 {dimension_numbers = #tpu.dot_dimension_numbers<[1], [0], [0], [1], [0, 0, 1, 1], [], []>} : vector<256x84xf32>, vector<84x37xf32>, vector<256x37xf32> -> vector<256x37xf32>
    %33 = arith.addf %26, %32 : vector<256x37xf32>
    %c5 = arith.constant 5 : index
    %c0_34 = arith.constant 0 : index
    %c0_35 = arith.constant 0 : index
    %34 = vector.load %arg3[%c5, %c0_34, %c0_35] : memref<7x256x84xf32, #tpu.memory_space<vmem>>, vector<1x256x84xf32>
    %35 = vector.shape_cast %34 : vector<1x256x84xf32> to vector<256x84xf32>
    %c0_36 = arith.constant 0 : index
    %c0_37 = arith.constant 0 : index
    %c0_38 = arith.constant 0 : index
    %c5_39 = arith.constant 5 : index
    %36 = vector.load %arg2[%c0_36, %c0_37, %c0_38, %c5_39] : memref<1x1x84x43xbf16, #tpu.memory_space<vmem>>, vector<1x1x84x37xbf16>
    %37 = vector.shape_cast %36 : vector<1x1x84x37xbf16> to vector<84x37xbf16>
    %38 = arith.extf %37 : vector<84x37xbf16> to vector<84x37xf32>
    %cst_40 = arith.constant dense<0.000000e+00> : vector<256x37xf32>
    %39 = tpu.matmul %35, %38, %cst_40 {dimension_numbers = #tpu.dot_dimension_numbers<[1], [0], [0], [1], [0, 0, 1, 1], [], []>} : vector<256x84xf32>, vector<84x37xf32>, vector<256x37xf32> -> vector<256x37xf32>
    %40 = arith.addf %33, %39 : vector<256x37xf32>
    %c6 = arith.constant 6 : index
    %c0_41 = arith.constant 0 : index
    %c0_42 = arith.constant 0 : index
    %41 = vector.load %arg3[%c6, %c0_41, %c0_42] : memref<7x256x84xf32, #tpu.memory_space<vmem>>, vector<1x256x84xf32>
    %42 = vector.shape_cast %41 : vector<1x256x84xf32> to vector<256x84xf32>
    %c0_43 = arith.constant 0 : index
    %c0_44 = arith.constant 0 : index
    %c0_45 = arith.constant 0 : index
    %c6_46 = arith.constant 6 : index
    %43 = vector.load %arg2[%c0_43, %c0_44, %c0_45, %c6_46] : memref<1x1x84x43xbf16, #tpu.memory_space<vmem>>, vector<1x1x84x37xbf16>
    %44 = vector.shape_cast %43 : vector<1x1x84x37xbf16> to vector<84x37xbf16>
    %45 = arith.extf %44 : vector<84x37xbf16> to vector<84x37xf32>
    %cst_47 = arith.constant dense<0.000000e+00> : vector<256x37xf32>
    %46 = tpu.matmul %42, %45, %cst_47 {dimension_numbers = #tpu.dot_dimension_numbers<[1], [0], [0], [1], [0, 0, 1, 1], [], []>} : vector<256x84xf32>, vector<84x37xf32>, vector<256x37xf32> -> vector<256x37xf32>
    %47 = arith.addf %40, %46 : vector<256x37xf32>
    %c0_48 = arith.constant 0 : index
    %c0_49 = arith.constant 0 : index
    %48 = vector.load %arg4[%c0_48, %c0_49] : memref<256x1xf32, #tpu.memory_space<vmem>>, vector<256x1xf32>
    %49 = vector.broadcast %48 : vector<256x1xf32> to vector<256x37xf32>
    %50 = arith.mulf %47, %49 : vector<256x37xf32>
    %c0_50 = arith.constant 0 : index
    %c0_51 = arith.constant 0 : index
    %51 = vector.load %arg5[%c0_50, %c0_51] : memref<256x1xf32, #tpu.memory_space<vmem>>, vector<256x1xf32>
    %52 = vector.broadcast %51 : vector<256x1xf32> to vector<256x37xf32>
    %53 = arith.addf %50, %52 : vector<256x37xf32>
    %cst_52 = arith.constant 0.000000e+00 : f32
    %54 = vector.broadcast %cst_52 : f32 to vector<256x37xf32>
    %55 = arith.subf %54, %53 : vector<256x37xf32>
    %56 = math.exp %55 : vector<256x37xf32>
    %cst_53 = arith.constant 1.000000e+00 : f32
    %57 = vector.broadcast %cst_53 : f32 to vector<256x37xf32>
    %58 = arith.addf %57, %56 : vector<256x37xf32>
    %cst_54 = arith.constant 1.000000e+00 : f32
    %59 = vector.broadcast %cst_54 : f32 to vector<256x37xf32>
    %60 = arith.divf %59, %58 : vector<256x37xf32>
    %61 = vector.shape_cast %60 : vector<256x37xf32> to vector<32x8x37xf32>
    %c0_55 = arith.constant 0 : index
    %c0_56 = arith.constant 0 : index
    %c0_57 = arith.constant 0 : index
    %c0_58 = arith.constant 0 : index
    %62 = vector.load %arg6[%c0_55, %c0_56, %c0_57, %c0_58] : memref<1x32x8x37xf32, #tpu.memory_space<vmem>>, vector<1x32x8x37xf32>
    %63 = vector.shape_cast %62 : vector<1x32x8x37xf32> to vector<32x8x37xf32>
    %64 = vector.shape_cast %61 : vector<32x8x37xf32> to vector<1x32x8x37xf32>
    tpu.vector_store %arg6[%c0_55, %c0_56, %c0_57, %c0_58], %64 {strides = array<i32>} : memref<1x32x8x37xf32, #tpu.memory_space<vmem>>, vector<1x32x8x37xf32>,
    return
  }
  func.func @transform_0(%arg0: i32, %arg1: i32) -> (i32, i32, i32, i32) {
    %c0_i32 = arith.constant 0 : i32
    %c0_i32_0 = arith.constant 0 : i32
    %c0_i32_1 = arith.constant 0 : i32
    return %arg0, %arg1, %c0_i32, %c0_i32_0 : i32, i32, i32, i32
  }
  func.func @transform_1(%arg0: i32, %arg1: i32) -> (i32, i32, i32) {
    %c0_i32 = arith.constant 0 : i32
    %c0_i32_0 = arith.constant 0 : i32
    %c0_i32_1 = arith.constant 0 : i32
    %c0_i32_2 = arith.constant 0 : i32
    return %c0_i32, %c0_i32_0, %c0_i32_1 : i32, i32, i32
  }
  func.func @transform_2(%arg0: i32, %arg1: i32) -> (i32, i32) {
    %c0_i32 = arith.constant 0 : i32
    %c0_i32_0 = arith.constant 0 : i32
    %c0_i32_1 = arith.constant 0 : i32
    return %c0_i32, %c0_i32_0 : i32, i32
  }
  func.func @transform_3(%arg0: i32, %arg1: i32) -> (i32, i32) {
    %c0_i32 = arith.constant 0 : i32
    %c0_i32_0 = arith.constant 0 : i32
    %c0_i32_1 = arith.constant 0 : i32
    return %c0_i32, %c0_i32_0 : i32, i32
  }
  func.func @transform_4(%arg0: i32, %arg1: i32) -> (i32, i32, i32, i32) {
    %c0_i32 = arith.constant 0 : i32
    %c0_i32_0 = arith.constant 0 : i32
    %c0_i32_1 = arith.constant 0 : i32
    return %arg0, %c0_i32, %arg1, %c0_i32_0 : i32, i32, i32, i32
  }
}

</mosaic_0001>

<bundles_post_ra>
// kernel: model_forward.2
= control target key start
LH: loop header
LB: loop body
LE: loop exit
PB: predicated region body
PF: predicated region fallthrough
CT: control target
= control target key end

     0   :  { %s3544_s9 = smov 0   ;;  %s3546_s10 = smov 0   ;;  %s5127_s0 = inlined_call_operand.vmem [shape: bf16[1,5,84,43], index: 0, kind: input, shape index: {}]   ;;  %s5128_s1 = inlined_call_operand.vmem [shape: f32[7,256,84], index: 1, kind: input, shape index: {}]   ;;  %s5129_s2 = inlined_call_operand.vmem [shape: f32[1,5,32,2], index: 2, kind: output, shape index: {}]  }
   0x1   :  { %s3548_s11 = smov 0  }
   0x2 LB: > { %s21_s12 = sadd.s32 1, %s3517_s10  ;;  %p2831_p0 = scmp.ge.s32.totalorder %s3521_s11, 1  ;;  %s3521_s11 = sphi %s3548_s11, %s12_s11   ;;  %s3517_s10 = sphi %s3546_s10, %s5131_s10   ;;  %s3513_s9 = sphi %s3544_s9, %s5130_s9  }
   0x3   : > { %p22_p1 = scmp.ge.s32.totalorder %s21_s12, 5  ;;  %p132_p2 = scmp.lt.s32.totalorder %s3521_s11, 6 }
   0x5   : > { %s5133_s12 = smov (%p22_p1, %s21_s12), 0  ;;  %p133_p3 = pnand %p2831_p0, %p132_p2 }
   0x6   : > { %p164_p4 = scmp.lt.s32.totalorder (!%p133_p3), %s3513_s9, 4  ;;  %s3523_s17 = smov (!%p133_p3), 126  }
   0x7   : > { %136 = sbr.rel (%p133_p3) target bundleno = 997 (0x3e5), region = 28  ;;  %s3524_s18 = smov (!%p133_p3), 127  }
   0x8   : > { %s3525_s19 = smov (!%p133_p3), 125   ;;  %s3526_s20 = smov (!%p133_p3), 122  }
   0x9   : > { %s3527_s21 = smov (!%p133_p3), 124   ;;  %s3528_s22 = smov (!%p133_p3), 123  }
   0xc   : > { %s5135_s9 = smov (!%p164_p4, %s3513_s9), 4  ;;  %vm407_vm0 = vcmask 1043456   ;;  %v180_v33 = vld [vmem:[%s5128_s1] sm:$0xff]  ;;  %vm310_vm1 = vcmask 687104   ;;  %v181_v40 = vld [vmem:[%s5128_s1 + $0x8] sm:$0xff]  ;;  %v182_v54 = vld [vmem:[%s5128_s1 + $0x10] sm:$0xff] }
   0xd   : > { %s3318_s13 = smul.u32 44, %s5135_s9  ;;  %v2859_v60 = vld [vmem:[%s5128_s1 + $0x1c0] sm:$0xff]  ;;  %vm2274_vm2 = vcmask 302080   ;;  %vm2437_vm3 = vcmask 1041409   ;;  %vm2439_vm4 = vcmask 1042434   ;;  %vm2441_vm5 = vcmask 1043459  }
   0xe   : > { %v2835_v62 = vld [vmem:[%s5128_s1 + $0x100] sm:$0xff]  ;;  %vm2443_vm6 = vcmask 1044484   ;;  %vm2445_vm7 = vcmask 1045509   ;;  %vm2447_vm8 = vcmask 1046534   ;;  %vm2449_vm9 = vcmask 1047559  }
   0xf   : > { %s170_s16 = scalar_lea.vmem %s5127_s0, %s3318_s13  ;;  %vm2476_vm10 = vcmask 64512   ;;  %vm2725_vm11 = vcmask 7168   ;;  %vm2730_vm12 = vcmask 15368  }
  0x10   : > { %v3284_v0 = vld [vmem:[%s170_s16 + $0x20] sm:$0xff]   ;;  %v222_v1 = vld [vmem:[%s170_s16 + $0x28] sm:$0x3]  ;;  %v3283_v2 = vld [vmem:[%s170_s16 + $0x18] sm:$0xff]  }
  0x11   : > { %v3568_v3 = vunpack.c.h.bf16 %v3284_v0  ;;  %v3570_v4 = vunpack.c.l.bf16 %v222_v1  ;;  %v3572_v5 = vunpack.c.l.bf16 %v3284_v0  ;;  %v3574_v6 = vunpack.c.h.bf16 %v3283_v2  ;;  %v3282_v7 = vld [vmem:[%s170_s16 + $0x10] sm:$0xff]   ;;  %v3281_v12 = vld [vmem:[%s170_s16 + $0x8] sm:$0xff]   ;;  %v3262_v16 = vld [vmem:[%s170_s16] sm:$0xff]   ;;  %s3260_s16 = sshll.u32 %s5135_s9, 5 }
  0x12   : > { %v3580_v10 = vunpack.c.h.bf16 %v3282_v7  ;;  %v3582_v11 = vunpack.c.l.bf16 %v3283_v2  ;;  %v3584_v13 = vunpack.c.h.bf16 %v3281_v12  ;;  %v3586_v14 = vunpack.c.l.bf16 %v3282_v7  ;;  %v2933_v0 = vld [vmem:[%s5128_s1 + $0x200] sm:$0xff]  ;;  %v183_v1 = vld [vmem:[%s5128_s1 + $0x18] sm:$0xff] }
  0x13   : > { %v3359_v8 = vpack.i.bf16 %v3568_v3, %v3570_v4  ;;  %v3369_v9 = vpack.i.bf16 %v3574_v6, %v3572_v5  ;;  %v3594_v18 = vunpack.c.h.bf16 %v3262_v16  ;;  %v3596_v19 = vunpack.c.l.bf16 %v3281_v12  ;;  %2900 = vmatpush.msk.msra.mxu1 %vm407_vm0, %v3570_v4 }
  0x14   : > { %v3364_v15 = vpack.i.bf16 %v3580_v10, %v3582_v11  ;;  %v3592_v17 = vpack.i.bf16 %v3584_v13, %v3586_v14  ;;  %v3605_v21 = vunpack.c.l.bf16 %v3262_v16 }
  0x15   : > { %3360 = vrot.lane.b32.xlu1 %v3359_v8, %s3523_s17  ;;  %3350 = vrot.lane.b32.xlu0 %v3359_v8, %s3524_s18  ;;  %v3601_v20 = vpack.i.bf16 %v3594_v18, %v3596_v19 }
  0x16   : > { %3370 = vrot.lane.b32.xlu2 %v3369_v9, %s3523_s17  ;;  %627 = vmatpush.msra.mxu1 %v3568_v3 }
  0x18   : > { %628 = vmatpush.msra.mxu1 %v3572_v5 }
  0x1a   : > { %629 = vmatpush.msra.mxu1 %v3574_v6 }
  0x1c   : > { %630 = vmatpush.msra.mxu1 %v3582_v11 }
  0x1d   : > { %3355 = vrot.lane.b32.xlu0 %v3369_v9, %s3524_s18  ;;  %3365 = vrot.lane.b32.xlu1 %v3364_v15, %s3524_s18 }
  0x1e   : > { %3375 = vrot.lane.b32.xlu2 %v3592_v17, %s3524_s18  ;;  %631 = vmatpush.msra.mxu1 %v3580_v10 }
  0x20   : > { %632 = vmatpush.msra.mxu1 %v3586_v14 }
  0x22   : > { %633 = vmatpush.msra.mxu1 %v3584_v13 }
  0x24   : > { %634 = vmatpush.msra.mxu1 %v3596_v19 }
  0x25   : > { %3380 = vrot.lane.b32.xlu0 %v3364_v15, %s3523_s17  ;;  %3385 = vrot.lane.b32.xlu1 %v3601_v20, %s3524_s18 }
  0x26   : > { %3390 = vrot.lane.b32.xlu2 %v3592_v17, %s3523_s17  ;;  %635 = vmatpush.msra.mxu1 %v3594_v18 }
  0x28   : > { %636 = vmatpush.msra.mxu1 %v3605_v21 }
  0x29   : > { %2901 = vmatmul.msk.f32.vlgmr.msra.gmra.mxu1 %vm310_vm1, %v180_v33  ;;  %v2838_v33 = vld [vmem:[%s5128_s1 + $0x118] sm:$0xff] }
  0x2d   : > { %3395 = vrot.lane.b32.xlu1 %v3601_v20, %s3523_s17  ;;  %278 = vrot.lane.b32.xlu0 %v3605_v21, %s3524_s18 }
  0x2e   : > { %767 = vrot.lane.b32.xlu2 %v3605_v21, %s3523_s17 }
  0x31   : > { %2902 = vmatmul.msk.f32.gmra.mxu1 %vm310_vm1, %v181_v40  ;;  %v188_v40 = vld [vmem:[%s5128_s1 + $0x40] sm:$0xff] }
  0x35   : > { %3405 = vrot.lane.b32.xlu1 %v3369_v9, %s3525_s19  ;;  %3400 = vrot.lane.b32.xlu0 %v3359_v8, %s3525_s19 }
  0x36   : > { %3410 = vrot.lane.b32.xlu2 %v3359_v8, %s3526_s20 }
  0x39   : > { %2903 = vmatmul.msk.f32.gmra.mxu1 %vm310_vm1, %v182_v54  ;;  %v2940_v54 = vld [vmem:[%s5128_s1 + $0x238] sm:$0xff] }
  0x3d   : > { %3420 = vrot.lane.b32.xlu1 %v3359_v8, %s3527_s21  ;;  %3415 = vrot.lane.b32.xlu0 %v3364_v15, %s3525_s19 }
  0x3e   : > { %3425 = vrot.lane.b32.xlu2 %v3359_v8, %s3528_s22  ;;  %v2836_v8 = vld [vmem:[%s5128_s1 + $0x108] sm:$0xff] }
  0x41   : > { %2904 = vmatmul.msk.f32.gmra.mxu1 %vm310_vm1, %v183_v1  ;;  %v205_v1 = vld [vmem:[%s5128_s1 + $0xc8] sm:$0xff] }
  0x45   : > { %3430 = vrot.lane.b32.xlu0 %v3369_v9, %s3526_s20  ;;  %3435 = vrot.lane.b32.xlu1 %v3592_v17, %s3525_s19 }
  0x46   : > { %3440 = vrot.lane.b32.xlu2 %v3369_v9, %s3527_s21 }
  0x4d   : > { %3445 = vrot.lane.b32.xlu0 %v3369_v9, %s3528_s22  ;;  %3450 = vrot.lane.b32.xlu1 %v3364_v15, %s3526_s20 }
  0x4e   : > { %3455 = vrot.lane.b32.xlu2 %v3601_v20, %s3525_s19 }
  0x55   : > { %3460 = vrot.lane.b32.xlu0 %v3364_v15, %s3527_s21  ;;  %3465 = vrot.lane.b32.xlu1 %v3364_v15, %s3528_s22 }
  0x56   : > { %3470 = vrot.lane.b32.xlu2 %v3592_v17, %s3526_s20 }
  0x5d   : > { %1075 = vrot.lane.b32.xlu0 %v3605_v21, %s3525_s19  ;;  %3475 = vrot.lane.b32.xlu1 %v3592_v17, %s3527_s21  ;;  %s5038_s19 = scalar_lea.vmem %s5129_s2, %s3260_s16 }
  0x5e   : > { %3480 = vrot.lane.b32.xlu2 %v3592_v17, %s3528_s22  ;;  %v2837_v17 = vld [vmem:[%s5128_s1 + $0x110] sm:$0xff] }
  0x65   : > { %3485 = vrot.lane.b32.xlu0 %v3601_v20, %s3526_s20  ;;  %3490 = vrot.lane.b32.xlu1 %v3601_v20, %s3527_s21 }
  0x66   : > { %3495 = vrot.lane.b32.xlu2 %v3601_v20, %s3528_s22  ;;  %v2839_v20 = vld [vmem:[%s5128_s1 + $0x120] sm:$0xff] }
  0x6d   : > { %1999 = vrot.lane.b32.xlu0 %v3605_v21, %s3526_s20  ;;  %1383 = vrot.lane.b32.xlu1 %v3605_v21, %s3527_s21 }
  0x6e   : > { %1691 = vrot.lane.b32.xlu2 %v3605_v21, %s3528_s22 }
  0x70   : > { %v3631_v22 = vpop.permute.xlu2 %3370 }
  0x71   : > { %v3372_v31 = vunpack.i.l.bf16 %v3631_v22  ;;  %v3373_v34 = vunpack.i.h.bf16 %v3631_v22  ;;  %v2937_v22 = vld [vmem:[%s5128_s1 + $0x220] sm:$0xff] }
  0x78   : > { %v3376_v23 = vpop.permute.xlu2 %3375 }
  0x79   : > { %v3377_v45 = vunpack.i.l.bf16 %v3376_v23  ;;  %v3378_v51 = vunpack.i.h.bf16 %v3376_v23  ;;  %v2935_v23 = vld [vmem:[%s5128_s1 + $0x210] sm:$0xff] }
  0x80   : > { %v3640_v24 = vpop.permute.xlu2 %3390 }
  0x81   : > { %v3392_v52 = vunpack.i.l.bf16 %v3640_v24  ;;  %v3393_v55 = vunpack.i.h.bf16 %v3640_v24 }
  0x87   : > { %v3644_v25 = vpop.permute.xlu1 %3360  ;;  %v3351_v26 = vpop.permute.xlu0 %3350 }
  0x88   : > { %v3362_v27 = vunpack.i.l.bf16 %v3644_v25  ;;  %v3363_v28 = vunpack.i.h.bf16 %v3644_v25  ;;  %v3352_v29 = vunpack.i.l.bf16 %v3351_v26  ;;  %v3648_v30 = vpop.permute.xlu2 %767  ;;  %v3353_v32 = vunpack.i.h.bf16 %v3351_v26 }
  0x8a   : > { %2965 = vmatpush.msk.msra.mxu2 %vm407_vm0, %v3362_v27  ;;  %2867 = vmatpush.msk.msra.mxu0 %vm407_vm0, %v3352_v29 }
  0x8b   : > { %3285 = vmatpush.msk.msra.mxu3 %vm407_vm0, %v3352_v29 }
  0x8c   : > { %903 = vmatpush.msra.mxu2 %v3363_v28  ;;  %416 = vmatpush.msra.mxu0 %v3353_v32 }
  0x8d   : > { %3286 = vmatpush.msra.mxu3 %v3353_v32 }
  0x8e   : > { %904 = vmatpush.msra.mxu2 %v3372_v31 }
  0x8f   : > { %v3356_v35 = vpop.permute.xlu0 %3355  ;;  %v3366_v36 = vpop.permute.xlu1 %3365 }
  0x90   : > { %905 = vmatpush.msra.mxu2 %v3373_v34  ;;  %v3357_v37 = vunpack.i.l.bf16 %v3356_v35  ;;  %v3667_v38 = vpop.permute.xlu2 %3410  ;;  %v3358_v39 = vunpack.i.h.bf16 %v3356_v35  ;;  %v3367_v41 = vunpack.i.l.bf16 %v3366_v36  ;;  %v3368_v42 = vunpack.i.h.bf16 %v3366_v36  ;;  %v186_v35 = vld [vmem:[%s5128_s1 + $0x30] sm:$0xff]  ;;  %v2863_v36 = vld [vmem:[%s5128_s1 + $0x1e0] sm:$0xff] }
  0x91   : > { %v3412_v63 = vunpack.i.l.bf16 %v3667_v38 }
  0x92   : > { %417 = vmatpush.msra.mxu0 %v3357_v37  ;;  %3287 = vmatpush.msra.mxu3 %v3357_v37  ;;  %v187_v37 = vld [vmem:[%s5128_s1 + $0x38] sm:$0xff] }
  0x94   : > { %418 = vmatpush.msra.mxu0 %v3358_v39  ;;  %3288 = vmatpush.msra.mxu3 %v3358_v39  ;;  %v2840_v39 = vld [vmem:[%s5128_s1 + $0x128] sm:$0xff] }
  0x96   : > { %419 = vmatpush.msra.mxu0 %v3367_v41  ;;  %3289 = vmatpush.msra.mxu3 %v3367_v41  ;;  %v2865_v41 = vld [vmem:[%s5128_s1 + $0x1f0] sm:$0xff] }
  0x97   : > { %v3675_v43 = vpop.permute.xlu0 %3380  ;;  %v3386_v44 = vpop.permute.xlu1 %3385 }
  0x98   : > { %420 = vmatpush.msra.mxu0 %v3368_v42  ;;  %3290 = vmatpush.msra.mxu3 %v3368_v42  ;;  %v3382_v46 = vunpack.i.l.bf16 %v3675_v43  ;;  %v3426_v47 = vpop.permute.xlu2 %3425  ;;  %v3383_v48 = vunpack.i.h.bf16 %v3675_v43  ;;  %v3387_v53 = vunpack.i.l.bf16 %v3386_v44  ;;  %v3388_v56 = vunpack.i.h.bf16 %v3386_v44  ;;  %v2841_v42 = vld [vmem:[%s5128_s1 + $0x130] sm:$0xff] }
  0x99   : > { %v3427_v49 = vunpack.i.l.bf16 %v3426_v47  ;;  %v3428_v50 = vunpack.i.h.bf16 %v3426_v47 }
  0x9a   : > { %421 = vmatpush.msra.mxu0 %v3377_v45  ;;  %3291 = vmatpush.msra.mxu3 %v3377_v45  ;;  %v2939_v45 = vld [vmem:[%s5128_s1 + $0x230] sm:$0xff] }
  0x9b   : > { %906 = vmatpush.msra.mxu2 %v3382_v46  ;;  %3160 = vmatpush.msk.msrb.mxu1 %vm407_vm0, %v3427_v49  ;;  %v189_v49 = vld [vmem:[%s5128_s1 + $0x48] sm:$0xff] }
  0x9c   : > { %422 = vmatpush.msra.mxu0 %v3378_v51  ;;  %3292 = vmatpush.msra.mxu3 %v3378_v51 }
  0x9d   : > { %907 = vmatpush.msra.mxu2 %v3383_v48  ;;  %1827 = vmatpush.msrb.mxu1 %v3428_v50 }
  0x9e   : > { %423 = vmatpush.msra.mxu0 %v3387_v53  ;;  %3293 = vmatpush.msra.mxu3 %v3387_v53  ;;  %v2842_v53 = vld [vmem:[%s5128_s1 + $0x138] sm:$0xff] }
  0x9f   : > { %908 = vmatpush.msra.mxu2 %v3392_v52  ;;  %v3693_v57 = vpop.permute.xlu1 %3395  ;;  %v279_v58 = vpop.permute.xlu0 %278 }
  0xa0   : > { %424 = vmatpush.msra.mxu0 %v3388_v56  ;;  %3294 = vmatpush.msra.mxu3 %v3388_v56  ;;  %v3397_v59 = vunpack.i.l.bf16 %v3693_v57  ;;  %v3398_v61 = vunpack.i.h.bf16 %v3693_v57  ;;  %v3441_v16 = vpop.permute.xlu2 %3440  ;;  %v204_v57 = vld [vmem:[%s5128_s1 + $0xc0] sm:$0xff] }
  0xa1   : > { %909 = vmatpush.msra.mxu2 %v3393_v55  ;;  %v3443_v26 = vunpack.i.h.bf16 %v3441_v16 }
  0xa2   : > { %3295 = vmatpush.msra.mxu3 %v279_v58  ;;  %425 = vmatpush.msra.mxu0 %v279_v58  ;;  %v2843_v58 = vld [vmem:[%s5128_s1 + $0x140] sm:$0xff] }
  0xa3   : > { %910 = vmatpush.msra.mxu2 %v3397_v59  ;;  %2892 = vmatmul.msk.f32.vlgmr.msra.gmra.mxu3 %vm310_vm1, %v2859_v60 }
  0xa4   : > { %3296 = vmatpush.msk.msrb.mxu3 %vm407_vm0, %v3570_v4  ;;  %2868 = vmatmul.msk.f32.vlgmr.msra.gmra.mxu0 %vm310_vm1, %v2835_v62  ;;  %v3413_v4 = vunpack.i.h.bf16 %v3667_v38  ;;  %v2864_v38 = vld [vmem:[%s5128_s1 + $0x1e8] sm:$0xff]  ;;  %v191_v62 = vld [vmem:[%s5128_s1 + $0x58] sm:$0xff] }
  0xa5   : > { %911 = vmatpush.msra.mxu2 %v3398_v61 }
  0xa6   : > { %3297 = vmatpush.msrb.mxu3 %v3568_v3  ;;  %v2860_v3 = vld [vmem:[%s5128_s1 + $0x1c8] sm:$0xff] }
  0xa7   : > { %912 = vmatpush.msra.mxu2 %v3648_v30  ;;  %v3725_v2 = vpop.permute.xlu1 %3405  ;;  %v3728_v7 = vpop.permute.xlu0 %3400 }
  0xa8   : > { %3298 = vmatpush.msrb.mxu3 %v3572_v5  ;;  %2966 = vmatmul.msk.f32.vlgmr.msra.gmra.mxu2 %vm310_vm1, %v2933_v0  ;;  %v2934_v5 = vld [vmem:[%s5128_s1 + $0x208] sm:$0xff]  ;;  %v3402_v56 = vunpack.i.l.bf16 %v3728_v7  ;;  %v3407_v60 = vunpack.i.l.bf16 %v3725_v2 }
  0xa9   : > { %3225 = vmatpush.msk.msrb.mxu2 %vm407_vm0, %v3412_v63  ;;  %v3408_v63 = vunpack.i.h.bf16 %v3725_v2 }
  0xaa   : > { %3299 = vmatpush.msrb.mxu3 %v3574_v6  ;;  %v184_v6 = vld [vmem:[%s5128_s1 + $0x20] sm:$0xff] }
  0xab   : > { %2893 = vmatmul.msk.f32.gmra.mxu3 %vm310_vm1, %v2860_v3  ;;  %2135 = vmatpush.msrb.mxu2 %v3413_v4  ;;  %v2844_v4 = vld [vmem:[%s5128_s1 + $0x148] sm:$0xff] }
  0xac   : > { %3300 = vmatpush.msrb.mxu3 %v3582_v11  ;;  %2869 = vmatmul.msk.f32.gmra.mxu0 %vm310_vm1, %v2836_v8  ;;  %v2861_v11 = vld [vmem:[%s5128_s1 + $0x1d0] sm:$0xff]  ;;  %v2942_v8 = vld [vmem:[%s5128_s1 + $0x248] sm:$0xff] }
  0xad   : > { %2905 = vmatmul.msk.f32.gmra.mxu1 %vm310_vm1, %v184_v6 }
  0xae   : > { %3301 = vmatpush.msrb.mxu3 %v3580_v10 }
  0xaf   : > { %v3421_v9 = vpop.permute.xlu1 %3420  ;;  %v3755_v12 = vpop.permute.xlu0 %3415 }
  0xb0   : > { %v3422_v15 = vunpack.i.l.bf16 %v3421_v9  ;;  %3302 = vmatpush.msrb.mxu3 %v3586_v14  ;;  %2967 = vmatmul.msk.f32.gmra.mxu2 %vm310_vm1, %v2934_v5  ;;  %v3423_v10 = vunpack.i.h.bf16 %v3421_v9  ;;  %v3442_v14 = vunpack.i.l.bf16 %v3441_v16  ;;  %v3417_v0 = vunpack.i.l.bf16 %v3755_v12  ;;  %v192_v5 = vld [vmem:[%s5128_s1 + $0x60] sm:$0xff]  ;;  %v206_v9 = vld [vmem:[%s5128_s1 + $0xd0] sm:$0xff] }
  0xb1   : > { %v3418_v3 = vunpack.i.h.bf16 %v3755_v12 }
  0xb2   : > { %3303 = vmatpush.msrb.mxu3 %v3584_v13  ;;  %3095 = vmatpush.msk.msrb.mxu0 %vm407_vm0, %v3422_v15  ;;  %v185_v13 = vld [vmem:[%s5128_s1 + $0x28] sm:$0xff]  ;;  %v2845_v15 = vld [vmem:[%s5128_s1 + $0x150] sm:$0xff] }
  0xb3   : > { %2894 = vmatmul.msk.f32.gmra.mxu3 %vm310_vm1, %v2861_v11 }
  0xb4   : > { %3304 = vmatpush.msrb.mxu3 %v3596_v19  ;;  %1519 = vmatpush.msrb.mxu0 %v3423_v10 }
  0xb5   : > { %2870 = vmatmul.msk.f32.gmra.mxu0 %vm310_vm1, %v2837_v17  ;;  %2906 = vmatmul.msk.f32.gmra.mxu1 %vm310_vm1, %v185_v13  ;;  %v2943_v17 = vld [vmem:[%s5128_s1 + $0x250] sm:$0xff] }
  0xb6   : > { %3305 = vmatpush.msrb.mxu3 %v3594_v18  ;;  %1520 = vmatpush.msrb.mxu0 %v3442_v14  ;;  %v2862_v18 = vld [vmem:[%s5128_s1 + $0x1d8] sm:$0xff] }
  0xb7   : > { %v3431_v29 = vpop.permute.xlu0 %3430 }
  0xb8   : > { %3306 = vmatpush.msrb.mxu3 %v3605_v21  ;;  %2968 = vmatmul.msk.f32.gmra.mxu2 %vm310_vm1, %v2935_v23  ;;  %v3432_v19 = vunpack.i.l.bf16 %v3431_v29  ;;  %v3433_v32 = vunpack.i.h.bf16 %v3431_v29  ;;  %v2938_v21 = vld [vmem:[%s5128_s1 + $0x228] sm:$0xff] }
  0xb9   : > { %1521 = vmatpush.msrb.mxu0 %v3443_v26  ;;  %v193_v23 = vld [vmem:[%s5128_s1 + $0x68] sm:$0xff]  ;;  %v207_v26 = vld [vmem:[%s5128_s1 + $0xd8] sm:$0xff] }
  0xba   : > { %3307 = vmatpush.msk.msra.mxu3 %vm407_vm0, %v3362_v27  ;;  %2136 = vmatpush.msrb.mxu2 %v3432_v19  ;;  %v2936_v27 = vld [vmem:[%s5128_s1 + $0x218] sm:$0xff] }
  0xbb   : > { %2895 = vmatmul.msk.f32.gmra.mxu3 %vm310_vm1, %v2862_v18  ;;  %v2846_v19 = vld [vmem:[%s5128_s1 + $0x158] sm:$0xff] }
  0xbc   : > { %3308 = vmatpush.msra.mxu3 %v3363_v28  ;;  %2137 = vmatpush.msrb.mxu2 %v3433_v32 }
  0xbd   : > { %2871 = vmatmul.msk.f32.gmra.mxu0 %vm310_vm1, %v2838_v33  ;;  %2907 = vmatmul.msk.f32.gmra.mxu1 %vm310_vm1, %v186_v35  ;;  %v2944_v35 = vld [vmem:[%s5128_s1 + $0x258] sm:$0xff] }
  0xbe   : > { %3309 = vmatpush.msra.mxu3 %v3372_v31 }
  0xbf   : > { %v3446_v25 = vpop.permute.xlu0 %3445 }
  0xc0   : > { %3310 = vmatpush.msra.mxu3 %v3373_v34  ;;  %2969 = vmatmul.msk.f32.gmra.mxu2 %vm310_vm1, %v2936_v27  ;;  %v3447_v28 = vunpack.i.l.bf16 %v3446_v25  ;;  %v3448_v31 = vunpack.i.h.bf16 %v3446_v25  ;;  %v3829_v34 = vpop.permute.xlu1 %3435  ;;  %v194_v25 = vld [vmem:[%s5128_s1 + $0x70] sm:$0xff] }
  0xc1   : > { %v3437_v2 = vunpack.i.l.bf16 %v3829_v34  ;;  %v3438_v6 = vunpack.i.h.bf16 %v3829_v34  ;;  %v2848_v34 = vld [vmem:[%s5128_s1 + $0x168] sm:$0xff] }
  0xc2   : > { %3311 = vmatpush.msra.mxu3 %v3382_v46  ;;  %1828 = vmatpush.msrb.mxu1 %v3447_v28  ;;  %v208_v28 = vld [vmem:[%s5128_s1 + $0xe0] sm:$0xff] }
  0xc3   : > { %2896 = vmatmul.msk.f32.gmra.mxu3 %vm310_vm1, %v2863_v36  ;;  %v2945_v36 = vld [vmem:[%s5128_s1 + $0x260] sm:$0xff] }
  0xc4   : > { %3312 = vmatpush.msra.mxu3 %v3383_v48  ;;  %1829 = vmatpush.msrb.mxu1 %v3448_v31  ;;  %v2847_v31 = vld [vmem:[%s5128_s1 + $0x160] sm:$0xff] }
  0xc5   : > { %2872 = vmatmul.msk.f32.gmra.mxu0 %vm310_vm1, %v2839_v20  ;;  %2908 = vmatmul.msk.f32.gmra.mxu1 %vm310_vm1, %v187_v37  ;;  %v195_v20 = vld [vmem:[%s5128_s1 + $0x78] sm:$0xff]  ;;  %v638_v37 = vpop.f32.mrf.mxu1 }
  0xc6   : > { %3313 = vmatpush.msra.mxu3 %v3392_v52  ;;  %v2866_v52 = vld [vmem:[%s5128_s1 + $0x1f8] sm:$0xff] }
  0xc7   : > { %v3461_v44 = vpop.permute.xlu0 %3460 }
  0xc8   : > { %3314 = vmatpush.msra.mxu3 %v3393_v55  ;;  %2970 = vmatmul.msk.f32.gmra.mxu2 %vm310_vm1, %v2937_v22  ;;  %v3451_v24 = vpop.permute.xlu1 %3450  ;;  %v3462_v47 = vunpack.i.l.bf16 %v3461_v44  ;;  %v3463_v48 = vunpack.i.h.bf16 %v3461_v44  ;;  %v190_v55 = vld [vmem:[%s5128_s1 + $0x50] sm:$0xff]  ;;  %v209_v22 = vld [vmem:[%s5128_s1 + $0xe8] sm:$0xff] }
  0xc9   : > { %v3453_v43 = vunpack.i.h.bf16 %v3451_v24 }
  0xca   : > { %3315 = vmatpush.msra.mxu3 %v3397_v59  ;;  %1522 = vmatpush.msrb.mxu0 %v3462_v47  ;;  %v3403_v59 = vunpack.i.h.bf16 %v3728_v7  ;;  %v3456_v7 = vpop.permute.xlu2 %3455 }
  0xcb   : > { %2897 = vmatmul.msk.f32.gmra.mxu3 %vm310_vm1, %v2864_v38  ;;  %v3457_v12 = vunpack.i.l.bf16 %v3456_v7  ;;  %v3458_v11 = vunpack.i.h.bf16 %v3456_v7  ;;  %v2946_v38 = vld [vmem:[%s5128_s1 + $0x268] sm:$0xff] }
  0xcc   : > { %3316 = vmatpush.msra.mxu3 %v3398_v61  ;;  %1523 = vmatpush.msrb.mxu0 %v3463_v48  ;;  %v2941_v61 = vld [vmem:[%s5128_s1 + $0x240] sm:$0xff]  ;;  %v2852_v7 = vld [vmem:[%s5128_s1 + $0x188] sm:$0xff] }
  0xcd   : > { %2873 = vmatmul.msk.f32.gmra.mxu0 %vm310_vm1, %v2840_v39  ;;  %2909 = vmatmul.msk.f32.gmra.mxu1 %vm310_vm1, %v188_v40  ;;  %v196_v39 = vld [vmem:[%s5128_s1 + $0x80] sm:$0xff]  ;;  %v2849_v40 = vld [vmem:[%s5128_s1 + $0x170] sm:$0xff] }
  0xce   : > { %3317 = vmatpush.msra.mxu3 %v3648_v30  ;;  %v3452_v30 = vunpack.i.l.bf16 %v3451_v24  ;;  %v210_v24 = vld [vmem:[%s5128_s1 + $0xf0] sm:$0xff] }
  0xd0   : > { %2971 = vmatmul.msk.f32.gmra.mxu2 %vm310_vm1, %v2938_v21  ;;  %v3466_v46 = vpop.permute.xlu1 %3465  ;;  %v1076_v21 = vpop.permute.xlu0 %1075 }
  0xd1   : > { %2138 = vmatpush.msrb.mxu2 %v3452_v30  ;;  %v3467_v50 = vunpack.i.l.bf16 %v3466_v46  ;;  %v3468_v51 = vunpack.i.h.bf16 %v3466_v46  ;;  %v2947_v30 = vld [vmem:[%s5128_s1 + $0x270] sm:$0xff] }
  0xd2   : > { %v3471_v10 = vpop.permute.xlu2 %3470 }
  0xd3   : > { %2898 = vmatmul.msk.f32.gmra.mxu3 %vm310_vm1, %v2865_v41  ;;  %2139 = vmatpush.msrb.mxu2 %v3453_v43  ;;  %v3472_v16 = vunpack.i.l.bf16 %v3471_v10  ;;  %v3473_v14 = vunpack.i.h.bf16 %v3471_v10  ;;  %v641_v41 = vpop.f32.mrf.mxu1  ;;  %v211_v43 = vld [vmem:[%s5128_s1 + $0xf8] sm:$0xff]  ;;  %v2853_v10 = vld [vmem:[%s5128_s1 + $0x190] sm:$0xff] }
  0xd4   : > { %1830 = vmatpush.msrb.mxu1 %v3467_v50 }
  0xd5   : > { %2874 = vmatmul.msk.f32.gmra.mxu0 %vm310_vm1, %v2841_v42  ;;  %2910 = vmatmul.msk.f32.gmra.mxu1 %vm310_vm1, %v189_v49  ;;  %v197_v42 = vld [vmem:[%s5128_s1 + $0x88] sm:$0xff] }
  0xd6   : > { %1831 = vmatpush.msrb.mxu1 %v3468_v51  ;;  %2140 = vmatpush.msrb.mxu2 %v3472_v16  ;;  %v2948_v51 = vld [vmem:[%s5128_s1 + $0x278] sm:$0xff] }
  0xd8   : > { %2972 = vmatmul.msk.f32.gmra.mxu2 %vm310_vm1, %v2939_v45  ;;  %v3476_v13 = vpop.permute.xlu1 %3475  ;;  %v3486_v44 = vpop.permute.xlu0 %3485  ;;  %v2850_v45 = vld [vmem:[%s5128_s1 + $0x178] sm:$0xff] }
  0xd9   : > { %2141 = vmatpush.msrb.mxu2 %v3473_v14  ;;  %v3477_v29 = vunpack.i.l.bf16 %v3476_v13  ;;  %v3478_v18 = vunpack.i.h.bf16 %v3476_v13  ;;  %v3487_v46 = vunpack.i.l.bf16 %v3486_v44  ;;  %v3488_v50 = vunpack.i.h.bf16 %v3486_v44  ;;  %v2951_v14 = vld [vmem:[%s5128_s1 + $0x290] sm:$0xff]  ;;  %v2962_v44 = vld [vmem:[%s5128_s1 + $0x2e8] sm:$0xff] }
  0xda   : > { %v3481_v32 = vpop.permute.xlu2 %3480 }
  0xdb   : > { %2899 = vmatmul.msk.f32.gmra.mxu3 %vm310_vm1, %v2866_v52  ;;  %1524 = vmatpush.msrb.mxu0 %v3477_v29  ;;  %v3482_v33 = vunpack.i.l.bf16 %v3481_v32  ;;  %v3483_v27 = vunpack.i.h.bf16 %v3481_v32  ;;  %v644_v49 = vpop.f32.mrf.mxu1 }
  0xdc   : > { %2142 = vmatpush.msrb.mxu2 %v3487_v46  ;;  %v2856_v46 = vld [vmem:[%s5128_s1 + $0x1a8] sm:$0xff] }
  0xdd   : > { %2875 = vmatmul.msk.f32.gmra.mxu0 %vm310_vm1, %v2842_v53  ;;  %2911 = vmatmul.msk.f32.gmra.mxu1 %vm310_vm1, %v190_v55  ;;  %v198_v53 = vld [vmem:[%s5128_s1 + $0x90] sm:$0xff] }
  0xde   : > { %1525 = vmatpush.msrb.mxu0 %v3478_v18  ;;  %1832 = vmatpush.msrb.mxu1 %v3482_v33  ;;  %v2854_v18 = vld [vmem:[%s5128_s1 + $0x198] sm:$0xff] }
  0xdf   : > { %2143 = vmatpush.msrb.mxu2 %v3488_v50 }
  0xe0   : > { %2973 = vmatmul.msk.f32.gmra.mxu2 %vm310_vm1, %v2940_v54  ;;  %1833 = vmatpush.msrb.mxu1 %v3483_v27  ;;  %v3491_v48 = vpop.permute.xlu1 %3490 }
  0xe1   : > { %v3492_v52 = vunpack.i.l.bf16 %v3491_v48  ;;  %v3493_v54 = vunpack.i.h.bf16 %v3491_v48 }
  0xe2   : > { %v3496_v47 = vpop.permute.xlu2 %3495 }
  0xe3   : > { %2925 = vmatmul.msk.f32.vlgmr.msrb.gmra.mxu3 %vm310_vm1, %v204_v57  ;;  %1526 = vmatpush.msrb.mxu0 %v3492_v52  ;;  %v3497_v55 = vunpack.i.l.bf16 %v3496_v47  ;;  %v2957_v57 = vld [vmem:[%s5128_s1 + $0x2c0] sm:$0xff] }
  0xe4   : > { %3030 = vmatpush.msk.msrb.mxu3 %vm407_vm0, %v3402_v56  ;;  %v3498_v56 = vunpack.i.h.bf16 %v3496_v47 }
  0xe5   : > { %2876 = vmatmul.msk.f32.gmra.mxu0 %vm310_vm1, %v2843_v58  ;;  %2912 = vmatmul.msk.f32.gmra.mxu1 %vm310_vm1, %v191_v62  ;;  %v647_v62 = vpop.f32.mrf.mxu1 }
  0xe6   : > { %1211 = vmatpush.msrb.mxu3 %v3403_v59  ;;  %1527 = vmatpush.msrb.mxu0 %v3493_v54  ;;  %v2851_v59 = vld [vmem:[%s5128_s1 + $0x180] sm:$0xff]  ;;  %v2963_v54 = vld [vmem:[%s5128_s1 + $0x2f0] sm:$0xff] }
  0xe7   : > { %1834 = vmatpush.msrb.mxu1 %v3497_v55 }
  0xe8   : > { %2974 = vmatmul.msk.f32.gmra.mxu2 %vm310_vm1, %v2941_v61  ;;  %1212 = vmatpush.msrb.mxu3 %v3407_v60  ;;  %v2949_v60 = vld [vmem:[%s5128_s1 + $0x280] sm:$0xff] }
  0xe9   : > { %1835 = vmatpush.msrb.mxu1 %v3498_v56  ;;  %v2857_v56 = vld [vmem:[%s5128_s1 + $0x1b0] sm:$0xff] }
  0xea   : > { %1213 = vmatpush.msrb.mxu3 %v3408_v63  ;;  %v199_v63 = vld [vmem:[%s5128_s1 + $0x98] sm:$0xff] }
  0xeb   : > { %2926 = vmatmul.msk.f32.gmra.mxu3 %vm310_vm1, %v205_v1  ;;  %v2958_v1 = vld [vmem:[%s5128_s1 + $0x2c8] sm:$0xff] }
  0xec   : > { %1214 = vmatpush.msrb.mxu3 %v3417_v0 }
  0xed   : > { %2877 = vmatmul.msk.f32.gmra.mxu0 %vm310_vm1, %v2844_v4  ;;  %2913 = vmatmul.msk.f32.gmra.mxu1 %vm310_vm1, %v192_v5 }
  0xee   : > { %1215 = vmatpush.msrb.mxu3 %v3418_v3 }
  0xf0   : > { %2975 = vmatmul.msk.f32.gmra.mxu2 %vm310_vm1, %v2942_v8  ;;  %1216 = vmatpush.msrb.mxu3 %v3437_v2  ;;  %v2950_v8 = vld [vmem:[%s5128_s1 + $0x288] sm:$0xff] }
  0xf2   : > { %1217 = vmatpush.msrb.mxu3 %v3438_v6 }
  0xf3   : > { %2927 = vmatmul.msk.f32.gmra.mxu3 %vm310_vm1, %v206_v9  ;;  %v200_v9 = vld [vmem:[%s5128_s1 + $0xa0] sm:$0xff] }
  0xf4   : > { %1218 = vmatpush.msrb.mxu3 %v3457_v12 }
  0xf5   : > { %2878 = vmatmul.msk.f32.gmra.mxu0 %vm310_vm1, %v2845_v15  ;;  %2914 = vmatmul.msk.f32.gmra.mxu1 %vm310_vm1, %v193_v23  ;;  %v2959_v15 = vld [vmem:[%s5128_s1 + $0x2d0] sm:$0xff] }
  0xf6   : > { %1219 = vmatpush.msrb.mxu3 %v3458_v11 }
  0xf8   : > { %2976 = vmatmul.msk.f32.gmra.mxu2 %vm310_vm1, %v2943_v17  ;;  %1220 = vmatpush.msrb.mxu3 %v1076_v21 }
  0xfb   : > { %2928 = vmatmul.msk.f32.gmra.mxu3 %vm310_vm1, %v207_v26  ;;  %v201_v26 = vld [vmem:[%s5128_s1 + $0xa8] sm:$0xff] }
  0xfd   : > { %2879 = vmatmul.msk.f32.gmra.mxu0 %vm310_vm1, %v2846_v19  ;;  %2915 = vmatmul.msk.f32.gmra.mxu1 %vm310_vm1, %v194_v25  ;;  %v2960_v19 = vld [vmem:[%s5128_s1 + $0x2d8] sm:$0xff] }
 0x100   : > { %2977 = vmatmul.msk.f32.gmra.mxu2 %vm310_vm1, %v2944_v35  ;;  %v2952_v35 = vld [vmem:[%s5128_s1 + $0x298] sm:$0xff] }
 0x103   : > { %2929 = vmatmul.msk.f32.gmra.mxu3 %vm310_vm1, %v208_v28  ;;  %v202_v28 = vld [vmem:[%s5128_s1 + $0xb0] sm:$0xff] }
 0x105   : > { %2880 = vmatmul.msk.f32.gmra.mxu0 %vm310_vm1, %v2847_v31  ;;  %2916 = vmatmul.msk.f32.gmra.mxu1 %vm310_vm1, %v195_v20 }
 0x108   : > { %2978 = vmatmul.msk.f32.gmra.mxu2 %vm310_vm1, %v2945_v36  ;;  %v2000_v36 = vpop.permute.xlu0 %1999 }
 0x109   : > { %2144 = vmatpush.msrb.mxu2 %v2000_v36  ;;  %v3064_v36 = vld [vmem:[%s5128_s1 + $0x408] sm:$0xff] }
 0x10b   : > { %2930 = vmatmul.msk.f32.gmra.mxu3 %vm310_vm1, %v209_v22  ;;  %v1384_v22 = vpop.permute.xlu1 %1383 }
 0x10c   : > { %1528 = vmatpush.msrb.mxu0 %v1384_v22 }
 0x10d   : > { %2881 = vmatmul.msk.f32.gmra.mxu0 %vm310_vm1, %v2848_v34  ;;  %2917 = vmatmul.msk.f32.gmra.mxu1 %vm310_vm1, %v196_v39  ;;  %v1692_v34 = vpop.permute.xlu2 %1691  ;;  %v2855_v39 = vld [vmem:[%s5128_s1 + $0x1a0] sm:$0xff] }
 0x10e   : > { %1836 = vmatpush.msrb.mxu1 %v1692_v34 }
 0x110   : > { %2979 = vmatmul.msk.f32.gmra.mxu2 %vm310_vm1, %v2946_v38 }
 0x113   : > { %2931 = vmatmul.msk.f32.gmra.mxu3 %vm310_vm1, %v210_v24 }
 0x115   : > { %2882 = vmatmul.msk.f32.gmra.mxu0 %vm310_vm1, %v2849_v40  ;;  %2918 = vmatmul.msk.f32.gmra.mxu1 %vm310_vm1, %v197_v42  ;;  %v2953_v40 = vld [vmem:[%s5128_s1 + $0x2a0] sm:$0xff] }
 0x118   : > { %2980 = vmatmul.msk.f32.gmra.mxu2 %vm310_vm1, %v2947_v30  ;;  %v203_v30 = vld [vmem:[%s5128_s1 + $0xb8] sm:$0xff] }
 0x11b   : > { %2932 = vmatmul.msk.f32.gmra.mxu3 %vm310_vm1, %v211_v43 }
 0x11d   : > { %2883 = vmatmul.msk.f32.gmra.mxu0 %vm310_vm1, %v2850_v45  ;;  %2919 = vmatmul.msk.f32.gmra.mxu1 %vm310_vm1, %v198_v53 }
 0x120   : > { %2981 = vmatmul.msk.f32.gmra.mxu2 %vm310_vm1, %v2948_v51  ;;  %v3128_v51 = vld [vmem:[%s5128_s1 + $0x500] sm:$0xff] }
 0x121   : > { %v427_v58 = vpop.f32.mrf.mxu0 }
 0x122   : > { %v639_v0 = vadd.f32 %v638_v37, %v427_v58  ;;  %v2961_v37 = vld [vmem:[%s5128_s1 + $0x2e0] sm:$0xff] }
 0x123   : > { %2990 = vmatmul.msk.f32.vlgmr.msra.gmra.mxu3 %vm310_vm1, %v2957_v57 }
 0x125   : > { %2884 = vmatmul.msk.f32.gmra.mxu0 %vm310_vm1, %v2851_v59  ;;  %2920 = vmatmul.msk.f32.gmra.mxu1 %vm310_vm1, %v199_v63  ;;  %v2955_v59 = vld [vmem:[%s5128_s1 + $0x2b0] sm:$0xff] }
 0x126   : > { %v4041_v61 = vpop.f32.mrf.mxu3 }
 0x128   : > { %2982 = vmatmul.msk.f32.gmra.mxu2 %vm310_vm1, %v2949_v60 }
 0x129   : > { %v430_v4 = vpop.f32.mrf.mxu0 }
 0x12a   : > { %v650_v6 = vpop.f32.mrf.mxu1  ;;  %v642_v12 = vadd.f32 %v641_v41, %v430_v4 }
 0x12b   : > { %v914_v3 = vpop.f32.mrf.mxu2  ;;  %2991 = vmatmul.msk.f32.gmra.mxu3 %vm310_vm1, %v2958_v1  ;;  %v2964_v1 = vld [vmem:[%s5128_s1 + $0x2f8] sm:$0xff] }
 0x12c   : > { %v4055_v2 = vadd.f32 %v914_v3, %v639_v0 }
 0x12d   : > { %2885 = vmatmul.msk.f32.gmra.mxu0 %vm310_vm1, %v2852_v7  ;;  %2921 = vmatmul.msk.f32.gmra.mxu1 %vm310_vm1, %v200_v9  ;;  %v2858_v7 = vld [vmem:[%s5128_s1 + $0x1b8] sm:$0xff] }
 0x12e   : > { %v4061_v5 = vpop.f32.mrf.mxu3 }
 0x130   : > { %2983 = vmatmul.msk.f32.gmra.mxu2 %vm310_vm1, %v2950_v8 }
 0x132   : > { %v433_v11 = vpop.f32.mrf.mxu0  ;;  %v653_v13 = vpop.f32.mrf.mxu1 }
 0x133   : > { %v917_v16 = vpop.f32.mrf.mxu2  ;;  %2992 = vmatmul.msk.f32.gmra.mxu3 %vm310_vm1, %v2959_v15  ;;  %v645_v29 = vadd.f32 %v644_v49, %v433_v11  ;;  %v2954_v49 = vld [vmem:[%s5128_s1 + $0x2a8] sm:$0xff] }
 0x134   : > { %v4075_v17 = vadd.f32 %v917_v16, %v642_v12  ;;  %v3130_v12 = vld [vmem:[%s5128_s1 + $0x510] sm:$0xff] }
 0x135   : > { %2886 = vmatmul.msk.f32.gmra.mxu0 %vm310_vm1, %v2853_v10  ;;  %2922 = vmatmul.msk.f32.gmra.mxu1 %vm310_vm1, %v201_v26  ;;  %v2998_v10 = vld [vmem:[%s5128_s1 + $0x300] sm:$0xff] }
 0x136   : > { %v4081_v23 = vpop.f32.mrf.mxu3 }
 0x138   : > { %2984 = vmatmul.msk.f32.gmra.mxu2 %vm310_vm1, %v2951_v14  ;;  %v3063_v14 = vld [vmem:[%s5128_s1 + $0x400] sm:$0xff] }
 0x13a   : > { %v436_v32 = vpop.f32.mrf.mxu0  ;;  %v656_v25 = vpop.f32.mrf.mxu1 }
 0x13b   : > { %v920_v33 = vpop.f32.mrf.mxu2  ;;  %2993 = vmatmul.msk.f32.gmra.mxu3 %vm310_vm1, %v2960_v19  ;;  %v648_v20 = vadd.f32 %v647_v62, %v436_v32  ;;  %v3129_v62 = vld [vmem:[%s5128_s1 + $0x508] sm:$0xff]  ;;  %v3131_v32 = vld [vmem:[%s5128_s1 + $0x518] sm:$0xff] }
 0x13c   : > { %v4095_v27 = vadd.f32 %v920_v33, %v645_v29  ;;  %v3193_v29 = vld [vmem:[%s5128_s1 + $0x600] sm:$0xff] }
 0x13d   : > { %2887 = vmatmul.msk.f32.gmra.mxu0 %vm310_vm1, %v2854_v18  ;;  %2923 = vmatmul.msk.f32.gmra.mxu1 %vm310_vm1, %v202_v28 }
 0x13e   : > { %v4104_v31 = vpop.f32.mrf.mxu3 }
 0x140   : > { %2985 = vmatmul.msk.f32.gmra.mxu2 %vm310_vm1, %v2952_v35 }
 0x142   : > { %v439_v38 = vpop.f32.mrf.mxu0  ;;  %v659_v41 = vpop.f32.mrf.mxu1 }
 0x143   : > { %v923_v21 = vpop.f32.mrf.mxu2  ;;  %2994 = vmatmul.msk.f32.gmra.mxu3 %vm310_vm1, %v2961_v37  ;;  %v651_v43 = vadd.f32 %v650_v6, %v439_v38  ;;  %v2956_v6 = vld [vmem:[%s5128_s1 + $0x2b8] sm:$0xff]  ;;  %v3132_v37 = vld [vmem:[%s5128_s1 + $0x520] sm:$0xff] }
 0x144   : > { %v4115_v24 = vadd.f32 %v923_v21, %v648_v20 }
 0x145   : > { %2888 = vmatmul.msk.f32.gmra.mxu0 %vm310_vm1, %v2855_v39  ;;  %2924 = vmatmul.msk.f32.gmra.mxu1 %vm310_vm1, %v203_v30  ;;  %v3065_v30 = vld [vmem:[%s5128_s1 + $0x410] sm:$0xff] }
 0x146   : > { %v4124_v42 = vpop.f32.mrf.mxu3 }
 0x148   : > { %2986 = vmatmul.msk.f32.gmra.mxu2 %vm310_vm1, %v2953_v40  ;;  %v3000_v40 = vld [vmem:[%s5128_s1 + $0x310] sm:$0xff] }
 0x14a   : > { %v442_v45 = vpop.f32.mrf.mxu0  ;;  %v662_v50 = vpop.f32.mrf.mxu1 }
 0x14b   : > { %v926_v47 = vpop.f32.mrf.mxu2  ;;  %2995 = vmatmul.msk.f32.gmra.mxu3 %vm310_vm1, %v2962_v44  ;;  %v654_v53 = vadd.f32 %v653_v13, %v442_v45 }
 0x14c   : > { %v4135_v48 = vadd.f32 %v926_v47, %v651_v43 }
 0x14d   : > { %2889 = vmatmul.msk.f32.gmra.mxu0 %vm310_vm1, %v2856_v46  ;;  %3161 = vmatmul.msk.f32.vlgmr.msrb.gmra.mxu1 %vm310_vm1, %v3128_v51  ;;  %v3133_v46 = vld [vmem:[%s5128_s1 + $0x528] sm:$0xff]  ;;  %v3001_v51 = vld [vmem:[%s5128_s1 + $0x318] sm:$0xff] }
 0x14e   : > { %v4144_v52 = vpop.f32.mrf.mxu3 }
 0x150   : > { %2987 = vmatmul.msk.f32.gmra.mxu2 %vm310_vm1, %v2954_v49 }
 0x152   : > { %v445_v55 = vpop.f32.mrf.mxu0  ;;  %v665_v60 = vpop.f32.mrf.mxu1 }
 0x153   : > { %v929_v57 = vpop.f32.mrf.mxu2  ;;  %2996 = vmatmul.msk.f32.gmra.mxu3 %vm310_vm1, %v2963_v54  ;;  %v657_v0 = vadd.f32 %v656_v25, %v445_v55  ;;  %v2999_v25 = vld [vmem:[%s5128_s1 + $0x308] sm:$0xff]  ;;  %v3066_v54 = vld [vmem:[%s5128_s1 + $0x418] sm:$0xff] }
 0x154   : > { %v4155_v58 = vadd.f32 %v929_v57, %v654_v53 }
 0x155   : > { %2890 = vmatmul.msk.f32.gmra.mxu0 %vm310_vm1, %v2857_v56  ;;  %3162 = vmatmul.msk.f32.gmra.mxu1 %vm310_vm1, %v3129_v62 }
 0x156   : > { %v4164_v63 = vpop.f32.mrf.mxu3 }
 0x158   : > { %2988 = vmatmul.msk.f32.gmra.mxu2 %vm310_vm1, %v2955_v59  ;;  %v3134_v59 = vld [vmem:[%s5128_s1 + $0x530] sm:$0xff] }
 0x15a   : > { %v448_v4 = vpop.f32.mrf.mxu0  ;;  %v668_v9 = vpop.f32.mrf.mxu1 }
 0x15b   : > { %v932_v3 = vpop.f32.mrf.mxu2  ;;  %2997 = vmatmul.msk.f32.gmra.mxu3 %vm310_vm1, %v2964_v1  ;;  %v660_v11 = vadd.f32 %v659_v41, %v448_v4  ;;  %v3002_v1 = vld [vmem:[%s5128_s1 + $0x320] sm:$0xff] }
 0x15c   : > { %v4175_v8 = vadd.f32 %v932_v3, %v657_v0 }
 0x15d   : > { %2891 = vmatmul.msk.f32.gmra.mxu0 %vm310_vm1, %v2858_v7  ;;  %3163 = vmatmul.msk.f32.gmra.mxu1 %vm310_vm1, %v3130_v12  ;;  %v3067_v7 = vld [vmem:[%s5128_s1 + $0x420] sm:$0xff]  ;;  %v3135_v12 = vld [vmem:[%s5128_s1 + $0x538] sm:$0xff] }
 0x15e   : > { %v4184_v15 = vpop.f32.mrf.mxu3 }
 0x160   : > { %2989 = vmatmul.msk.f32.gmra.mxu2 %vm310_vm1, %v2956_v6 }
 0x162   : > { %v451_v16 = vpop.f32.mrf.mxu0  ;;  %v671_v19 = vpop.f32.mrf.mxu1 }
 0x163   : > { %v935_v13 = vpop.f32.mrf.mxu2  ;;  %3031 = vmatmul.msk.f32.vlgmr.msrb.gmra.mxu3 %vm310_vm1, %v2998_v10  ;;  %v663_v35 = vadd.f32 %v662_v50, %v451_v16 }
 0x164   : > { %v4195_v26 = vadd.f32 %v935_v13, %v660_v11 }
 0x165   : > { %3096 = vmatmul.msk.f32.vlgmr.msrb.gmra.mxu0 %vm310_vm1, %v3063_v14  ;;  %3164 = vmatmul.msk.f32.gmra.mxu1 %vm310_vm1, %v3131_v32  ;;  %v3003_v14 = vld [vmem:[%s5128_s1 + $0x328] sm:$0xff] }
 0x166   : > { %v710_v18 = vpop.f32.mrf.mxu3 }
 0x167   : > { %v4205_v33 = vadd.f32 %v710_v18, %v4041_v61  ;;  %v3194_v61 = vld [vmem:[%s5128_s1 + $0x608] sm:$0xff] }
 0x168   : > { %3226 = vmatmul.msk.f32.vlgmr.msrb.gmra.mxu2 %vm310_vm1, %v3193_v29  ;;  %v3068_v29 = vld [vmem:[%s5128_s1 + $0x428] sm:$0xff] }
 0x16a   : > { %v454_v28 = vpop.f32.mrf.mxu0  ;;  %v674_v34 = vpop.f32.mrf.mxu1 }
 0x16b   : > { %v938_v20 = vpop.f32.mrf.mxu2  ;;  %3032 = vmatmul.msk.f32.gmra.mxu3 %vm310_vm1, %v2999_v25  ;;  %v666_v21 = vadd.f32 %v665_v60, %v454_v28 }
 0x16c   : > { %v4216_v22 = vadd.f32 %v938_v20, %v663_v35  ;;  %v3136_v35 = vld [vmem:[%s5128_s1 + $0x540] sm:$0xff]  ;;  %v3004_v20 = vld [vmem:[%s5128_s1 + $0x330] sm:$0xff] }
 0x16d   : > { %3097 = vmatmul.msk.f32.gmra.mxu0 %vm310_vm1, %v3064_v36  ;;  %3165 = vmatmul.msk.f32.gmra.mxu1 %vm310_vm1, %v3132_v37 }
 0x16e   : > { %v713_v38 = vpop.f32.mrf.mxu3 }
 0x16f   : > { %v4226_v39 = vadd.f32 %v713_v38, %v4061_v5  ;;  %v3195_v5 = vld [vmem:[%s5128_s1 + $0x610] sm:$0xff] }
 0x170   : > { %3227 = vmatmul.msk.f32.gmra.mxu2 %vm310_vm1, %v3194_v61 }
 0x172   : > { %v457_v41 = vpop.f32.mrf.mxu0  ;;  %v677_v45 = vpop.f32.mrf.mxu1 }
 0x173   : > { %v941_v43 = vpop.f32.mrf.mxu2  ;;  %3033 = vmatmul.msk.f32.gmra.mxu3 %vm310_vm1, %v3000_v40  ;;  %v669_v50 = vadd.f32 %v668_v9, %v457_v41  ;;  %v3137_v40 = vld [vmem:[%s5128_s1 + $0x548] sm:$0xff] }
 0x174   : > { %v4237_v44 = vadd.f32 %v941_v43, %v666_v21 }
 0x175   : > { %3098 = vmatmul.msk.f32.gmra.mxu0 %vm310_vm1, %v3065_v30  ;;  %3166 = vmatmul.msk.f32.gmra.mxu1 %vm310_vm1, %v3133_v46  ;;  %v3070_v46 = vld [vmem:[%s5128_s1 + $0x438] sm:$0xff] }
 0x176   : > { %v716_v47 = vpop.f32.mrf.mxu3 }
 0x177   : > { %v4247_v49 = vadd.f32 %v716_v47, %v4081_v23  ;;  %v3196_v23 = vld [vmem:[%s5128_s1 + $0x618] sm:$0xff] }
 0x178   : > { %3228 = vmatmul.msk.f32.gmra.mxu2 %vm310_vm1, %v3195_v5  ;;  %v3005_v5 = vld [vmem:[%s5128_s1 + $0x338] sm:$0xff] }
 0x17a   : > { %v460_v53 = vpop.f32.mrf.mxu0  ;;  %v680_v57 = vpop.f32.mrf.mxu1 }
 0x17b   : > { %v944_v55 = vpop.f32.mrf.mxu2  ;;  %3034 = vmatmul.msk.f32.gmra.mxu3 %vm310_vm1, %v3001_v51  ;;  %v672_v0 = vadd.f32 %v671_v19, %v460_v53  ;;  %v3138_v53 = vld [vmem:[%s5128_s1 + $0x550] sm:$0xff] }
 0x17c   : > { %v4258_v56 = vadd.f32 %v944_v55, %v669_v50 }
 0x17d   : > { %3099 = vmatmul.msk.f32.gmra.mxu0 %vm310_vm1, %v3066_v54  ;;  %3167 = vmatmul.msk.f32.gmra.mxu1 %vm310_vm1, %v3134_v59 }
 0x17e   : > { %v719_v60 = vpop.f32.mrf.mxu3 }
 0x17f   : > { %v4268_v62 = vadd.f32 %v719_v60, %v4104_v31  ;;  %v3197_v31 = vld [vmem:[%s5128_s1 + $0x620] sm:$0xff] }
 0x180   : > { %3229 = vmatmul.msk.f32.gmra.mxu2 %vm310_vm1, %v3196_v23  ;;  %v3071_v60 = vld [vmem:[%s5128_s1 + $0x440] sm:$0xff] }
 0x182   : > { %v463_v4 = vpop.f32.mrf.mxu0  ;;  %v683_v9 = vpop.f32.mrf.mxu1 }
 0x183   : > { %v947_v3 = vpop.f32.mrf.mxu2  ;;  %3035 = vmatmul.msk.f32.gmra.mxu3 %vm310_vm1, %v3002_v1  ;;  %v675_v16 = vadd.f32 %v674_v34, %v463_v4  ;;  %v3069_v34 = vld [vmem:[%s5128_s1 + $0x430] sm:$0xff] }
 0x184   : > { %v4279_v6 = vadd.f32 %v947_v3, %v672_v0 }
 0x185   : > { %3100 = vmatmul.msk.f32.gmra.mxu0 %vm310_vm1, %v3067_v7  ;;  %3168 = vmatmul.msk.f32.gmra.mxu1 %vm310_vm1, %v3135_v12  ;;  %v3139_v7 = vld [vmem:[%s5128_s1 + $0x558] sm:$0xff]  ;;  %v3007_v12 = vld [vmem:[%s5128_s1 + $0x348] sm:$0xff] }
 0x186   : > { %v722_v11 = vpop.f32.mrf.mxu3 }
 0x187   : > { %v4289_v10 = vadd.f32 %v722_v11, %v4124_v42  ;;  %v3198_v42 = vld [vmem:[%s5128_s1 + $0x628] sm:$0xff] }
 0x188   : > { %3230 = vmatmul.msk.f32.gmra.mxu2 %vm310_vm1, %v3197_v31 }
 0x18a   : > { %v466_v13 = vpop.f32.mrf.mxu0  ;;  %v686_v18 = vpop.f32.mrf.mxu1 }
 0x18b   : > { %v950_v19 = vpop.f32.mrf.mxu2  ;;  %3036 = vmatmul.msk.f32.gmra.mxu3 %vm310_vm1, %v3003_v14  ;;  %v678_v36 = vadd.f32 %v677_v45, %v466_v13 }
 0x18c   : > { %v4300_v32 = vadd.f32 %v950_v19, %v675_v16  ;;  %v3072_v16 = vld [vmem:[%s5128_s1 + $0x448] sm:$0xff]  ;;  %v3140_v19 = vld [vmem:[%s5128_s1 + $0x560] sm:$0xff] }
 0x18d   : > { %3101 = vmatmul.msk.f32.gmra.mxu0 %vm310_vm1, %v3068_v29  ;;  %3169 = vmatmul.msk.f32.gmra.mxu1 %vm310_vm1, %v3136_v35 }
 0x18e   : > { %v725_v25 = vpop.f32.mrf.mxu3 }
 0x18f   : > { %v4310_v28 = vadd.f32 %v725_v25, %v4144_v52  ;;  %v3199_v52 = vld [vmem:[%s5128_s1 + $0x630] sm:$0xff] }
 0x190   : > { %3231 = vmatmul.msk.f32.gmra.mxu2 %vm310_vm1, %v3198_v42  ;;  %v3008_v25 = vld [vmem:[%s5128_s1 + $0x350] sm:$0xff] }
 0x192   : > { %v469_v61 = vpop.f32.mrf.mxu0  ;;  %v689_v21 = vpop.f32.mrf.mxu1 }
 0x193   : > { %v953_v37 = vpop.f32.mrf.mxu2  ;;  %3037 = vmatmul.msk.f32.gmra.mxu3 %vm310_vm1, %v3004_v20  ;;  %v681_v43 = vadd.f32 %v680_v57, %v469_v61  ;;  %v3006_v57 = vld [vmem:[%s5128_s1 + $0x340] sm:$0xff]  ;;  %v3073_v20 = vld [vmem:[%s5128_s1 + $0x450] sm:$0xff] }
 0x194   : > { %v4321_v38 = vadd.f32 %v953_v37, %v678_v36 }
 0x195   : > { %3102 = vmatmul.msk.f32.gmra.mxu0 %vm310_vm1, %v3069_v34  ;;  %3170 = vmatmul.msk.f32.gmra.mxu1 %vm310_vm1, %v3137_v40 }
 0x196   : > { %v728_v41 = vpop.f32.mrf.mxu3 }
 0x197   : > { %v4331_v30 = vadd.f32 %v728_v41, %v4164_v63  ;;  %v3200_v63 = vld [vmem:[%s5128_s1 + $0x638] sm:$0xff] }
 0x198   : > { %3232 = vmatmul.msk.f32.gmra.mxu2 %vm310_vm1, %v3199_v52  ;;  %v3141_v52 = vld [vmem:[%s5128_s1 + $0x568] sm:$0xff] }
 0x19a   : > { %v472_v45 = vpop.f32.mrf.mxu0  ;;  %v692_v51 = vpop.f32.mrf.mxu1 }
 0x19b   : > { %v956_v47 = vpop.f32.mrf.mxu2  ;;  %3038 = vmatmul.msk.f32.gmra.mxu3 %vm310_vm1, %v3005_v5  ;;  %v684_v23 = vadd.f32 %v683_v9, %v472_v45  ;;  %v3074_v45 = vld [vmem:[%s5128_s1 + $0x458] sm:$0xff] }
 0x19c   : > { %v4342_v50 = vadd.f32 %v956_v47, %v681_v43  ;;  %v3009_v43 = vld [vmem:[%s5128_s1 + $0x358] sm:$0xff] }
 0x19d   : > { %3103 = vmatmul.msk.f32.gmra.mxu0 %vm310_vm1, %v3070_v46  ;;  %3171 = vmatmul.msk.f32.gmra.mxu1 %vm310_vm1, %v3138_v53 }
 0x19e   : > { %v731_v54 = vpop.f32.mrf.mxu3 }
 0x19f   : > { %v4352_v55 = vadd.f32 %v731_v54, %v4184_v15  ;;  %v3201_v15 = vld [vmem:[%s5128_s1 + $0x640] sm:$0xff] }
 0x1a0   : > { %3233 = vmatmul.msk.f32.gmra.mxu2 %vm310_vm1, %v3200_v63 }
 0x1a2   : > { %v475_v59 = vpop.f32.mrf.mxu0  ;;  %v695_v4 = vpop.f32.mrf.mxu1 }
 0x1a3   : > { %v959_v0 = vpop.f32.mrf.mxu2  ;;  %3039 = vmatmul.msk.f32.gmra.mxu3 %vm310_vm1, %v3006_v57  ;;  %v687_v9 = vadd.f32 %v686_v18, %v475_v59  ;;  %v3010_v57 = vld [vmem:[%s5128_s1 + $0x360] sm:$0xff] }
 0x1a4   : > { %v4363_v1 = vadd.f32 %v959_v0, %v684_v23 }
 0x1a5   : > { %3104 = vmatmul.msk.f32.gmra.mxu0 %vm310_vm1, %v3071_v60  ;;  %3172 = vmatmul.msk.f32.gmra.mxu1 %vm310_vm1, %v3139_v7  ;;  %v3075_v60 = vld [vmem:[%s5128_s1 + $0x460] sm:$0xff]  ;;  %v3143_v7 = vld [vmem:[%s5128_s1 + $0x578] sm:$0xff] }
 0x1a6   : > { %v986_v3 = vpop.f32.mrf.mxu3 }
 0x1a7   : > { %v4373_v31 = vadd.f32 %v986_v3, %v4205_v33  ;;  %v3202_v33 = vld [vmem:[%s5128_s1 + $0x648] sm:$0xff] }
 0x1a8   : > { %3234 = vmatmul.msk.f32.gmra.mxu2 %vm310_vm1, %v3201_v15 }
 0x1aa   : > { %v478_v11 = vpop.f32.mrf.mxu0  ;;  %v698_v29 = vpop.f32.mrf.mxu1 }
 0x1ab   : > { %v962_v14 = vpop.f32.mrf.mxu2  ;;  %3040 = vmatmul.msk.f32.gmra.mxu3 %vm310_vm1, %v3007_v12  ;;  %v690_v35 = vadd.f32 %v689_v21, %v478_v11  ;;  %v3011_v11 = vld [vmem:[%s5128_s1 + $0x368] sm:$0xff] }
 0x1ac   : > { %v4384_v13 = vadd.f32 %v962_v14, %v687_v9  ;;  %v3076_v14 = vld [vmem:[%s5128_s1 + $0x468] sm:$0xff] }
 0x1ad   : > { %3105 = vmatmul.msk.f32.gmra.mxu0 %vm310_vm1, %v3072_v16  ;;  %3173 = vmatmul.msk.f32.gmra.mxu1 %vm310_vm1, %v3140_v19 }
 0x1ae   : > { %v989_v42 = vpop.f32.mrf.mxu3 }
 0x1af   : > { %v4394_v18 = vadd.f32 %v989_v42, %v4226_v39  ;;  %v3203_v39 = vld [vmem:[%s5128_s1 + $0x650] sm:$0xff]  ;;  %v3144_v42 = vld [vmem:[%s5128_s1 + $0x580] sm:$0xff] }
 0x1b0   : > { %3235 = vmatmul.msk.f32.gmra.mxu2 %vm310_vm1, %v3202_v33 }
 0x1b2   : > { %v481_v36 = vpop.f32.mrf.mxu0  ;;  %v701_v37 = vpop.f32.mrf.mxu1 }
 0x1b3   : > { %v965_v61 = vpop.f32.mrf.mxu2  ;;  %3041 = vmatmul.msk.f32.gmra.mxu3 %vm310_vm1, %v3008_v25  ;;  %v693_v41 = vadd.f32 %v692_v51, %v481_v36  ;;  %v3142_v51 = vld [vmem:[%s5128_s1 + $0x570] sm:$0xff] }
 0x1b4   : > { %v4405_v34 = vadd.f32 %v965_v61, %v690_v35 }
 0x1b5   : > { %3106 = vmatmul.msk.f32.gmra.mxu0 %vm310_vm1, %v3073_v20  ;;  %3174 = vmatmul.msk.f32.gmra.mxu1 %vm310_vm1, %v3141_v52  ;;  %v3012_v20 = vld [vmem:[%s5128_s1 + $0x370] sm:$0xff] }
 0x1b6   : > { %v992_v21 = vpop.f32.mrf.mxu3 }
 0x1b7   : > { %v4415_v40 = vadd.f32 %v992_v21, %v4247_v49  ;;  %v3204_v49 = vld [vmem:[%s5128_s1 + $0x658] sm:$0xff] }
 0x1b8   : > { %3236 = vmatmul.msk.f32.gmra.mxu2 %vm310_vm1, %v3203_v39  ;;  %v3077_v39 = vld [vmem:[%s5128_s1 + $0x470] sm:$0xff] }
 0x1ba   : > { %v484_v5 = vpop.f32.mrf.mxu0  ;;  %v704_v63 = vpop.f32.mrf.mxu1 }
 0x1bb   : > { %v968_v46 = vpop.f32.mrf.mxu2  ;;  %3042 = vmatmul.msk.f32.gmra.mxu3 %vm310_vm1, %v3009_v43  ;;  %v696_v23 = vadd.f32 %v695_v4, %v484_v5 }
 0x1bc   : > { %v4426_v47 = vadd.f32 %v968_v46, %v693_v41  ;;  %v3145_v41 = vld [vmem:[%s5128_s1 + $0x588] sm:$0xff]  ;;  %v3013_v46 = vld [vmem:[%s5128_s1 + $0x378] sm:$0xff] }
 0x1bd   : > { %3107 = vmatmul.msk.f32.gmra.mxu0 %vm310_vm1, %v3074_v45  ;;  %3175 = vmatmul.msk.f32.gmra.mxu1 %vm310_vm1, %v3142_v51  ;;  %v3078_v51 = vld [vmem:[%s5128_s1 + $0x478] sm:$0xff] }
 0x1be   : > { %v995_v53 = vpop.f32.mrf.mxu3 }
 0x1bf   : > { %v4436_v54 = vadd.f32 %v995_v53, %v4268_v62  ;;  %v3205_v62 = vld [vmem:[%s5128_s1 + $0x660] sm:$0xff] }
 0x1c0   : > { %3237 = vmatmul.msk.f32.gmra.mxu2 %vm310_vm1, %v3204_v49 }
 0x1c2   : > { %v487_v59 = vpop.f32.mrf.mxu0  ;;  %v707_v4 = vpop.f32.mrf.mxu1 }
 0x1c3   : > { %v971_v0 = vpop.f32.mrf.mxu2  ;;  %3043 = vmatmul.msk.f32.gmra.mxu3 %vm310_vm1, %v3010_v57  ;;  %v699_v12 = vadd.f32 %v698_v29, %v487_v59  ;;  %v3146_v57 = vld [vmem:[%s5128_s1 + $0x590] sm:$0xff] }
 0x1c4   : > { %v4447_v15 = vadd.f32 %v971_v0, %v696_v23 }
 0x1c5   : > { %3108 = vmatmul.msk.f32.gmra.mxu0 %vm310_vm1, %v3075_v60  ;;  %3176 = vmatmul.msk.f32.gmra.mxu1 %vm310_vm1, %v3143_v7 }
 0x1c6   : > { %v998_v3 = vpop.f32.mrf.mxu3 }
 0x1c7   : > { %v4457_v9 = vadd.f32 %v998_v3, %v4289_v10  ;;  %v3206_v10 = vld [vmem:[%s5128_s1 + $0x668] sm:$0xff]  ;;  %v3079_v3 = vld [vmem:[%s5128_s1 + $0x480] sm:$0xff] }
 0x1c8   : > { %3238 = vmatmul.msk.f32.gmra.mxu2 %vm310_vm1, %v3205_v62  ;;  %v3014_v62 = vld [vmem:[%s5128_s1 + $0x380] sm:$0xff] }
 0x1ca   : > { %v490_v16 = vpop.f32.mrf.mxu0  ;;  %v1838_v29 = vpop.f32.mrf.mxu1 }
 0x1cb   : > { %v974_v33 = vpop.f32.mrf.mxu2  ;;  %3044 = vmatmul.msk.f32.gmra.mxu3 %vm310_vm1, %v3011_v11  ;;  %v702_v36 = vadd.f32 %v701_v37, %v490_v16  ;;  %v3147_v16 = vld [vmem:[%s5128_s1 + $0x598] sm:$0xff] }
 0x1cc   : > { %v4468_v19 = vadd.f32 %v974_v33, %v699_v12 }
 0x1cd   : > { %3109 = vmatmul.msk.f32.gmra.mxu0 %vm310_vm1, %v3076_v14  ;;  %3177 = vmatmul.msk.f32.gmra.mxu1 %vm310_vm1, %v3144_v42 }
 0x1ce   : > { %v1001_v35 = vpop.f32.mrf.mxu3 }
 0x1cf   : > { %v4478_v25 = vadd.f32 %v1001_v35, %v4310_v28  ;;  %v3207_v28 = vld [vmem:[%s5128_s1 + $0x670] sm:$0xff] }
 0x1d0   : > { %3239 = vmatmul.msk.f32.gmra.mxu2 %vm310_vm1, %v3206_v10  ;;  %v3015_v10 = vld [vmem:[%s5128_s1 + $0x388] sm:$0xff] }
 0x1d2   : > { %v493_v61 = vpop.f32.mrf.mxu0  ;;  %v4495_v37 = vpop.f32.mrf.mxu1 }
 0x1d3   : > { %v977_v52 = vpop.f32.mrf.mxu2  ;;  %3045 = vmatmul.msk.f32.gmra.mxu3 %vm310_vm1, %v3012_v20  ;;  %v705_v45 = vadd.f32 %v704_v63, %v493_v61 }
 0x1d4   : > { %v4489_v21 = vadd.f32 %v977_v52, %v702_v36  ;;  %v3080_v36 = vld [vmem:[%s5128_s1 + $0x488] sm:$0xff] }
 0x1d5   : > { %3110 = vmatmul.msk.f32.gmra.mxu0 %vm310_vm1, %v3077_v39  ;;  %3178 = vmatmul.msk.f32.gmra.mxu1 %vm310_vm1, %v3145_v41 }
 0x1d6   : > { %v1004_v43 = vpop.f32.mrf.mxu3 }
 0x1d7   : > { %v4501_v5 = vadd.f32 %v1004_v43, %v4331_v30  ;;  %v3208_v30 = vld [vmem:[%s5128_s1 + $0x678] sm:$0xff] }
 0x1d8   : > { %3240 = vmatmul.msk.f32.gmra.mxu2 %vm310_vm1, %v3207_v28  ;;  %v3148_v28 = vld [vmem:[%s5128_s1 + $0x5a0] sm:$0xff] }
 0x1da   : > { %v496_v49 = vpop.f32.mrf.mxu0  ;;  %v4518_v63 = vpop.f32.mrf.mxu1 }
 0x1db   : > { %v980_v53 = vpop.f32.mrf.mxu2  ;;  %3046 = vmatmul.msk.f32.gmra.mxu3 %vm310_vm1, %v3013_v46  ;;  %v708_v0 = vadd.f32 %v707_v4, %v496_v49  ;;  %v3016_v46 = vld [vmem:[%s5128_s1 + $0x390] sm:$0xff] }
 0x1dc   : > { %v4512_v23 = vadd.f32 %v980_v53, %v705_v45 }
 0x1dd   : > { %3111 = vmatmul.msk.f32.gmra.mxu0 %vm310_vm1, %v3078_v51  ;;  %3179 = vmatmul.msk.f32.gmra.mxu1 %vm310_vm1, %v3146_v57 }
 0x1de   : > { %v1007_v59 = vpop.f32.mrf.mxu3 }
 0x1df   : > { %v4524_v60 = vadd.f32 %v1007_v59, %v4352_v55  ;;  %v3209_v55 = vld [vmem:[%s5128_s1 + $0x680] sm:$0xff]  ;;  %v3211_v59 = vld [vmem:[%s5128_s1 + $0x690] sm:$0xff] }
 0x1e0   : > { %3241 = vmatmul.msk.f32.gmra.mxu2 %vm310_vm1, %v3208_v30 }
 0x1e2   : > { %v1530_v7 = vpop.f32.mrf.mxu0  ;;  %v4541_v4 = vpop.f32.mrf.mxu1 }
 0x1e3   : > { %v983_v12 = vpop.f32.mrf.mxu2  ;;  %3047 = vmatmul.msk.f32.gmra.mxu3 %vm310_vm1, %v3014_v62 }
 0x1e4   : > { %v4535_v11 = vadd.f32 %v983_v12, %v708_v0 }
 0x1e5   : > { %3112 = vmatmul.msk.f32.gmra.mxu0 %vm310_vm1, %v3079_v3  ;;  %3180 = vmatmul.msk.f32.gmra.mxu1 %vm310_vm1, %v3147_v16  ;;  %v3017_v16 = vld [vmem:[%s5128_s1 + $0x398] sm:$0xff] }
 0x1e6   : > { %v1222_v14 = vpop.f32.mrf.mxu3 }
 0x1e7   : > { %v1318_v33 = vadd.f32 %v1222_v14, %v4055_v2  ;;  %v3210_v2 = vld [vmem:[%s5128_s1 + $0x688] sm:$0xff] }
 0x1e8   : > { %3242 = vmatmul.msk.f32.gmra.mxu2 %vm310_vm1, %v3209_v55 }
 0x1e9   : > { %v1626_v42 = vadd.f32 %v1530_v7, %v1318_v33  ;;  %v3149_v7 = vld [vmem:[%s5128_s1 + $0x5a8] sm:$0xff] }
 0x1ea   : > { %v1533_v35 = vpop.f32.mrf.mxu0  ;;  %v4560_v52 = vpop.f32.mrf.mxu1 }
 0x1eb   : > { %v2146_v20 = vpop.f32.mrf.mxu2  ;;  %v1934_v61 = vadd.f32 %v1838_v29, %v1626_v42  ;;  %3048 = vmatmul.msk.f32.gmra.mxu3 %vm310_vm1, %v3015_v10 }
 0x1ed   : > { %3113 = vmatmul.msk.f32.gmra.mxu0 %vm310_vm1, %v3080_v36  ;;  %v2242_v39 = vadd.f32 %v2146_v20, %v1934_v61  ;;  %3181 = vmatmul.msk.f32.gmra.mxu1 %vm310_vm1, %v3148_v28  ;;  %v3212_v36 = vld [vmem:[%s5128_s1 + $0x698] sm:$0xff] }
 0x1ee   : > { %v1225_v41 = vpop.f32.mrf.mxu3 }
 0x1ef   : > { %v1319_v43 = vadd.f32 %v1225_v41, %v4075_v17  ;;  %v2275_v29 = vsel %vm2274_vm2, %v2242_v39, 0.0  ;;  %v2489_v45 = vmul.f32 %v2242_v39, %v2242_v39  ;;  %v3081_v17 = vld [vmem:[%s5128_s1 + $0x490] sm:$0xff] }
 0x1f0   : > { %3243 = vmatmul.msk.f32.gmra.mxu2 %vm310_vm1, %v3210_v2  ;;  %2276 = vadd.xlane.f32.xlu0 %v2275_v29  ;;  %v3150_v2 = vld [vmem:[%s5128_s1 + $0x5b0] sm:$0xff] }
 0x1f1   : > { %v1627_v49 = vadd.f32 %v1533_v35, %v1319_v43  ;;  %v2521_v51 = vsel %vm2274_vm2, %v2489_v45, 0.0  ;;  %v3018_v43 = vld [vmem:[%s5128_s1 + $0x3a0] sm:$0xff] }
 0x1f2   : > { %v1536_v53 = vpop.f32.mrf.mxu0  ;;  %2522 = vadd.xlane.f32.xlu2 %v2521_v51  ;;  %v4582_v62 = vpop.f32.mrf.mxu1 }
 0x1f3   : > { %v2149_v30 = vpop.f32.mrf.mxu2  ;;  %v1935_v57 = vadd.f32 %v4495_v37, %v1627_v49  ;;  %3049 = vmatmul.msk.f32.gmra.mxu3 %vm310_vm1, %v3016_v46 }
 0x1f5   : > { %3114 = vmatmul.msk.f32.gmra.mxu0 %vm310_vm1, %v3081_v17  ;;  %v2243_v0 = vadd.f32 %v2149_v30, %v1935_v57  ;;  %3182 = vmatmul.msk.f32.gmra.mxu1 %vm310_vm1, %v3149_v7  ;;  %v3151_v57 = vld [vmem:[%s5128_s1 + $0x5b8] sm:$0xff]  ;;  %v3019_v7 = vld [vmem:[%s5128_s1 + $0x3a8] sm:$0xff] }
 0x1f6   : > { %v1228_v3 = vpop.f32.mrf.mxu3 }
 0x1f7   : > { %v1320_v12 = vadd.f32 %v1228_v3, %v4095_v27  ;;  %v2278_v37 = vsel %vm2274_vm2, %v2243_v0, 0.0  ;;  %v2490_v55 = vmul.f32 %v2243_v0, %v2243_v0  ;;  %v3082_v27 = vld [vmem:[%s5128_s1 + $0x498] sm:$0xff] }
 0x1f8   : > { %3244 = vmatmul.msk.f32.gmra.mxu2 %vm310_vm1, %v3211_v59  ;;  %2279 = vadd.xlane.f32.xlu1 %v2278_v37  ;;  %v3084_v37 = vld [vmem:[%s5128_s1 + $0x4a8] sm:$0xff] }
 0x1f9   : > { %v1628_v14 = vadd.f32 %v1536_v53, %v1320_v12  ;;  %v2524_v33 = vsel %vm2274_vm2, %v2490_v55, 0.0  ;;  %v3213_v53 = vld [vmem:[%s5128_s1 + $0x6a0] sm:$0xff] }
 0x1fa   : > { %v1539_v10 = vpop.f32.mrf.mxu0  ;;  %2525 = vadd.xlane.f32.xlu0 %v2524_v33  ;;  %v4604_v61 = vpop.f32.mrf.mxu1 }
 0x1fb   : > { %v2152_v42 = vpop.f32.mrf.mxu2  ;;  %v1936_v35 = vadd.f32 %v4518_v63, %v1628_v14  ;;  %3050 = vmatmul.msk.f32.gmra.mxu3 %vm310_vm1, %v3017_v16  ;;  %v3214_v14 = vld [vmem:[%s5128_s1 + $0x6a8] sm:$0xff] }
 0x1fd   : > { %3115 = vmatmul.msk.f32.gmra.mxu0 %vm310_vm1, %v3082_v27  ;;  %v2244_v20 = vadd.f32 %v2152_v42, %v1936_v35  ;;  %3183 = vmatmul.msk.f32.gmra.mxu1 %vm310_vm1, %v3150_v2  ;;  %v3152_v42 = vld [vmem:[%s5128_s1 + $0x5c0] sm:$0xff] }
 0x1fe   : > { %v1231_v39 = vpop.f32.mrf.mxu3 }
 0x1ff   : > { %v1321_v28 = vadd.f32 %v1231_v39, %v4115_v24  ;;  %v2281_v63 = vsel %vm2274_vm2, %v2244_v20, 0.0  ;;  %v2491_v41 = vmul.f32 %v2244_v20, %v2244_v20  ;;  %v3083_v24 = vld [vmem:[%s5128_s1 + $0x4a0] sm:$0xff]  ;;  %v3020_v20 = vld [vmem:[%s5128_s1 + $0x3b0] sm:$0xff] }
 0x200   : > { %3245 = vmatmul.msk.f32.gmra.mxu2 %vm310_vm1, %v3212_v36  ;;  %2282 = vadd.xlane.f32.xlu2 %v2281_v63 }
 0x201   : > { %v1629_v29 = vadd.f32 %v1539_v10, %v1321_v28  ;;  %v2527_v45 = vsel %vm2274_vm2, %v2491_v41, 0.0  ;;  %v3085_v28 = vld [vmem:[%s5128_s1 + $0x4b0] sm:$0xff] }
 0x202   : > { %v1542_v46 = vpop.f32.mrf.mxu0  ;;  %2528 = vadd.xlane.f32.xlu1 %v2527_v45  ;;  %v4626_v30 = vpop.f32.mrf.mxu1 }
 0x203   : > { %v2155_v49 = vpop.f32.mrf.mxu2  ;;  %v1937_v51 = vadd.f32 %v4541_v4, %v1629_v29  ;;  %3051 = vmatmul.msk.f32.gmra.mxu3 %vm310_vm1, %v3018_v43  ;;  %v3215_v43 = vld [vmem:[%s5128_s1 + $0x6b0] sm:$0xff] }
 0x205   : > { %3116 = vmatmul.msk.f32.gmra.mxu0 %vm310_vm1, %v3083_v24  ;;  %v2245_v17 = vadd.f32 %v2155_v49, %v1937_v51  ;;  %3184 = vmatmul.msk.f32.gmra.mxu1 %vm310_vm1, %v3151_v57  ;;  %v3153_v24 = vld [vmem:[%s5128_s1 + $0x5c8] sm:$0xff] }
 0x206   : > { %v1234_v59 = vpop.f32.mrf.mxu3 }
 0x207   : > { %v1322_v0 = vadd.f32 %v1234_v59, %v4135_v48  ;;  %v2284_v4 = vsel %vm2274_vm2, %v2245_v17, 0.0  ;;  %v2492_v16 = vmul.f32 %v2245_v17, %v2245_v17  ;;  %v3086_v59 = vld [vmem:[%s5128_s1 + $0x4b8] sm:$0xff] }
 0x208   : > { %3246 = vmatmul.msk.f32.gmra.mxu2 %vm310_vm1, %v3213_v53  ;;  %2285 = vadd.xlane.f32.xlu2 %v2284_v4  ;;  %v3021_v53 = vld [vmem:[%s5128_s1 + $0x3b8] sm:$0xff] }
 0x209   : > { %v1630_v3 = vadd.f32 %v1542_v46, %v1322_v0 }
 0x20a   : > { %v1545_v12 = vpop.f32.mrf.mxu0  ;;  %v4647_v10 = vpop.f32.mrf.mxu1 }
 0x20b   : > { %v2158_v55 = vpop.f32.mrf.mxu2  ;;  %v1938_v48 = vadd.f32 %v4560_v52, %v1630_v3  ;;  %3052 = vmatmul.msk.f32.gmra.mxu3 %vm310_vm1, %v3019_v7  ;;  %v2530_v52 = vsel %vm2274_vm2, %v2492_v16, 0.0  ;;  %v3216_v7 = vld [vmem:[%s5128_s1 + $0x6b8] sm:$0xff] }
 0x20d   : > { %3117 = vmatmul.msk.f32.gmra.mxu0 %vm310_vm1, %v3084_v37  ;;  %v2246_v33 = vadd.f32 %v2158_v55, %v1938_v48  ;;  %3185 = vmatmul.msk.f32.gmra.mxu1 %vm310_vm1, %v3152_v42  ;;  %v3154_v55 = vld [vmem:[%s5128_s1 + $0x5d0] sm:$0xff]  ;;  %v3087_v42 = vld [vmem:[%s5128_s1 + $0x4c0] sm:$0xff] }
 0x20e   : > { %v1237_v27 = vpop.f32.mrf.mxu3 }
 0x20f   : > { %v1323_v35 = vadd.f32 %v1237_v27, %v4155_v58  ;;  %v2287_v36 = vsel %vm2274_vm2, %v2246_v33, 0.0  ;;  %v2493_v41 = vmul.f32 %v2246_v33, %v2246_v33 }
 0x210   : > { %3247 = vmatmul.msk.f32.gmra.mxu2 %vm310_vm1, %v3214_v14  ;;  %2531 = vadd.xlane.f32.xlu2 %v2530_v52  ;;  %v3022_v14 = vld [vmem:[%s5128_s1 + $0x3c0] sm:$0xff] }
 0x211   : > { %2288 = vadd.xlane.f32.xlu0 %v2287_v36  ;;  %v1631_v2 = vadd.f32 %v1545_v12, %v1323_v35  ;;  %v2533_v51 = vsel %vm2274_vm2, %v2493_v41, 0.0  ;;  %v3217_v36 = vld [vmem:[%s5128_s1 + $0x6c0] sm:$0xff]  ;;  %v3023_v41 = vld [vmem:[%s5128_s1 + $0x3c8] sm:$0xff] }
 0x212   : > { %v1548_v39 = vpop.f32.mrf.mxu0  ;;  %v4669_v45 = vpop.f32.mrf.mxu1 }
 0x213   : > { %v2161_v58 = vpop.f32.mrf.mxu2  ;;  %v1939_v63 = vadd.f32 %v4582_v62, %v1631_v2  ;;  %3053 = vmatmul.msk.f32.gmra.mxu3 %vm310_vm1, %v3020_v20 }
 0x215   : > { %3118 = vmatmul.msk.f32.gmra.mxu0 %vm310_vm1, %v3085_v28  ;;  %v2247_v29 = vadd.f32 %v2161_v58, %v1939_v63  ;;  %3186 = vmatmul.msk.f32.gmra.mxu1 %vm310_vm1, %v3153_v24  ;;  %v3155_v28 = vld [vmem:[%s5128_s1 + $0x5d8] sm:$0xff] }
 0x216   : > { %v1240_v46 = vpop.f32.mrf.mxu3 }
 0x217   : > { %v1324_v49 = vadd.f32 %v1240_v46, %v4175_v8  ;;  %v2290_v62 = vsel %vm2274_vm2, %v2247_v29, 0.0  ;;  %v2494_v4 = vmul.f32 %v2247_v29, %v2247_v29  ;;  %v3088_v46 = vld [vmem:[%s5128_s1 + $0x4c8] sm:$0xff] }
 0x218   : > { %3248 = vmatmul.msk.f32.gmra.mxu2 %vm310_vm1, %v3215_v43  ;;  %2291 = vadd.xlane.f32.xlu1 %v2290_v62  ;;  %v3218_v62 = vld [vmem:[%s5128_s1 + $0x6c8] sm:$0xff] }
 0x219   : > { %2534 = vadd.xlane.f32.xlu0 %v2533_v51  ;;  %v1632_v17 = vadd.f32 %v1548_v39, %v1324_v49 }
 0x21a   : > { %v1551_v57 = vpop.f32.mrf.mxu0  ;;  %v4691_v12 = vpop.f32.mrf.mxu1 }
 0x21b   : > { %v2164_v8 = vpop.f32.mrf.mxu2  ;;  %v1940_v0 = vadd.f32 %v4604_v61, %v1632_v17  ;;  %3054 = vmatmul.msk.f32.gmra.mxu3 %vm310_vm1, %v3021_v53  ;;  %v2536_v61 = vsel %vm2274_vm2, %v2494_v4, 0.0  ;;  %v3024_v4 = vld [vmem:[%s5128_s1 + $0x3d0] sm:$0xff] }
 0x21d   : > { %3119 = vmatmul.msk.f32.gmra.mxu0 %vm310_vm1, %v3086_v59  ;;  %v2248_v3 = vadd.f32 %v2164_v8, %v1940_v0  ;;  %3187 = vmatmul.msk.f32.gmra.mxu1 %vm310_vm1, %v3154_v55 }
 0x21e   : > { %v1243_v37 = vpop.f32.mrf.mxu3 }
 0x21f   : > { %v1325_v48 = vadd.f32 %v1243_v37, %v4195_v26  ;;  %v2293_v16 = vsel %vm2274_vm2, %v2248_v3, 0.0  ;;  %v2495_v52 = vmul.f32 %v2248_v3, %v2248_v3 }
 0x220   : > { %3249 = vmatmul.msk.f32.gmra.mxu2 %vm310_vm1, %v3216_v7  ;;  %2537 = vadd.xlane.f32.xlu1 %v2536_v61  ;;  %v3219_v61 = vld [vmem:[%s5128_s1 + $0x6d0] sm:$0xff] }
 0x221   : > { %2294 = vadd.xlane.f32.xlu2 %v2293_v16  ;;  %v1633_v33 = vadd.f32 %v1551_v57, %v1325_v48  ;;  %v3156_v57 = vld [vmem:[%s5128_s1 + $0x5e0] sm:$0xff] }
 0x222   : > { %v1554_v27 = vpop.f32.mrf.mxu0  ;;  %v4713_v2 = vpop.f32.mrf.mxu1 }
 0x223   : > { %v2167_v26 = vpop.f32.mrf.mxu2  ;;  %v1941_v35 = vadd.f32 %v4626_v30, %v1633_v33  ;;  %3055 = vmatmul.msk.f32.gmra.mxu3 %vm310_vm1, %v3022_v14  ;;  %v2539_v30 = vsel %vm2274_vm2, %v2495_v52, 0.0 }
 0x225   : > { %3120 = vmatmul.msk.f32.gmra.mxu0 %vm310_vm1, %v3087_v42  ;;  %v2249_v20 = vadd.f32 %v2167_v26, %v1941_v35  ;;  %3188 = vmatmul.msk.f32.gmra.mxu1 %vm310_vm1, %v3155_v28  ;;  %v3025_v26 = vld [vmem:[%s5128_s1 + $0x3d8] sm:$0xff] }
 0x226   : > { %v1246_v39 = vpop.f32.mrf.mxu3 }
 0x227   : > { %v1326_v58 = vadd.f32 %v1246_v39, %v4216_v22  ;;  %v2296_v63 = vsel %vm2274_vm2, %v2249_v20, 0.0  ;;  %v2496_v49 = vmul.f32 %v2249_v20, %v2249_v20  ;;  %v3090_v39 = vld [vmem:[%s5128_s1 + $0x4d8] sm:$0xff] }
 0x228   : > { %3250 = vmatmul.msk.f32.gmra.mxu2 %vm310_vm1, %v3217_v36  ;;  %2297 = vadd.xlane.f32.xlu0 %v2296_v63 }
 0x229   : > { %2540 = vadd.xlane.f32.xlu2 %v2539_v30  ;;  %v1634_v43 = vadd.f32 %v1554_v27, %v1326_v58  ;;  %v2542_v8 = vsel %vm2274_vm2, %v2496_v49, 0.0  ;;  %v3157_v27 = vld [vmem:[%s5128_s1 + $0x5e8] sm:$0xff]  ;;  %v3220_v58 = vld [vmem:[%s5128_s1 + $0x6d8] sm:$0xff] }
 0x22a   : > { %v1557_v29 = vpop.f32.mrf.mxu0  ;;  %v4735_v53 = vpop.f32.mrf.mxu1 }
 0x22b   : > { %v2170_v22 = vpop.f32.mrf.mxu2  ;;  %v1942_v24 = vadd.f32 %v4647_v10, %v1634_v43  ;;  %3056 = vmatmul.msk.f32.gmra.mxu3 %vm310_vm1, %v3023_v41  ;;  %v3158_v43 = vld [vmem:[%s5128_s1 + $0x5f0] sm:$0xff] }
 0x22d   : > { %3121 = vmatmul.msk.f32.gmra.mxu0 %vm310_vm1, %v3088_v46  ;;  %v2250_v51 = vadd.f32 %v2170_v22, %v1942_v24  ;;  %3189 = vmatmul.msk.f32.gmra.mxu1 %vm310_vm1, %v3156_v57  ;;  %v3026_v46 = vld [vmem:[%s5128_s1 + $0x3e0] sm:$0xff] }
 0x22e   : > { %v1249_v17 = vpop.f32.mrf.mxu3  ;;  %v3221_v57 = vld [vmem:[%s5128_s1 + $0x6e0] sm:$0xff] }
 0x22f   : > { %v1327_v59 = vadd.f32 %v1249_v17, %v4237_v44  ;;  %v2299_v10 = vsel %vm2274_vm2, %v2250_v51, 0.0  ;;  %v2497_v0 = vmul.f32 %v2250_v51, %v2250_v51  ;;  %v3089_v44 = vld [vmem:[%s5128_s1 + $0x4d0] sm:$0xff]  ;;  %v3091_v51 = vld [vmem:[%s5128_s1 + $0x4e0] sm:$0xff] }
 0x230   : > { %3251 = vmatmul.msk.f32.gmra.mxu2 %vm310_vm1, %v3218_v62  ;;  %2300 = vadd.xlane.f32.xlu1 %v2299_v10 }
 0x231   : > { %2543 = vadd.xlane.f32.xlu0 %v2542_v8  ;;  %v1635_v7 = vadd.f32 %v1557_v29, %v1327_v59  ;;  %v2545_v3 = vsel %vm2274_vm2, %v2497_v0, 0.0  ;;  %v3159_v0 = vld [vmem:[%s5128_s1 + $0x5f8] sm:$0xff] }
 0x232   : > { %v1560_v37 = vpop.f32.mrf.mxu0  ;;  %2546 = vadd.xlane.f32.xlu2 %v2545_v3  ;;  %v4758_v14 = vpop.f32.mrf.mxu1  ;;  %v3027_v3 = vld [vmem:[%s5128_s1 + $0x3e8] sm:$0xff] }
 0x233   : > { %v2173_v55 = vpop.f32.mrf.mxu2  ;;  %v1943_v48 = vadd.f32 %v4669_v45, %v1635_v7  ;;  %3057 = vmatmul.msk.f32.gmra.mxu3 %vm310_vm1, %v3024_v4 }
 0x235   : > { %3122 = vmatmul.msk.f32.gmra.mxu0 %vm310_vm1, %v3089_v44  ;;  %v2251_v16 = vadd.f32 %v2173_v55, %v1943_v48  ;;  %3190 = vmatmul.msk.f32.gmra.mxu1 %vm310_vm1, %v3157_v27  ;;  %v3092_v48 = vld [vmem:[%s5128_s1 + $0x4e8] sm:$0xff] }
 0x236   : > { %v1252_v33 = vpop.f32.mrf.mxu3 }
 0x237   : > { %v1328_v42 = vadd.f32 %v1252_v33, %v4258_v56  ;;  %v2498_v45 = vmul.f32 %v2251_v16, %v2251_v16  ;;  %v2302_v52 = vsel %vm2274_vm2, %v2251_v16, 0.0  ;;  %v3222_v16 = vld [vmem:[%s5128_s1 + $0x6e8] sm:$0xff] }
 0x238   : > { %3252 = vmatmul.msk.f32.gmra.mxu2 %vm310_vm1, %v3219_v61 }
 0x239   : > { %v1636_v35 = vadd.f32 %v1560_v37, %v1328_v42  ;;  %v2548_v36 = vsel %vm2274_vm2, %v2498_v45, 0.0 }
 0x23a   : > { %v1563_v20 = vpop.f32.mrf.mxu0  ;;  %2303 = vadd.xlane.f32.xlu2 %v2302_v52  ;;  %2549 = vadd.xlane.f32.xlu0 %v2548_v36  ;;  %v4780_v63 = vpop.f32.mrf.mxu1  ;;  %v3093_v36 = vld [vmem:[%s5128_s1 + $0x4f0] sm:$0xff] }
 0x23b   : > { %v2176_v56 = vpop.f32.mrf.mxu2  ;;  %v1944_v28 = vadd.f32 %v4691_v12, %v1636_v35  ;;  %3058 = vmatmul.msk.f32.gmra.mxu3 %vm310_vm1, %v3025_v26 }
 0x23d   : > { %3123 = vmatmul.msk.f32.gmra.mxu0 %vm310_vm1, %v3090_v39  ;;  %v2252_v30 = vadd.f32 %v2176_v56, %v1944_v28  ;;  %3191 = vmatmul.msk.f32.gmra.mxu1 %vm310_vm1, %v3158_v43 }
 0x23e   : > { %v1255_v41 = vpop.f32.mrf.mxu3 }
 0x23f   : > { %v1329_v29 = vadd.f32 %v1255_v41, %v4279_v6  ;;  %v2499_v12 = vmul.f32 %v2252_v30, %v2252_v30  ;;  %v2305_v49 = vsel %vm2274_vm2, %v2252_v30, 0.0 }
 0x240   : > { %3253 = vmatmul.msk.f32.gmra.mxu2 %vm310_vm1, %v3220_v58 }
 0x241   : > { %v1637_v22 = vadd.f32 %v1563_v20, %v1329_v29  ;;  %v2551_v24 = vsel %vm2274_vm2, %v2499_v12, 0.0 }
 0x242   : > { %v1566_v62 = vpop.f32.mrf.mxu0  ;;  %2552 = vadd.xlane.f32.xlu2 %v2551_v24  ;;  %2306 = vadd.xlane.f32.xlu0 %v2305_v49  ;;  %v4802_v10 = vpop.f32.mrf.mxu1  ;;  %v3224_v49 = vld [vmem:[%s5128_s1 + $0x6f8] sm:$0xff] }
 0x243   : > { %v2179_v6 = vpop.f32.mrf.mxu2  ;;  %v1945_v17 = vadd.f32 %v4713_v2, %v1637_v22  ;;  %3059 = vmatmul.msk.f32.gmra.mxu3 %vm310_vm1, %v3026_v46  ;;  %v3094_v22 = vld [vmem:[%s5128_s1 + $0x4f8] sm:$0xff] }
 0x245   : > { %3124 = vmatmul.msk.f32.gmra.mxu0 %vm310_vm1, %v3091_v51  ;;  %v2253_v59 = vadd.f32 %v2179_v6, %v1945_v17  ;;  %3192 = vmatmul.msk.f32.gmra.mxu1 %vm310_vm1, %v3159_v0 }
 0x246   : > { %v1258_v8 = vpop.f32.mrf.mxu3 }
 0x247   : > { %v1330_v4 = vadd.f32 %v1258_v8, %v4300_v32  ;;  %v2308_v2 = vsel %vm2274_vm2, %v2253_v59, 0.0  ;;  %v2500_v7 = vmul.f32 %v2253_v59, %v2253_v59 }
 0x248   : > { %3254 = vmatmul.msk.f32.gmra.mxu2 %vm310_vm1, %v3221_v57  ;;  %2309 = vadd.xlane.f32.xlu1 %v2308_v2 }
 0x249   : > { %v1638_v37 = vadd.f32 %v1566_v62, %v1330_v4  ;;  %v2554_v44 = vsel %vm2274_vm2, %v2500_v7, 0.0 }
 0x24a   : > { %v1569_v55 = vpop.f32.mrf.mxu0  ;;  %2555 = vadd.xlane.f32.xlu2 %v2554_v44  ;;  %v4824_v27 = vpop.f32.mrf.mxu1 }
 0x24b   : > { %v2182_v32 = vpop.f32.mrf.mxu2  ;;  %v1946_v61 = vadd.f32 %v4735_v53, %v1638_v37  ;;  %3060 = vmatmul.msk.f32.gmra.mxu3 %vm310_vm1, %v3027_v3  ;;  %v3028_v53 = vld [vmem:[%s5128_s1 + $0x3f0] sm:$0xff] }
 0x24d   : > { %3125 = vmatmul.msk.f32.gmra.mxu0 %vm310_vm1, %v3092_v48  ;;  %v2254_v33 = vadd.f32 %v2182_v32, %v1946_v61  ;;  %v2403_v48 = vlaneseq }
 0x24e   : > { %v1261_v42 = vpop.f32.mrf.mxu3 }
 0x24f   : > { %v1331_v45 = vadd.f32 %v1261_v42, %v4321_v38  ;;  %v2311_v35 = vsel %vm2274_vm2, %v2254_v33, 0.0  ;;  %v3223_v38 = vld [vmem:[%s5128_s1 + $0x6f0] sm:$0xff]  ;;  %v2501_v28 = vmul.f32 %v2254_v33, %v2254_v33 }
 0x250   : > { %3255 = vmatmul.msk.f32.gmra.mxu2 %vm310_vm1, %v3222_v16 }
 0x251   : > { %v1639_v26 = vadd.f32 %v1569_v55, %v1331_v45  ;;  %v2557_v12 = vsel %vm2274_vm2, %v2501_v28, 0.0 }
 0x252   : > { %v1572_v52 = vpop.f32.mrf.mxu0  ;;  %2312 = vadd.xlane.f32.xlu2 %v2311_v35  ;;  %v4841_v58 = vpop.f32.mrf.mxu1 }
 0x253   : > { %v2185_v20 = vpop.f32.mrf.mxu2  ;;  %v1947_v39 = vadd.f32 %v4758_v14, %v1639_v26  ;;  %3061 = vmatmul.msk.f32.gmra.mxu3 %vm310_vm1, %v3028_v53  ;;  %v3029_v14 = vld [vmem:[%s5128_s1 + $0x3f8] sm:$0xff] }
 0x255   : > { %3126 = vmatmul.msk.f32.gmra.mxu0 %vm310_vm1, %v3093_v36  ;;  %v2255_v56 = vadd.f32 %v2185_v20, %v1947_v39 }
 0x256   : > { %v1264_v30 = vpop.f32.mrf.mxu3 }
 0x257   : > { %v1332_v41 = vadd.f32 %v1264_v30, %v4342_v50  ;;  %v2314_v43 = vsel %vm2274_vm2, %v2255_v56, 0.0  ;;  %v2502_v51 = vmul.f32 %v2255_v56, %v2255_v56 }
 0x258   : > { %3256 = vmatmul.msk.f32.gmra.mxu2 %vm310_vm1, %v3223_v38  ;;  %2315 = vadd.xlane.f32.xlu0 %v2314_v43 }
 0x259   : > { %v1640_v29 = vadd.f32 %v1572_v52, %v1332_v41  ;;  %v2560_v0 = vsel %vm2274_vm2, %v2502_v51, 0.0 }
 0x25a   : > { %v1575_v46 = vpop.f32.mrf.mxu0  ;;  %2558 = vadd.xlane.f32.xlu2 %v2557_v12  ;;  %v4859_v17 = vpop.f32.mrf.mxu1 }
 0x25b   : > { %v2188_v24 = vpop.f32.mrf.mxu2  ;;  %v1948_v50 = vadd.f32 %v4780_v63, %v1640_v29  ;;  %3062 = vmatmul.msk.f32.gmra.mxu3 %vm310_vm1, %v3029_v14 }
 0x25d   : > { %3127 = vmatmul.msk.f32.gmra.mxu0 %vm310_vm1, %v3094_v22  ;;  %v2256_v62 = vadd.f32 %v2188_v24, %v1948_v50 }
 0x25e   : > { %v1267_v6 = vpop.f32.mrf.mxu3 }
 0x25f   : > { %v1333_v57 = vadd.f32 %v1267_v6, %v4363_v1  ;;  %v2317_v59 = vsel %vm2274_vm2, %v2256_v62, 0.0  ;;  %v2503_v63 = vmul.f32 %v2256_v62, %v2256_v62 }
 0x260   : > { %3257 = vmatmul.msk.f32.gmra.mxu2 %vm310_vm1, %v3224_v49  ;;  %2318 = vadd.xlane.f32.xlu1 %v2317_v59 }
 0x261   : > { %v1641_v8 = vadd.f32 %v1575_v46, %v1333_v57  ;;  %v2563_v4 = vsel %vm2274_vm2, %v2503_v63, 0.0 }
 0x262   : > { %v1578_v2 = vpop.f32.mrf.mxu0  ;;  %2561 = vadd.xlane.f32.xlu2 %v2560_v0  ;;  %2564 = vadd.xlane.f32.xlu0 %v2563_v4  ;;  %v1895_v32 = vpop.f32.mrf.mxu1 }
 0x263   : > { %v2191_v7 = vpop.f32.mrf.mxu2  ;;  %v1949_v3 = vadd.f32 %v4802_v10, %v1641_v8  ;;  %v4867_v37 = vpop.xlane.xlu0 %2276  ;;  %v4875_v10 = vand.u32 127, %v2403_v48 }
 0x265   : > { %v4869_v1 = vadd.f32 %v2191_v7, %v1949_v3  ;;  %v2523_v45 = vpop.xlane.xlu2 %2522 }
 0x266   : > { %v1270_v44 = vpop.f32.mrf.mxu3 }
 0x267   : > { %v1334_v55 = vadd.f32 %v1270_v44, %v4384_v13  ;;  %v2320_v16 = vsel %vm2274_vm2, %v4869_v1, 0.0  ;;  %v2649_v13 = vperm.slane %v2523_v45, %v4875_v10 }
 0x269   : > { %v1642_v61 = vadd.f32 %v1578_v2, %v1334_v55 }
 0x26a   : > { %v1581_v33 = vpop.f32.mrf.mxu0  ;;  %2321 = vadd.xlane.f32.xlu2 %v2320_v16  ;;  %v1898_v14 = vpop.f32.mrf.mxu1 }
 0x26b   : > { %v2194_v42 = vpop.f32.mrf.mxu2  ;;  %v1950_v53 = vadd.f32 %v4824_v27, %v1642_v61  ;;  %v4877_v26 = vpop.xlane.xlu1 %2279 }
 0x26d   : > { %v2258_v35 = vadd.f32 %v2194_v42, %v1950_v53  ;;  %v2526_v52 = vpop.xlane.xlu0 %2525 }
 0x26e   : > { %v2650_v36 = vperm.slane %v2526_v52, %v4875_v10  ;;  %v1273_v20 = vpop.f32.mrf.mxu3 }
 0x26f   : > { %v1335_v39 = vadd.f32 %v1273_v20, %v4405_v34  ;;  %v2323_v38 = vsel %vm2274_vm2, %v2258_v35, 0.0  ;;  %v2505_v56 = vmul.f32 %v2258_v35, %v2258_v35 }
 0x270   : > { %v2681_v28 = vsel %vm2437_vm3, %v2650_v36, %v2649_v13  ;;  %2324 = vadd.xlane.f32.xlu0 %v2323_v38 }
 0x271   : > { %v1643_v27 = vadd.f32 %v1581_v33, %v1335_v39  ;;  %v2569_v30 = vsel %vm2274_vm2, %v2505_v56, 0.0 }
 0x272   : > { %v1584_v41 = vpop.f32.mrf.mxu0  ;;  %2570 = vadd.xlane.f32.xlu1 %v2569_v30  ;;  %v1901_v0 = vpop.f32.mrf.mxu1 }
 0x273   : > { %v2197_v43 = vpop.f32.mrf.mxu2  ;;  %v1951_v29 = vadd.f32 %v4841_v58, %v1643_v27  ;;  %v4886_v12 = vpop.xlane.xlu2 %2282 }
 0x275   : > { %v2259_v46 = vadd.f32 %v2197_v43, %v1951_v29  ;;  %v2529_v22 = vpop.xlane.xlu1 %2528 }
 0x276   : > { %v2651_v34 = vperm.slane %v2529_v22, %v4875_v10  ;;  %v1276_v24 = vpop.f32.mrf.mxu3 }
 0x277   : > { %v1336_v50 = vadd.f32 %v1276_v24, %v4426_v47  ;;  %v2506_v49 = vmul.f32 %v2259_v46, %v2259_v46  ;;  %v2326_v6 = vsel %vm2274_vm2, %v2259_v46, 0.0 }
 0x278   : > { %v2682_v62 = vsel %vm2439_vm4, %v2651_v34, %v2681_v28 }
 0x279   : > { %v1644_v51 = vadd.f32 %v1584_v41, %v1336_v50  ;;  %v2572_v57 = vsel %vm2274_vm2, %v2506_v49, 0.0  ;;  %v2406_v50 = vperm.slane %v4877_v26, %v4875_v10 }
 0x27a   : > { %v1587_v59 = vpop.f32.mrf.mxu0  ;;  %2327 = vadd.xlane.f32.xlu1 %v2326_v6  ;;  %2573 = vadd.xlane.f32.xlu2 %v2572_v57  ;;  %v1904_v35 = vpop.f32.mrf.mxu1 }
 0x27b   : > { %v2200_v58 = vpop.f32.mrf.mxu2  ;;  %v1952_v63 = vadd.f32 %v4859_v17, %v1644_v51  ;;  %v4894_v8 = vpop.xlane.xlu2 %2285  ;;  %v2407_v51 = vperm.slane %v4886_v12, %v4875_v10 }
 0x27d   : > { %v2260_v4 = vadd.f32 %v2200_v58, %v1952_v63 }
 0x27e   : > { %v1279_v2 = vpop.f32.mrf.mxu3 }
 0x27f   : > { %v1337_v47 = vadd.f32 %v1279_v2, %v4447_v15  ;;  %v2507_v7 = vmul.f32 %v2260_v4, %v2260_v4  ;;  %v2329_v44 = vsel %vm2274_vm2, %v2260_v4, 0.0 }
 0x281   : > { %v1645_v3 = vadd.f32 %v1587_v59, %v1337_v47  ;;  %v2575_v55 = vsel %vm2274_vm2, %v2507_v7, 0.0  ;;  %v2408_v59 = vperm.slane %v4894_v8, %v4875_v10 }
 0x282   : > { %v1590_v48 = vpop.f32.mrf.mxu0  ;;  %2330 = vadd.xlane.f32.xlu2 %v2329_v44  ;;  %2576 = vadd.xlane.f32.xlu0 %v2575_v55  ;;  %v4907_v46 = vpop.f32.mrf.mxu1 }
 0x283   : > { %v2203_v61 = vpop.f32.mrf.mxu2  ;;  %v1953_v16 = vadd.f32 %v1895_v32, %v1645_v3  ;;  %v2532_v33 = vpop.xlane.xlu2 %2531 }
 0x284   : > { %v2289_v17 = vpop.xlane.xlu0 %2288  ;;  %v2652_v42 = vperm.slane %v2532_v33, %v4875_v10 }
 0x285   : > { %v2261_v45 = vadd.f32 %v2203_v61, %v1953_v16  ;;  %v2409_v2 = vperm.slane %v2289_v17, %v4875_v10 }
 0x286   : > { %v2683_v53 = vsel %vm2441_vm5, %v2652_v42, %v2682_v62  ;;  %v1282_v15 = vpop.f32.mrf.mxu3 }
 0x287   : > { %v1338_v52 = vadd.f32 %v1282_v15, %v4468_v19  ;;  %v2332_v36 = vsel %vm2274_vm2, %v2261_v45, 0.0  ;;  %v2508_v30 = vmul.f32 %v2261_v45, %v2261_v45 }
 0x289   : > { %v1646_v13 = vadd.f32 %v1590_v48, %v1338_v52 }
 0x28a   : > { %v1593_v20 = vpop.f32.mrf.mxu0  ;;  %2333 = vadd.xlane.f32.xlu0 %v2332_v36  ;;  %v1910_v48 = vpop.f32.mrf.mxu1 }
 0x28b   : > { %v2206_v39 = vpop.f32.mrf.mxu2  ;;  %v1954_v38 = vadd.f32 %v1898_v14, %v1646_v13  ;;  %v2292_v56 = vpop.xlane.xlu1 %2291  ;;  %v2578_v14 = vsel %vm2274_vm2, %v2508_v30, 0.0 }
 0x28c   : > { %v2535_v32 = vpop.xlane.xlu0 %2534 }
 0x28d   : > { %v2653_v28 = vperm.slane %v2535_v32, %v4875_v10  ;;  %v2262_v27 = vadd.f32 %v2206_v39, %v1954_v38 }
 0x28e   : > { %v1285_v43 = vpop.f32.mrf.mxu3 }
 0x28f   : > { %v2684_v41 = vsel %vm2443_vm6, %v2653_v28, %v2683_v53  ;;  %v1339_v29 = vadd.f32 %v1285_v43, %v4489_v21  ;;  %v2335_v19 = vsel %vm2274_vm2, %v2262_v27, 0.0  ;;  %v2405_v21 = vperm.slane %v4867_v37, %v4875_v10 }
 0x290   : > { %2336 = vadd.xlane.f32.xlu1 %v2335_v19  ;;  %v2509_v57 = vmul.f32 %v2262_v27, %v2262_v27  ;;  %v2410_v37 = vperm.slane %v2292_v56, %v4875_v10 }
 0x291   : > { %v1647_v22 = vadd.f32 %v1593_v20, %v1339_v29  ;;  %v2438_v4 = vsel %vm2437_vm3, %v2406_v50, %v2405_v21 }
 0x292   : > { %v1596_v34 = vpop.f32.mrf.mxu0  ;;  %2579 = vadd.xlane.f32.xlu0 %v2578_v14  ;;  %v2440_v12 = vsel %vm2439_vm4, %v2407_v51, %v2438_v4  ;;  %v2581_v3 = vsel %vm2274_vm2, %v2509_v57, 0.0  ;;  %v1913_v43 = vpop.f32.mrf.mxu1 }
 0x293   : > { %v2209_v24 = vpop.f32.mrf.mxu2  ;;  %v1955_v49 = vadd.f32 %v1901_v0, %v1647_v22  ;;  %v2538_v58 = vpop.xlane.xlu1 %2537  ;;  %v2442_v55 = vsel %vm2441_vm5, %v2408_v59, %v2440_v12 }
 0x294   : > { %v2295_v62 = vpop.xlane.xlu2 %2294  ;;  %v2654_v47 = vperm.slane %v2538_v58, %v4875_v10  ;;  %v2444_v61 = vsel %vm2443_vm6, %v2409_v2, %v2442_v55 }
 0x295   : > { %v2263_v6 = vadd.f32 %v2209_v24, %v1955_v49  ;;  %v2411_v8 = vperm.slane %v2295_v62, %v4875_v10  ;;  %v2446_v42 = vsel %vm2445_vm7, %v2410_v37, %v2444_v61 }
 0x296   : > { %v1288_v63 = vpop.f32.mrf.mxu3  ;;  %v2685_v15 = vsel %vm2445_vm7, %v2654_v47, %v2684_v41 }
 0x297   : > { %v1340_v26 = vadd.f32 %v1288_v63, %v4512_v23  ;;  %v2338_v0 = vsel %vm2274_vm2, %v2263_v6, 0.0  ;;  %v2448_v52 = vsel %vm2447_vm8, %v2411_v8, %v2446_v42  ;;  %v2510_v13 = vmul.f32 %v2263_v6, %v2263_v6 }
 0x298   : > { %2339 = vadd.xlane.f32.xlu2 %v2338_v0 }
 0x299   : > { %v1648_v7 = vadd.f32 %v1596_v34, %v1340_v26  ;;  %v2584_v56 = vsel %vm2274_vm2, %v2510_v13, 0.0 }
 0x29a   : > { %v1599_v44 = vpop.f32.mrf.mxu0  ;;  %2582 = vadd.xlane.f32.xlu0 %v2581_v3  ;;  %v1916_v63 = vpop.f32.mrf.mxu1 }
 0x29b   : > { %v2212_v23 = vpop.f32.mrf.mxu2  ;;  %v1956_v16 = vadd.f32 %v1904_v35, %v1648_v7  ;;  %v2298_v17 = vpop.xlane.xlu0 %2297 }
 0x29c   : > { %v2541_v33 = vpop.xlane.xlu2 %2540  ;;  %v2412_v53 = vperm.slane %v2298_v17, %v4875_v10 }
 0x29d   : > { %v2655_v45 = vperm.slane %v2541_v33, %v4875_v10  ;;  %v2264_v39 = vadd.f32 %v2212_v23, %v1956_v16 }
 0x29e   : > { %v1291_v36 = vpop.f32.mrf.mxu3  ;;  %v2450_v20 = vsel %vm2449_vm9, %v2412_v53, %v2448_v52 }
 0x29f   : > { %v4936_v35 = vsel %vm2447_vm8, %v2655_v45, %v2685_v15  ;;  %v1341_v38 = vadd.f32 %v1291_v36, %v4535_v11  ;;  %v2477_v32 = vsel %vm2476_vm10, %v2450_v20, 0.0  ;;  %v2511_v41 = vmul.f32 %v2264_v39, %v2264_v39 }
 0x2a0   : > { %2478 = vadd.xlane.f32.xlu1 %v2477_v32  ;;  %v2341_v50 = vsel %vm2274_vm2, %v2264_v39, 0.0 }
 0x2a1   : > { %v1649_v30 = vadd.f32 %v1599_v44, %v1341_v38  ;;  %v2587_v11 = vsel %vm2274_vm2, %v2511_v41, 0.0 }
 0x2a2   : > { %v1602_v28 = vpop.f32.mrf.mxu0  ;;  %2585 = vadd.xlane.f32.xlu0 %v2584_v56  ;;  %v1919_v33 = vpop.f32.mrf.mxu1 }
 0x2a3   : > { %v2215_v27 = vpop.f32.mrf.mxu2  ;;  %v1957_v14 = vadd.f32 %v4907_v46, %v1649_v30 }
 0x2a4   : > { %v4941_v29 = vpop.xlane.xlu0 %2543 }
 0x2a5   : > { %v2547_v19 = vpop.xlane.xlu2 %2546  ;;  %v4947_v51 = vadd.f32 %v2215_v27, %v1957_v14 }
 0x2a6   : > { %v1294_v22 = vpop.f32.mrf.mxu3  ;;  %v2657_v46 = vperm.slane %v2547_v19, %v4875_v10 }
 0x2a7   : > { %v1342_v34 = vadd.f32 %v1294_v22, %v4373_v31  ;;  %v2344_v26 = vsel %vm2274_vm2, %v4947_v51, 0.0 }
 0x2a8   : > { %2588 = vadd.xlane.f32.xlu1 %v2587_v11 }
 0x2a9   : > { %v1650_v24 = vadd.f32 %v1602_v28, %v1342_v34 }
 0x2aa   : > { %v1605_v49 = vpop.f32.mrf.mxu0  ;;  %2342 = vadd.xlane.f32.xlu0 %v2341_v50  ;;  %v1922_v30 = vpop.f32.mrf.mxu1 }
 0x2ab   : > { %v2218_v62 = vpop.f32.mrf.mxu2  ;;  %v1958_v21 = vadd.f32 %v1910_v48, %v1650_v24 }
 0x2ad   : > { %v2266_v6 = vadd.f32 %v2218_v62, %v1958_v21  ;;  %v4949_v57 = vpop.xlane.xlu2 %2303  ;;  %v2550_v59 = vpop.xlane.xlu0 %2549 }
 0x2ae   : > { %v2658_v31 = vperm.slane %v2550_v59, %v4875_v10  ;;  %v1297_v58 = vpop.f32.mrf.mxu3 }
 0x2af   : > { %v1343_v4 = vadd.f32 %v1297_v58, %v4394_v18  ;;  %v2347_v2 = vsel %vm2274_vm2, %v2266_v6, 0.0  ;;  %v2513_v0 = vmul.f32 %v2266_v6, %v2266_v6  ;;  %v2301_v6 = vpop.xlane.xlu1 %2300 }
 0x2b0   : > { %v2688_v12 = vsel %vm2437_vm3, %v2658_v31, %v2657_v46  ;;  %2348 = vadd.xlane.f32.xlu2 %v2347_v2  ;;  %2345 = vadd.xlane.f32.xlu1 %v2344_v26 }
 0x2b1   : > { %v1651_v37 = vadd.f32 %v1605_v49, %v1343_v4  ;;  %v2593_v47 = vsel %vm2274_vm2, %v2513_v0, 0.0 }
 0x2b2   : > { %v1608_v8 = vpop.f32.mrf.mxu0  ;;  %2594 = vadd.xlane.f32.xlu0 %v2593_v47  ;;  %v1925_v59 = vpop.f32.mrf.mxu1 }
 0x2b3   : > { %v2221_v7 = vpop.f32.mrf.mxu2  ;;  %v1959_v3 = vadd.f32 %v1913_v43, %v1651_v37 }
 0x2b5   : > { %v2267_v44 = vadd.f32 %v2221_v7, %v1959_v3  ;;  %v2553_v55 = vpop.xlane.xlu2 %2552  ;;  %v4968_v43 = vpop.xlane.xlu0 %2306 }
 0x2b6   : > { %v2659_v18 = vperm.slane %v2553_v55, %v4875_v10  ;;  %v1300_v23 = vpop.f32.mrf.mxu3 }
 0x2b7   : > { %v1344_v48 = vadd.f32 %v1300_v23, %v4415_v40  ;;  %v2514_v61 = vmul.f32 %v2267_v44, %v2267_v44  ;;  %v2350_v42 = vsel %vm2274_vm2, %v2267_v44, 0.0 }
 0x2b8   : > { %v2689_v16 = vsel %vm2439_vm4, %v2659_v18, %v2688_v12 }
 0x2b9   : > { %v1652_v17 = vadd.f32 %v1608_v8, %v1344_v48  ;;  %v2596_v45 = vsel %vm2274_vm2, %v2514_v61, 0.0 }
 0x2ba   : > { %v1611_v53 = vpop.f32.mrf.mxu0  ;;  %2351 = vadd.xlane.f32.xlu0 %v2350_v42  ;;  %2597 = vadd.xlane.f32.xlu1 %v2596_v45  ;;  %v1928_v61 = vpop.f32.mrf.mxu1 }
 0x2bb   : > { %v2224_v15 = vpop.f32.mrf.mxu2  ;;  %v1960_v52 = vadd.f32 %v1916_v63, %v1652_v17  ;;  %v2310_v47 = vpop.xlane.xlu1 %2309 }
 0x2bd   : > { %v2268_v13 = vadd.f32 %v2224_v15, %v1960_v52  ;;  %v2556_v36 = vpop.xlane.xlu2 %2555  ;;  %v2415_v52 = vperm.slane %v4968_v43, %v4875_v10 }
 0x2be   : > { %v2660_v20 = vperm.slane %v2556_v36, %v4875_v10  ;;  %v1303_v39 = vpop.f32.mrf.mxu3  ;;  %v2416_v36 = vperm.slane %v2310_v47, %v4875_v10 }
 0x2bf   : > { %v1345_v40 = vadd.f32 %v1303_v39, %v4436_v54  ;;  %v2353_v56 = vsel %vm2274_vm2, %v2268_v13, 0.0  ;;  %v2515_v14 = vmul.f32 %v2268_v13, %v2268_v13 }
 0x2c0   : > { %v2690_v38 = vsel %vm2441_vm5, %v2660_v20, %v2689_v16 }
 0x2c1   : > { %v1653_v32 = vadd.f32 %v1611_v53, %v1345_v40  ;;  %v2599_v50 = vsel %vm2274_vm2, %v2515_v14, 0.0  ;;  %v2414_v53 = vperm.slane %v4949_v57, %v4875_v10 }
 0x2c2   : > { %v1614_v28 = vpop.f32.mrf.mxu0  ;;  %2354 = vadd.xlane.f32.xlu1 %v2353_v56 }
 0x2c3   : > { %v2227_v27 = vpop.f32.mrf.mxu2  ;;  %v1961_v41 = vadd.f32 %v1919_v33, %v1653_v32 }
 0x2c5   : > { %v2269_v19 = vadd.f32 %v2227_v27, %v1961_v41  ;;  %v4970_v22 = vpop.xlane.xlu2 %2312 }
 0x2c6   : > { %v1306_v34 = vpop.f32.mrf.mxu3  ;;  %v2417_v39 = vperm.slane %v4970_v22, %v4875_v10 }
 0x2c7   : > { %v1346_v11 = vadd.f32 %v1306_v34, %v4457_v9  ;;  %v2356_v54 = vsel %vm2274_vm2, %v2269_v19, 0.0  ;;  %v2516_v63 = vmul.f32 %v2269_v19, %v2269_v19  ;;  %v1931_v34 = vpop.f32.mrf.mxu1 }
 0x2c8   : > { %2357 = vadd.xlane.f32.xlu2 %v2356_v54 }
 0x2c9   : > { %v1654_v24 = vadd.f32 %v1614_v28, %v1346_v11  ;;  %v2602_v12 = vsel %vm2274_vm2, %v2516_v63, 0.0 }
 0x2ca   : > { %2600 = vadd.xlane.f32.xlu1 %v2599_v50  ;;  %v1617_v62 = vpop.f32.mrf.mxu0 }
 0x2cb   : > { %v2230_v49 = vpop.f32.mrf.mxu2  ;;  %v1962_v21 = vadd.f32 %v1922_v30, %v1654_v24  ;;  %v2316_v46 = vpop.xlane.xlu0 %2315 }
 0x2cc   : > { %v2418_v57 = vperm.slane %v2316_v46, %v4875_v10 }
 0x2cd   : > { %v2270_v31 = vadd.f32 %v2230_v49, %v1962_v21  ;;  %v2559_v58 = vpop.xlane.xlu2 %2558 }
 0x2ce   : > { %v2661_v4 = vperm.slane %v2559_v58, %v4875_v10  ;;  %v1309_v2 = vpop.f32.mrf.mxu3 }
 0x2cf   : > { %v2359_v9 = vsel %vm2274_vm2, %v2270_v31, 0.0  ;;  %v1347_v0 = vadd.f32 %v1309_v2, %v4478_v25  ;;  %v2517_v55 = vmul.f32 %v2270_v31, %v2270_v31 }
 0x2d0   : > { %v2691_v26 = vsel %vm2443_vm6, %v2661_v4, %v2690_v38  ;;  %2360 = vadd.xlane.f32.xlu0 %v2359_v9 }
 0x2d1   : > { %v1655_v7 = vadd.f32 %v1617_v62, %v1347_v0  ;;  %v2605_v42 = vsel %vm2274_vm2, %v2517_v55, 0.0  ;;  %v2504_v0 = vmul.f32 %v4869_v1, %v4869_v1  ;;  %v2512_v1 = vmul.f32 %v4947_v51, %v4947_v51 }
 0x2d2   : > { %2603 = vadd.xlane.f32.xlu1 %v2602_v12  ;;  %v1620_v8 = vpop.f32.mrf.mxu0 }
 0x2d3   : > { %v2233_v37 = vpop.f32.mrf.mxu2  ;;  %v1963_v33 = vadd.f32 %v1925_v59, %v1655_v7  ;;  %v2319_v20 = vpop.xlane.xlu1 %2318 }
 0x2d4   : > { %v2419_v41 = vperm.slane %v2319_v20, %v4875_v10 }
 0x2d5   : > { %v2562_v3 = vpop.xlane.xlu2 %2561  ;;  %v2565_v44 = vpop.xlane.xlu0 %2564  ;;  %v2271_v40 = vadd.f32 %v2233_v37, %v1963_v33 }
 0x2d6   : > { %v2662_v18 = vperm.slane %v2562_v3, %v4875_v10  ;;  %v2663_v23 = vperm.slane %v2565_v44, %v4875_v10  ;;  %v1312_v48 = vpop.f32.mrf.mxu3  ;;  %v2566_v3 = vsel %vm2274_vm2, %v2504_v0, 0.0  ;;  %v2656_v44 = vperm.slane %v4941_v29, %v4875_v10 }
 0x2d7   : > { %v1348_v16 = vadd.f32 %v1312_v48, %v4501_v5  ;;  %v2413_v5 = vperm.slane %v2301_v6, %v4875_v10  ;;  %v2362_v24 = vsel %vm2274_vm2, %v2271_v40, 0.0  ;;  %v2518_v59 = vmul.f32 %v2271_v40, %v2271_v40 }
 0x2d8   : > { %v2692_v25 = vsel %vm2445_vm7, %v2662_v18, %v2691_v26  ;;  %v2590_v48 = vsel %vm2274_vm2, %v2512_v1, 0.0 }
 0x2d9   : > { %v1656_v17 = vadd.f32 %v1620_v8, %v1348_v16  ;;  %v4986_v45 = vsel %vm2447_vm8, %v2663_v23, %v2692_v25  ;;  %v2451_v56 = vsel %vm2437_vm3, %v2414_v53, %v2413_v5  ;;  %v2608_v58 = vsel %vm2274_vm2, %v2518_v59, 0.0 }
 0x2da   : > { %2606 = vadd.xlane.f32.xlu1 %v2605_v42  ;;  %v1623_v27 = vpop.f32.mrf.mxu0  ;;  %v2452_v30 = vsel %vm2439_vm4, %v2415_v52, %v2451_v56  ;;  %v2687_v23 = vsel %vm2449_vm9, %v2656_v44, %v4936_v35 }
 0x2db   : > { %v2236_v15 = vpop.f32.mrf.mxu2  ;;  %v1964_v13 = vadd.f32 %v1928_v61, %v1656_v17  ;;  %v2453_v14 = vsel %vm2441_vm5, %v2416_v36, %v2452_v30  ;;  %v2713_v16 = vsel %vm2476_vm10, %v2687_v23, 0.0 }
 0x2dc   : > { %v2454_v11 = vsel %vm2443_vm6, %v2417_v39, %v2453_v14 }
 0x2dd   : > { %v2272_v38 = vadd.f32 %v2236_v15, %v1964_v13  ;;  %v2322_v32 = vpop.xlane.xlu2 %2321  ;;  %v2455_v50 = vsel %vm2445_vm7, %v2418_v57, %v2454_v11 }
 0x2de   : > { %v1315_v28 = vpop.f32.mrf.mxu3  ;;  %v2420_v22 = vperm.slane %v2322_v32, %v4875_v10 }
 0x2df   : > { %v1349_v43 = vadd.f32 %v1315_v28, %v4524_v60  ;;  %v2365_v19 = vsel %vm2274_vm2, %v2272_v38, 0.0  ;;  %v2456_v60 = vsel %vm2447_vm8, %v2419_v41, %v2455_v50  ;;  %v2519_v2 = vmul.f32 %v2272_v38, %v2272_v38 }
 0x2e0   : > { %2366 = vadd.xlane.f32.xlu2 %v2365_v19  ;;  %v2457_v21 = vsel %vm2449_vm9, %v2420_v22, %v2456_v60 }
 0x2e1   : > { %v1657_v54 = vadd.f32 %v1623_v27, %v1349_v43  ;;  %v2480_v31 = vsel %vm2476_vm10, %v2457_v21, 0.0  ;;  %v2611_v8 = vsel %vm2274_vm2, %v2519_v2, 0.0 }
 0x2e2   : > { %2363 = vadd.xlane.f32.xlu1 %v2362_v24 }
 0x2e3   : > { %v2239_v49 = vpop.f32.mrf.mxu2  ;;  %v1965_v62 = vadd.f32 %v1931_v34, %v1657_v54  ;;  %v2325_v9 = vpop.xlane.xlu0 %2324 }
 0x2e4   : > { %v2421_v57 = vperm.slane %v2325_v9, %v4875_v10 }
 0x2e5   : > { %v2273_v6 = vadd.f32 %v2239_v49, %v1965_v62  ;;  %v2571_v63 = vpop.xlane.xlu1 %2570 }
 0x2e6   : > { %v2665_v12 = vperm.slane %v2571_v63, %v4875_v10 }
 0x2e7   : > { %v2368_v46 = vsel %vm2274_vm2, %v2273_v6, 0.0  ;;  %v2520_v4 = vmul.f32 %v2273_v6, %v2273_v6 }
 0x2e8   : > { %2369 = vadd.xlane.f32.xlu0 %v2368_v46  ;;  %2481 = vadd.xlane.f32.xlu2 %v2480_v31 }
 0x2e9   : > { %v2614_v47 = vsel %vm2274_vm2, %v2520_v4, 0.0 }
 0x2ea   : > { %2609 = vadd.xlane.f32.xlu1 %v2608_v58 }
 0x2ed   : > { %v2574_v26 = vpop.xlane.xlu2 %2573  ;;  %v2328_v25 = vpop.xlane.xlu1 %2327 }
 0x2ee   : > { %v2666_v37 = vperm.slane %v2574_v26, %v4875_v10  ;;  %v2422_v40 = vperm.slane %v2328_v25, %v4875_v10 }
 0x2f0   : > { %v2695_v7 = vsel %vm2437_vm3, %v2666_v37, %v2665_v12  ;;  %2615 = vadd.xlane.f32.xlu0 %v2614_v47  ;;  %2612 = vadd.xlane.f32.xlu2 %v2611_v8  ;;  %v2458_v43 = vsel %vm2437_vm3, %v2422_v40, %v2421_v57 }
 0x2f2   : > { %2567 = vadd.xlane.f32.xlu1 %v2566_v3 }
 0x2f5   : > { %v2577_v55 = vpop.xlane.xlu0 %2576  ;;  %v2331_v13 = vpop.xlane.xlu2 %2330 }
 0x2f6   : > { %v2667_v18 = vperm.slane %v2577_v55, %v4875_v10  ;;  %v2423_v32 = vperm.slane %v2331_v13, %v4875_v10 }
 0x2f8   : > { %v2696_v61 = vsel %vm2439_vm4, %v2667_v18, %v2695_v7  ;;  %2591 = vadd.xlane.f32.xlu2 %v2590_v48  ;;  %v2459_v14 = vsel %vm2439_vm4, %v2423_v32, %v2458_v43 }
 0x2fa   : > { %2714 = vadd.xlane.f32.xlu1 %v2713_v16 }
 0x2fd   : > { %v2334_v29 = vpop.xlane.xlu0 %2333 }
 0x2fe   : > { %v2424_v28 = vperm.slane %v2334_v29, %v4875_v10 }
 0x300   : > { %v2460_v34 = vsel %vm2441_vm5, %v2424_v28, %v2459_v14 }
 0x303   : > { %v2337_v42 = vpop.xlane.xlu1 %2336 }
 0x304   : > { %v2425_v41 = vperm.slane %v2337_v42, %v4875_v10 }
 0x305   : > { %v2580_v33 = vpop.xlane.xlu0 %2579 }
 0x306   : > { %v2668_v51 = vperm.slane %v2580_v33, %v4875_v10  ;;  %v2461_v11 = vsel %vm2443_vm6, %v2425_v41, %v2460_v34 }
 0x308   : > { %v2697_v17 = vsel %vm2441_vm5, %v2668_v51, %v2696_v61 }
 0x30b   : > { %v2340_v56 = vpop.xlane.xlu2 %2339 }
 0x30c   : > { %v2426_v19 = vperm.slane %v2340_v56, %v4875_v10 }
 0x30d   : > { %v2583_v53 = vpop.xlane.xlu0 %2582 }
 0x30e   : > { %v2669_v15 = vperm.slane %v2583_v53, %v4875_v10  ;;  %v2462_v24 = vsel %vm2445_vm7, %v2426_v19, %v2461_v11 }
 0x310   : > { %v2698_v35 = vsel %vm2443_vm6, %v2669_v15, %v2697_v17 }
 0x313   : > { %v2479_v52 = vpop.xlane.xlu1 %2478 }
 0x314   : > { %2726 = vst.msk [vmem:[%s5038_s19] sm:$0xff] %vm2725_vm11, %v2479_v52 }
 0x315   : > { %v2586_v5 = vpop.xlane.xlu0 %2585 }
 0x316   : > { %v2670_v36 = vperm.slane %v2586_v5, %v4875_v10 }
 0x318   : > { %v2699_v20 = vsel %vm2445_vm7, %v2670_v36, %v2698_v35 }
 0x31b   : > { %v2589_v39 = vpop.xlane.xlu1 %2588 }
 0x31c   : > { %v2671_v38 = vperm.slane %v2589_v39, %v4875_v10 }
 0x31d   : > { %v2343_v27 = vpop.xlane.xlu0 %2342 }
 0x31e   : > { %v5050_v30 = vsel %vm2447_vm8, %v2671_v38, %v2699_v20  ;;  %v2427_v22 = vperm.slane %v2343_v27, %v4875_v10 }
 0x320   : > { %v2463_v49 = vsel %vm2447_vm8, %v2427_v22, %v2462_v24 }
 0x323   : > { %v2346_v54 = vpop.xlane.xlu1 %2345  ;;  %v2349_v31 = vpop.xlane.xlu2 %2348 }
 0x324   : > { %v2428_v50 = vperm.slane %v2346_v54, %v4875_v10  ;;  %v2429_v37 = vperm.slane %v2349_v31, %v4875_v10 }
 0x325   : > { %v2595_v46 = vpop.xlane.xlu0 %2594 }
 0x326   : > { %v2464_v62 = vsel %vm2449_vm9, %v2428_v50, %v2463_v49  ;;  %v2673_v53 = vperm.slane %v2595_v46, %v4875_v10 }
 0x327   : > { %v2483_v60 = vsel %vm2476_vm10, %v2464_v62, 0.0 }
 0x328   : > { %2484 = vadd.xlane.f32.xlu0 %v2483_v60 }
 0x32d   : > { %v2598_v21 = vpop.xlane.xlu1 %2597  ;;  %v2352_v63 = vpop.xlane.xlu0 %2351 }
 0x32e   : > { %v2430_v9 = vperm.slane %v2352_v63, %v4875_v10  ;;  %v2674_v25 = vperm.slane %v2598_v21, %v4875_v10 }
 0x330   : > { %v2465_v3 = vsel %vm2437_vm3, %v2430_v9, %v2429_v37  ;;  %v2702_v13 = vsel %vm2437_vm3, %v2674_v25, %v2673_v53 }
 0x335   : > { %v2355_v6 = vpop.xlane.xlu1 %2354 }
 0x336   : > { %v2431_v0 = vperm.slane %v2355_v6, %v4875_v10 }
 0x338   : > { %v2466_v1 = vsel %vm2439_vm4, %v2431_v0, %v2465_v3 }
 0x33b   : > { %v2358_v4 = vpop.xlane.xlu2 %2357 }
 0x33c   : > { %v2432_v47 = vperm.slane %v2358_v4, %v4875_v10 }
 0x33d   : > { %v2601_v59 = vpop.xlane.xlu1 %2600 }
 0x33e   : > { %v2467_v55 = vsel %vm2441_vm5, %v2432_v47, %v2466_v1  ;;  %v2675_v17 = vperm.slane %v2601_v59, %v4875_v10 }
 0x340   : > { %v2703_v36 = vsel %vm2439_vm4, %v2675_v17, %v2702_v13 }
 0x343   : > { %v2361_v26 = vpop.xlane.xlu0 %2360 }
 0x344   : > { %v2433_v8 = vperm.slane %v2361_v26, %v4875_v10 }
 0x345   : > { %v2604_v58 = vpop.xlane.xlu1 %2603 }
 0x346   : > { %v2468_v18 = vsel %vm2443_vm6, %v2433_v8, %v2467_v55  ;;  %v2676_v15 = vperm.slane %v2604_v58, %v4875_v10 }
 0x348   : > { %v2704_v20 = vsel %vm2441_vm5, %v2676_v15, %v2703_v36 }
 0x34d   : > { %v2607_v2 = vpop.xlane.xlu1 %2606 }
 0x34e   : > { %v2677_v52 = vperm.slane %v2607_v2, %v4875_v10 }
 0x350   : > { %v2705_v38 = vsel %vm2443_vm6, %v2677_v52, %v2704_v20 }
 0x353   : > { %v2367_v12 = vpop.xlane.xlu2 %2366 }
 0x354   : > { %v2435_v48 = vperm.slane %v2367_v12, %v4875_v10 }
 0x355   : > { %v2364_v7 = vpop.xlane.xlu1 %2363 }
 0x356   : > { %v2434_v44 = vperm.slane %v2364_v7, %v4875_v10 }
 0x358   : > { %v2469_v23 = vsel %vm2445_vm7, %v2434_v44, %v2468_v18 }
 0x359   : > { %v2470_v51 = vsel %vm2447_vm8, %v2435_v48, %v2469_v23 }
 0x35b   : > { %v2482_v61 = vpop.xlane.xlu2 %2481  ;;  %v2370_v16 = vpop.xlane.xlu0 %2369 }
 0x35c   : > { %2727 = vst.msk [vmem:[%s5038_s19 + $0x8] sm:$0xff] %vm2725_vm11, %v2482_v61  ;;  %v2436_v29 = vperm.slane %v2370_v16, %v4875_v10 }
 0x35d   : > { %v2610_v33 = vpop.xlane.xlu1 %2609 }
 0x35e   : > { %v2471_v42 = vsel %vm2449_vm9, %v2436_v29, %v2470_v51  ;;  %v2678_v5 = vperm.slane %v2610_v33, %v4875_v10 }
 0x35f   : > { %v2486_v35 = vsel %vm2476_vm10, %v2471_v42, 0.0 }
 0x360   : > { %2487 = vadd.xlane.f32.xlu1 %v2486_v35  ;;  %v2706_v57 = vsel %vm2445_vm7, %v2678_v5, %v2705_v38 }
 0x363   : > { %v2613_v39 = vpop.xlane.xlu2 %2612  ;;  %v2616_v40 = vpop.xlane.xlu0 %2615 }
 0x364   : > { %v2679_v32 = vperm.slane %v2613_v39, %v4875_v10  ;;  %v2680_v56 = vperm.slane %v2616_v40, %v4875_v10 }
 0x365   : > { %v2568_v28 = vpop.xlane.xlu1 %2567 }
 0x366   : > { %v2664_v27 = vperm.slane %v2568_v28, %v4875_v10  ;;  %v2707_v41 = vsel %vm2447_vm8, %v2679_v32, %v2706_v57 }
 0x367   : > { %v2708_v43 = vsel %vm2449_vm9, %v2680_v56, %v2707_v41 }
 0x368   : > { %v2722_v19 = vsel %vm2476_vm10, %v2708_v43, 0.0  ;;  %v2694_v14 = vsel %vm2449_vm9, %v2664_v27, %v4986_v45 }
 0x369   : > { %2723 = vadd.xlane.f32.xlu1 %v2722_v19  ;;  %v2716_v22 = vsel %vm2476_vm10, %v2694_v14, 0.0 }
 0x36a   : > { %2717 = vadd.xlane.f32.xlu2 %v2716_v22 }
 0x36b   : > { %v2592_v34 = vpop.xlane.xlu2 %2591 }
 0x36c   : > { %v2672_v11 = vperm.slane %v2592_v34, %v4875_v10 }
 0x36d   : > { %v2715_v54 = vpop.xlane.xlu1 %2714 }
 0x36e   : > { %2731 = vst.msk [vmem:[%s5038_s19] sm:$0xff] %vm2730_vm12, %v2715_v54  ;;  %v2701_v24 = vsel %vm2449_vm9, %v2672_v11, %v5050_v30 }
 0x36f   : > { %v2719_v50 = vsel %vm2476_vm10, %v2701_v24, 0.0 }
 0x370   : > { %2720 = vadd.xlane.f32.xlu0 %v2719_v50 }
 0x39b   : > { %v2485_v45 = vpop.xlane.xlu0 %2484 }
 0x39c   : > { %2728 = vst.msk [vmem:[%s5038_s19 + $0x10] sm:$0xff] %vm2725_vm11, %v2485_v45 }
 0x3d3   : > { %v2488_v49 = vpop.xlane.xlu1 %2487 }
 0x3d4   : > { %2729 = vst.msk [vmem:[%s5038_s19 + $0x18] sm:$0xff] %vm2725_vm11, %v2488_v49 }
 0x3dc   : > { %v2724_v62 = vpop.xlane.xlu1 %2723 }
 0x3dd   : > { %2734 = vst.msk [vmem:[%s5038_s19 + $0x18] sm:$0xff] %vm2730_vm12, %v2724_v62  ;;  %v2718_v60 = vpop.xlane.xlu2 %2717 }
 0x3de   : > { %2732 = vst.msk [vmem:[%s5038_s19 + $0x8] sm:$0xff] %vm2730_vm12, %v2718_v60 }
 0x3e3   : > { %v2721_v10 = vpop.xlane.xlu0 %2720 }
 0x3e4   : > { %2733 = vst.msk [vmem:[%s5038_s19 + $0x10] sm:$0xff] %vm2730_vm12, %v2721_v10 }
 0x3e5 PF: > { %s12_s11 = sadd.s32 1, %s3521_s11   ;;  %s5130_s9 = smov %s3517_s10 }
 0x3e6   : > { %p9_p5 = scmp.ge.s32.totalorder %s12_s11, 7   ;;  %s5131_s10 = smov %s5133_s12 }
 0x3e8   :  { %11 = sbr.rel (!%p9_p5) target bundleno = 2 (0x2), region = 64 }

// kernel: model_forward.3
= control target key start
LH: loop header
LB: loop body
LE: loop exit
PB: predicated region body
PF: predicated region fallthrough
CT: control target
= control target key end

     0   :  { %s4533_s15 = smov 0   ;;  %s4535_s16 = smov 0   ;;  %s6609_s0 = inlined_call_operand.vmem [shape: bf16[1,5,84,43], index: 0, kind: input, shape index: {}]   ;;  %s6610_s1 = inlined_call_operand.vmem [shape: f32[7,256,84], index: 1, kind: input, shape index: {}]   ;;  %s6611_s2 = inlined_call_operand.vmem [shape: f32[256,1], index: 2, kind: input, shape index: {}]   ;;  %s6612_s3 = inlined_call_operand.vmem [shape: f32[256,1], index: 3, kind: input, shape index: {}]   ;;  %s6613_s4 = inlined_call_operand.vmem [shape: f32[1,32,37,37], index: 4, kind: output, shape index: {}]  }
   0x1   :  { %s4537_s17 = smov 0   ;;  %s4539_s18 = smov 0  }
   0x2   :  { %s4541_s19 = smov 0  }
   0x3 LB: > { %s3641_s20 = sadd.s32 4294967295, %s4499_s19   ;;  %s23_s21 = sadd.s32 1, %s4495_s18  ;;  %s4499_s19 = sphi %s4541_s19, %s14_s19   ;;  %s4495_s18 = sphi %s4539_s18, %s6652_s18   ;;  %s4491_s17 = sphi %s4537_s17, %s6651_s17   ;;  %s4487_s16 = sphi %s4535_s16, %s6650_s16   ;;  %s4483_s15 = sphi %s4533_s15, %s6649_s15  }
   0x4   : > { %p24_p0 = scmp.ge.s32.totalorder %s23_s21, 5  ;;  %s126_s22 = sadd.s32 1, %s4487_s16 }
   0x5   : > { %p136_p1 = scmp.ne.s32.totalorder %s4487_s16, %s4483_s15  ;;  %p137_p2 = scmp.eq.s32.totalorder %s3641_s20, 4 }
   0x6   : > { %s6654_s21 = smov (%p24_p0, %s23_s21), 0  ;;  %p3645_p4 = scmp.ge.s32.totalorder %s4499_s19, 1 }
   0x7   : > { %p4565_p3 = por %p137_p2, %p136_p1  ;;  %s122_s24 = ssub.s32 %s4495_s18, %s6654_s21 }
   0x8   : > { %p182_p5 = scmp.lt.s32.totalorder %s4499_s19, 6  ;;  %p124_p6 = scmp.eq.s32.totalorder %s122_s24, 0 }
   0xa   : > { %p183_p7 = pnand %p3645_p4, %p182_p5 }
   0xb   : > { %s4574_s25 = scalar_select %p124_p6, %s4487_s16, %s126_s22  }
   0xc   : > { %186 = sbr.rel (%p183_p7) target bundleno = 796 (0x31c), region = 36 }
  0x11   : > { %p213_p8 = scmp.lt.s32.totalorder %s4491_s17, 4  ;;  %s4501_s5 = smov 126   ;;  %vm447_vm0 = vcmask 1043456   ;;  %v220_v42 = vld [vmem:[%s6610_s1] sm:$0xff]  ;;  %vm350_vm1 = vcmask 687104   ;;  %v221_v49 = vld [vmem:[%s6610_s1 + $0x8] sm:$0xff] }
  0x12   : > { %s4502_s6 = smov 127   ;;  %s4503_s7 = smov 125   ;;  %v222_v60 = vld [vmem:[%s6610_s1 + $0x10] sm:$0xff]  ;;  %vm3370_vm4 = vcmask 302080  }
  0x13   : > { %s214_s26 = scalar_select %p213_p8, %s4491_s17, 4 }
  0x14   : > { %s4504_s8 = smov 124   ;;  %s4505_s9 = smov 122  }
  0x15   : > { %s4132_s27 = smul.u32 44, %s214_s26  ;;  %s4506_s10 = smov 123  }
  0x17   : > { %s219_s30 = scalar_lea.vmem %s6609_s0, %s4132_s27  ;;  %s4072_s27 = sshll.u32 (%p4565_p3), %s4491_s17, 3 }
  0x18   : > { %v4098_v0 = vld [vmem:[%s219_s30 + $0x20] sm:$0xff]   ;;  %v262_v1 = vld [vmem:[%s219_s30 + $0x28] sm:$0x3]  ;;  %v4097_v2 = vld [vmem:[%s219_s30 + $0x18] sm:$0xff]   ;;  %s6530_s29 = scalar_lea.vmem (%p4565_p3), %s6613_s4, %s4072_s27 }
  0x19   : > { %v4581_v3 = vunpack.c.h.bf16 %v4098_v0  ;;  %v4583_v4 = vunpack.c.l.bf16 %v262_v1  ;;  %v4096_v5 = vld [vmem:[%s219_s30 + $0x10] sm:$0xff]   ;;  %v4587_v7 = vunpack.c.l.bf16 %v4098_v0  ;;  %v4589_v8 = vunpack.c.h.bf16 %v4097_v2  ;;  %v4095_v12 = vld [vmem:[%s219_s30 + $0x8] sm:$0xff]   ;;  %v4076_v16 = vld [vmem:[%s219_s30] sm:$0xff]   ;;  %s208_s30 = sand.u32 1, %s4483_s15  }
  0x1a   : > { %v4591_v9 = vunpack.c.h.bf16 %v4096_v5  ;;  %v4593_v10 = vunpack.c.l.bf16 %v4097_v2  ;;  %v4597_v13 = vunpack.c.h.bf16 %v4095_v12  ;;  %v4599_v14 = vunpack.c.l.bf16 %v4096_v5  ;;  %v3672_v5 = vld [vmem:[%s6610_s1 + $0x1c0] sm:$0xff]  ;;  %s3646_s15 = sshll.u32 %s208_s30, 8 }
  0x1b   : > { %v4190_v6 = vpack.i.bf16 %v4581_v3, %v4583_v4  ;;  %v4200_v11 = vpack.i.bf16 %v4589_v8, %v4587_v7  ;;  %v4607_v18 = vunpack.c.h.bf16 %v4076_v16  ;;  %v4609_v19 = vunpack.c.l.bf16 %v4095_v12  ;;  %3713 = vmatpush.msk.msra.mxu1 %vm447_vm0, %v4583_v4  ;;  %s6019_s22 = scalar_lea.vmem [#allocation2], %s3646_s15 }
  0x1c   : > { %v4195_v15 = vpack.i.bf16 %v4591_v9, %v4593_v10  ;;  %v4605_v17 = vpack.i.bf16 %v4597_v13, %v4599_v14  ;;  %v4618_v21 = vunpack.c.l.bf16 %v4076_v16  ;;  %v4240_v24 = vpack.i.bf16 %v4591_v9, %v4599_v14  ;;  %v3746_v16 = vld [vmem:[%s6610_s1 + $0x200] sm:$0xff] }
  0x1d   : > { %4191 = vrot.lane.b32.xlu1 %v4190_v6, %s4501_s5  ;;  %4181 = vrot.lane.b32.xlu0 %v4190_v6, %s4502_s6  ;;  %v4614_v20 = vpack.i.bf16 %v4607_v18, %v4609_v19  ;;  %v4235_v22 = vpack.i.bf16 %v4597_v13, %v4609_v19  ;;  %v4250_v25 = vpack.i.bf16 %v4581_v3, %v4587_v7 }
  0x1e   : > { %4201 = vrot.lane.b32.xlu2 %v4200_v11, %s4501_s5  ;;  %v4230_v23 = vpack.i.bf16 %v4607_v18, %v4618_v21  ;;  %v4245_v26 = vpack.i.bf16 %v4589_v8, %v4593_v10  ;;  %v4260_v27 = vpack.i.bf16 %v4583_v4, %v4609_v19  ;;  %v4270_v28 = vpack.i.bf16 %v4587_v7, %v4581_v3 }
  0x1f   : > { %v4285_v29 = vpack.i.bf16 %v4593_v10, %v4589_v8  ;;  %v4300_v30 = vpack.i.bf16 %v4599_v14, %v4591_v9  ;;  %667 = vmatpush.msra.mxu1 %v4581_v3 }
  0x21   : > { %668 = vmatpush.msra.mxu1 %v4587_v7 }
  0x23   : > { %669 = vmatpush.msra.mxu1 %v4589_v8 }
  0x25   : > { %4186 = vrot.lane.b32.xlu0 %v4200_v11, %s4502_s6  ;;  %4196 = vrot.lane.b32.xlu1 %v4195_v15, %s4502_s6 }
  0x26   : > { %4206 = vrot.lane.b32.xlu2 %v4605_v17, %s4502_s6  ;;  %670 = vmatpush.msra.mxu1 %v4593_v10 }
  0x28   : > { %671 = vmatpush.msra.mxu1 %v4591_v9 }
  0x2a   : > { %672 = vmatpush.msra.mxu1 %v4599_v14 }
  0x2c   : > { %673 = vmatpush.msra.mxu1 %v4597_v13 }
  0x2d   : > { %4211 = vrot.lane.b32.xlu0 %v4195_v15, %s4501_s5  ;;  %4216 = vrot.lane.b32.xlu1 %v4614_v20, %s4502_s6 }
  0x2e   : > { %4221 = vrot.lane.b32.xlu2 %v4605_v17, %s4501_s5  ;;  %674 = vmatpush.msra.mxu1 %v4609_v19 }
  0x30   : > { %675 = vmatpush.msra.mxu1 %v4607_v18 }
  0x32   : > { %676 = vmatpush.msra.mxu1 %v4618_v21 }
  0x33   : > { %3714 = vmatmul.msk.f32.vlgmr.msra.gmra.mxu1 %vm350_vm1, %v220_v42 }
  0x35   : > { %4226 = vrot.lane.b32.xlu1 %v4614_v20, %s4501_s5  ;;  %318 = vrot.lane.b32.xlu0 %v4618_v21, %s4502_s6 }
  0x36   : > { %807 = vrot.lane.b32.xlu2 %v4618_v21, %s4501_s5 }
  0x3b   : > { %3715 = vmatmul.msk.f32.gmra.mxu1 %vm350_vm1, %v221_v49 }
  0x3d   : > { %4236 = vrot.lane.b32.xlu1 %v4235_v22, %s4503_s7  ;;  %4231 = vrot.lane.b32.xlu0 %v4230_v23, %s4503_s7 }
  0x3e   : > { %4241 = vrot.lane.b32.xlu2 %v4240_v24, %s4503_s7 }
  0x43   : > { %3716 = vmatmul.msk.f32.gmra.mxu1 %vm350_vm1, %v222_v60 }
  0x45   : > { %4251 = vrot.lane.b32.xlu1 %v4250_v25, %s4503_s7  ;;  %4246 = vrot.lane.b32.xlu0 %v4245_v26, %s4503_s7  ;;  %v3673_v25 = vld [vmem:[%s6610_s1 + $0x1c8] sm:$0xff] }
  0x46   : > { %1135 = vrot.lane.b32.xlu2 %v4583_v4, %s4503_s7  ;;  %v3649_v26 = vld [vmem:[%s6610_s1 + $0x108] sm:$0xff] }
  0x4d   : > { %4261 = vrot.lane.b32.xlu1 %v4260_v27, %s4504_s8  ;;  %4256 = vrot.lane.b32.xlu0 %v4230_v23, %s4504_s8  ;;  %v3650_v27 = vld [vmem:[%s6610_s1 + $0x110] sm:$0xff] }
  0x4e   : > { %4266 = vrot.lane.b32.xlu2 %v4190_v6, %s4505_s9 }
  0x55   : > { %4276 = vrot.lane.b32.xlu1 %v4190_v6, %s4506_s10  ;;  %4271 = vrot.lane.b32.xlu0 %v4270_v28, %s4504_s8 }
  0x56   : > { %4281 = vrot.lane.b32.xlu2 %v4200_v11, %s4505_s9 }
  0x5d   : > { %4286 = vrot.lane.b32.xlu0 %v4285_v29, %s4504_s8  ;;  %4291 = vrot.lane.b32.xlu1 %v4200_v11, %s4506_s10  ;;  %v3648_v11 = vld [vmem:[%s6610_s1 + $0x100] sm:$0xff] }
  0x5e   : > { %4296 = vrot.lane.b32.xlu2 %v4195_v15, %s4505_s9 }
  0x65   : > { %4301 = vrot.lane.b32.xlu0 %v4300_v30, %s4504_s8  ;;  %4306 = vrot.lane.b32.xlu1 %v4195_v15, %s4506_s10  ;;  %v223_v15 = vld [vmem:[%s6610_s1 + $0x18] sm:$0xff]  ;;  %v226_v30 = vld [vmem:[%s6610_s1 + $0x30] sm:$0xff] }
  0x66   : > { %3717 = vmatmul.msk.f32.gmra.mxu1 %vm350_vm1, %v223_v15  ;;  %4311 = vrot.lane.b32.xlu2 %v4605_v17, %s4505_s9 }
  0x6d   : > { %1429 = vrot.lane.b32.xlu0 %v4597_v13, %s4504_s8  ;;  %4316 = vrot.lane.b32.xlu1 %v4605_v17, %s4506_s10 }
  0x6e   : > { %4321 = vrot.lane.b32.xlu2 %v4614_v20, %s4505_s9 }
  0x75   : > { %2039 = vrot.lane.b32.xlu1 %v4618_v21, %s4505_s9  ;;  %4326 = vrot.lane.b32.xlu0 %v4614_v20, %s4506_s10  ;;  %v229_v20 = vld [vmem:[%s6610_s1 + $0x48] sm:$0xff] }
  0x76   : > { %1731 = vrot.lane.b32.xlu2 %v4618_v21, %s4506_s10 }
  0x78   : > { %v4653_v31 = vpop.permute.xlu2 %4201 }
  0x79   : > { %v4203_v40 = vunpack.i.l.bf16 %v4653_v31  ;;  %v4204_v43 = vunpack.i.h.bf16 %v4653_v31  ;;  %v3652_v31 = vld [vmem:[%s6610_s1 + $0x120] sm:$0xff] }
  0x80   : > { %v4207_v32 = vpop.permute.xlu2 %4206 }
  0x81   : > { %v4208_v54 = vunpack.i.l.bf16 %v4207_v32  ;;  %v4209_v57 = vunpack.i.h.bf16 %v4207_v32 }
  0x88   : > { %v4662_v33 = vpop.permute.xlu2 %4221 }
  0x89   : > { %v4223_v59 = vunpack.i.l.bf16 %v4662_v33  ;;  %v4224_v62 = vunpack.i.h.bf16 %v4662_v33  ;;  %v3653_v33 = vld [vmem:[%s6610_s1 + $0x128] sm:$0xff] }
  0x8f   : > { %v4664_v34 = vpop.permute.xlu1 %4191  ;;  %v4182_v35 = vpop.permute.xlu0 %4181 }
  0x90   : > { %v4193_v36 = vunpack.i.l.bf16 %v4664_v34  ;;  %v4194_v37 = vunpack.i.h.bf16 %v4664_v34  ;;  %v4183_v38 = vunpack.i.l.bf16 %v4182_v35  ;;  %v4669_v39 = vpop.permute.xlu2 %807  ;;  %v4184_v41 = vunpack.i.h.bf16 %v4182_v35  ;;  %v3749_v35 = vld [vmem:[%s6610_s1 + $0x218] sm:$0xff] }
  0x92   : > { %3778 = vmatpush.msk.msra.mxu2 %vm447_vm0, %v4193_v36  ;;  %3680 = vmatpush.msk.msra.mxu0 %vm447_vm0, %v4183_v38 }
  0x93   : > { %4099 = vmatpush.msk.msra.mxu3 %vm447_vm0, %v4183_v38 }
  0x94   : > { %943 = vmatpush.msra.mxu2 %v4194_v37  ;;  %456 = vmatpush.msra.mxu0 %v4184_v41 }
  0x95   : > { %4100 = vmatpush.msra.mxu3 %v4184_v41 }
  0x96   : > { %944 = vmatpush.msra.mxu2 %v4203_v40 }
  0x97   : > { %v4187_v44 = vpop.permute.xlu0 %4186  ;;  %v4197_v45 = vpop.permute.xlu1 %4196 }
  0x98   : > { %945 = vmatpush.msra.mxu2 %v4204_v43  ;;  %v4188_v46 = vunpack.i.l.bf16 %v4187_v44  ;;  %v4688_v47 = vpop.permute.xlu2 %4241  ;;  %v4189_v48 = vunpack.i.h.bf16 %v4187_v44  ;;  %v4198_v50 = vunpack.i.l.bf16 %v4197_v45  ;;  %v4199_v51 = vunpack.i.h.bf16 %v4197_v45  ;;  %v227_v45 = vld [vmem:[%s6610_s1 + $0x38] sm:$0xff] }
  0x9a   : > { %457 = vmatpush.msra.mxu0 %v4188_v46  ;;  %4101 = vmatpush.msra.mxu3 %v4188_v46  ;;  %v3750_v46 = vld [vmem:[%s6610_s1 + $0x220] sm:$0xff] }
  0x9c   : > { %458 = vmatpush.msra.mxu0 %v4189_v48  ;;  %4102 = vmatpush.msra.mxu3 %v4189_v48 }
  0x9e   : > { %459 = vmatpush.msra.mxu0 %v4198_v50  ;;  %4103 = vmatpush.msra.mxu3 %v4198_v50 }
  0x9f   : > { %v4694_v52 = vpop.permute.xlu0 %4211  ;;  %v4217_v53 = vpop.permute.xlu1 %4216 }
  0xa0   : > { %460 = vmatpush.msra.mxu0 %v4199_v51  ;;  %4104 = vmatpush.msra.mxu3 %v4199_v51  ;;  %v4213_v55 = vunpack.i.l.bf16 %v4694_v52  ;;  %v4214_v56 = vunpack.i.h.bf16 %v4694_v52  ;;  %v4700_v58 = vpop.permute.xlu2 %1135  ;;  %v4218_v61 = vunpack.i.l.bf16 %v4217_v53  ;;  %v4219_v63 = vunpack.i.h.bf16 %v4217_v53  ;;  %v3677_v53 = vld [vmem:[%s6610_s1 + $0x1e8] sm:$0xff] }
  0xa2   : > { %461 = vmatpush.msra.mxu0 %v4208_v54  ;;  %4105 = vmatpush.msra.mxu3 %v4208_v54 }
  0xa3   : > { %946 = vmatpush.msra.mxu2 %v4213_v55 }
  0xa4   : > { %462 = vmatpush.msra.mxu0 %v4209_v57  ;;  %4106 = vmatpush.msra.mxu3 %v4209_v57 }
  0xa5   : > { %947 = vmatpush.msra.mxu2 %v4214_v56 }
  0xa6   : > { %463 = vmatpush.msra.mxu0 %v4218_v61  ;;  %4107 = vmatpush.msra.mxu3 %v4218_v61  ;;  %v3654_v61 = vld [vmem:[%s6610_s1 + $0x130] sm:$0xff] }
  0xa7   : > { %948 = vmatpush.msra.mxu2 %v4223_v59  ;;  %v4714_v0 = vpop.permute.xlu1 %4226  ;;  %v319_v1 = vpop.permute.xlu0 %318 }
  0xa8   : > { %464 = vmatpush.msra.mxu0 %v4219_v63  ;;  %4108 = vmatpush.msra.mxu3 %v4219_v63  ;;  %v4228_v2 = vunpack.i.l.bf16 %v4714_v0  ;;  %v4229_v6 = vunpack.i.h.bf16 %v4714_v0  ;;  %v4267_v12 = vpop.permute.xlu2 %4266 }
  0xa9   : > { %949 = vmatpush.msra.mxu2 %v4224_v62  ;;  %v4268_v22 = vunpack.i.l.bf16 %v4267_v12 }
  0xaa   : > { %4109 = vmatpush.msra.mxu3 %v319_v1  ;;  %465 = vmatpush.msra.mxu0 %v319_v1 }
  0xab   : > { %950 = vmatpush.msra.mxu2 %v4228_v2  ;;  %3705 = vmatmul.msk.f32.vlgmr.msra.gmra.mxu3 %vm350_vm1, %v3672_v5 }
  0xac   : > { %4110 = vmatpush.msk.msrb.mxu3 %vm447_vm0, %v4583_v4  ;;  %3681 = vmatmul.msk.f32.vlgmr.msra.gmra.mxu0 %vm350_vm1, %v3648_v11  ;;  %v4269_v4 = vunpack.i.h.bf16 %v4267_v12  ;;  %v3753_v11 = vld [vmem:[%s6610_s1 + $0x238] sm:$0xff]  ;;  %v244_v12 = vld [vmem:[%s6610_s1 + $0xc0] sm:$0xff] }
  0xad   : > { %951 = vmatpush.msra.mxu2 %v4229_v6 }
  0xae   : > { %4111 = vmatpush.msrb.mxu3 %v4581_v3  ;;  %v224_v3 = vld [vmem:[%s6610_s1 + $0x20] sm:$0xff] }
  0xaf   : > { %952 = vmatpush.msra.mxu2 %v4669_v39  ;;  %v4745_v23 = vpop.permute.xlu1 %4236  ;;  %v4747_v24 = vpop.permute.xlu0 %4231  ;;  %3718 = vmatmul.msk.f32.gmra.mxu1 %vm350_vm1, %v224_v3  ;;  %v231_v3 = vld [vmem:[%s6610_s1 + $0x58] sm:$0xff] }
  0xb0   : > { %4112 = vmatpush.msrb.mxu3 %v4587_v7  ;;  %3779 = vmatmul.msk.f32.vlgmr.msra.gmra.mxu2 %vm350_vm1, %v3746_v16  ;;  %v3747_v7 = vld [vmem:[%s6610_s1 + $0x208] sm:$0xff]  ;;  %v4282_v32 = vpop.permute.xlu2 %4281  ;;  %v3656_v16 = vld [vmem:[%s6610_s1 + $0x140] sm:$0xff] }
  0xb1   : > { %4038 = vmatpush.msk.msrb.mxu2 %vm447_vm0, %v4268_v22  ;;  %v4283_v34 = vunpack.i.l.bf16 %v4282_v32  ;;  %v4284_v44 = vunpack.i.h.bf16 %v4282_v32  ;;  %v3658_v32 = vld [vmem:[%s6610_s1 + $0x150] sm:$0xff] }
  0xb2   : > { %4113 = vmatpush.msrb.mxu3 %v4589_v8 }
  0xb3   : > { %3706 = vmatmul.msk.f32.gmra.mxu3 %vm350_vm1, %v3673_v25  ;;  %2175 = vmatpush.msrb.mxu2 %v4269_v4 }
  0xb4   : > { %4114 = vmatpush.msrb.mxu3 %v4593_v10  ;;  %3682 = vmatmul.msk.f32.gmra.mxu0 %vm350_vm1, %v3649_v26  ;;  %v3674_v10 = vld [vmem:[%s6610_s1 + $0x1d0] sm:$0xff] }
  0xb5   : > { %2176 = vmatpush.msrb.mxu2 %v4283_v34  ;;  %v233_v34 = vld [vmem:[%s6610_s1 + $0x68] sm:$0xff] }
  0xb6   : > { %4115 = vmatpush.msrb.mxu3 %v4591_v9  ;;  %v225_v9 = vld [vmem:[%s6610_s1 + $0x28] sm:$0xff] }
  0xb7   : > { %v4772_v8 = vpop.permute.xlu1 %4251  ;;  %v4774_v17 = vpop.permute.xlu0 %4246  ;;  %3719 = vmatmul.msk.f32.gmra.mxu1 %vm350_vm1, %v225_v9  ;;  %2177 = vmatpush.msrb.mxu2 %v4284_v44 }
  0xb8   : > { %4116 = vmatpush.msrb.mxu3 %v4599_v14  ;;  %3780 = vmatmul.msk.f32.gmra.mxu2 %vm350_vm1, %v3747_v7  ;;  %v3748_v14 = vld [vmem:[%s6610_s1 + $0x210] sm:$0xff]  ;;  %v4297_v15 = vpop.permute.xlu2 %4296  ;;  %v4254_v4 = vunpack.i.h.bf16 %v4772_v8  ;;  %v4253_v7 = vunpack.i.l.bf16 %v4772_v8  ;;  %v4248_v8 = vunpack.i.l.bf16 %v4774_v17 }
  0xb9   : > { %v4298_v22 = vunpack.i.l.bf16 %v4297_v15  ;;  %v4299_v26 = vunpack.i.h.bf16 %v4297_v15  ;;  %v3770_v15 = vld [vmem:[%s6610_s1 + $0x2c0] sm:$0xff] }
  0xba   : > { %4117 = vmatpush.msrb.mxu3 %v4597_v13 }
  0xbb   : > { %3707 = vmatmul.msk.f32.gmra.mxu3 %vm350_vm1, %v3674_v10  ;;  %2178 = vmatpush.msrb.mxu2 %v4298_v22  ;;  %v3754_v10 = vld [vmem:[%s6610_s1 + $0x240] sm:$0xff] }
  0xbc   : > { %4118 = vmatpush.msrb.mxu3 %v4609_v19  ;;  %3683 = vmatmul.msk.f32.gmra.mxu0 %vm350_vm1, %v3650_v27  ;;  %v3651_v19 = vld [vmem:[%s6610_s1 + $0x118] sm:$0xff]  ;;  %v3664_v22 = vld [vmem:[%s6610_s1 + $0x180] sm:$0xff] }
  0xbd   : > { %2179 = vmatpush.msrb.mxu2 %v4299_v26  ;;  %v2325_v26 = vld [vmem:[%s6611_s2 + $0x58] sm:$0xff] }
  0xbe   : > { %4119 = vmatpush.msrb.mxu3 %v4607_v18  ;;  %v3675_v18 = vld [vmem:[%s6610_s1 + $0x1d8] sm:$0xff] }
  0xbf   : > { %v4798_v13 = vpop.permute.xlu1 %4261  ;;  %v4800_v28 = vpop.permute.xlu0 %4256  ;;  %3720 = vmatmul.msk.f32.gmra.mxu1 %vm350_vm1, %v226_v30  ;;  %v4238_v30 = vunpack.i.l.bf16 %v4745_v23 }
  0xc0   : > { %v4264_v29 = vunpack.i.h.bf16 %v4798_v13  ;;  %4120 = vmatpush.msrb.mxu3 %v4618_v21  ;;  %3781 = vmatmul.msk.f32.gmra.mxu2 %vm350_vm1, %v3748_v14  ;;  %v4263_v63 = vunpack.i.l.bf16 %v4798_v13  ;;  %v4259_v1 = vunpack.i.h.bf16 %v4800_v28  ;;  %v4258_v5 = vunpack.i.l.bf16 %v4800_v28  ;;  %v230_v21 = vld [vmem:[%s6610_s1 + $0x50] sm:$0xff]  ;;  %v3657_v13 = vld [vmem:[%s6610_s1 + $0x148] sm:$0xff]  ;;  %v4312_v44 = vpop.permute.xlu2 %4311 }
  0xc1   : > { %v4249_v14 = vunpack.i.h.bf16 %v4774_v17  ;;  %v4244_v28 = vunpack.i.h.bf16 %v4688_v47  ;;  %v4243_v17 = vunpack.i.l.bf16 %v4688_v47  ;;  %v246_v47 = vld [vmem:[%s6610_s1 + $0xd0] sm:$0xff] }
  0xc2   : > { %4121 = vmatpush.msk.msra.mxu3 %vm447_vm0, %v4193_v36  ;;  %3908 = vmatpush.msk.msrb.mxu0 %vm447_vm0, %v4264_v29  ;;  %v232_v29 = vld [vmem:[%s6610_s1 + $0x60] sm:$0xff] }
  0xc3   : > { %3708 = vmatmul.msk.f32.gmra.mxu3 %vm350_vm1, %v3675_v18  ;;  %v3755_v18 = vld [vmem:[%s6610_s1 + $0x248] sm:$0xff] }
  0xc4   : > { %4122 = vmatpush.msra.mxu3 %v4194_v37  ;;  %3684 = vmatmul.msk.f32.gmra.mxu0 %vm350_vm1, %v3651_v19  ;;  %v4239_v19 = vunpack.i.h.bf16 %v4745_v23  ;;  %v4233_v23 = vunpack.i.l.bf16 %v4747_v24 }
  0xc6   : > { %4123 = vmatpush.msra.mxu3 %v4203_v40  ;;  %v3676_v40 = vld [vmem:[%s6610_s1 + $0x1e0] sm:$0xff] }
  0xc7   : > { %v4277_v36 = vpop.permute.xlu1 %4276  ;;  %v4272_v37 = vpop.permute.xlu0 %4271  ;;  %3721 = vmatmul.msk.f32.gmra.mxu1 %vm350_vm1, %v227_v45  ;;  %v3758_v45 = vld [vmem:[%s6610_s1 + $0x260] sm:$0xff] }
  0xc8   : > { %4124 = vmatpush.msra.mxu3 %v4204_v43  ;;  %v4278_v38 = vunpack.i.l.bf16 %v4277_v36  ;;  %3782 = vmatmul.msk.f32.gmra.mxu2 %vm350_vm1, %v3749_v35  ;;  %v4279_v41 = vunpack.i.h.bf16 %v4277_v36  ;;  %v4273_v42 = vunpack.i.l.bf16 %v4272_v37  ;;  %v4274_v43 = vunpack.i.h.bf16 %v4272_v37  ;;  %v3756_v36 = vld [vmem:[%s6610_s1 + $0x250] sm:$0xff]  ;;  %v247_v37 = vld [vmem:[%s6610_s1 + $0xd8] sm:$0xff] }
  0xc9   : > { %v4234_v35 = vunpack.i.h.bf16 %v4747_v24  ;;  %v3659_v24 = vld [vmem:[%s6610_s1 + $0x158] sm:$0xff] }
  0xca   : > { %4125 = vmatpush.msra.mxu3 %v4213_v55  ;;  %3973 = vmatpush.msk.msrb.mxu1 %vm447_vm0, %v4278_v38  ;;  %v228_v55 = vld [vmem:[%s6610_s1 + $0x40] sm:$0xff]  ;;  %v234_v38 = vld [vmem:[%s6610_s1 + $0x70] sm:$0xff] }
  0xcb   : > { %1559 = vmatpush.msrb.mxu0 %v4273_v42  ;;  %3709 = vmatmul.msk.f32.gmra.mxu3 %vm350_vm1, %v3676_v40  ;;  %v248_v42 = vld [vmem:[%s6610_s1 + $0xe0] sm:$0xff] }
  0xcc   : > { %4126 = vmatpush.msra.mxu3 %v4214_v56  ;;  %1867 = vmatpush.msrb.mxu1 %v4279_v41  ;;  %v3751_v56 = vld [vmem:[%s6610_s1 + $0x228] sm:$0xff]  ;;  %v3757_v41 = vld [vmem:[%s6610_s1 + $0x258] sm:$0xff]  ;;  %v3660_v40 = vld [vmem:[%s6610_s1 + $0x160] sm:$0xff] }
  0xcd   : > { %3685 = vmatmul.msk.f32.gmra.mxu0 %vm350_vm1, %v3652_v31  ;;  %v235_v31 = vld [vmem:[%s6610_s1 + $0x78] sm:$0xff] }
  0xce   : > { %4127 = vmatpush.msra.mxu3 %v4223_v59  ;;  %1560 = vmatpush.msrb.mxu0 %v4274_v43  ;;  %v4313_v43 = vunpack.i.l.bf16 %v4312_v44 }
  0xcf   : > { %v4287_v48 = vpop.permute.xlu0 %4286  ;;  %v4292_v49 = vpop.permute.xlu1 %4291  ;;  %3722 = vmatmul.msk.f32.gmra.mxu1 %vm350_vm1, %v228_v55  ;;  %v236_v55 = vld [vmem:[%s6610_s1 + $0x80] sm:$0xff] }
  0xd0   : > { %4128 = vmatpush.msra.mxu3 %v4224_v62  ;;  %3783 = vmatmul.msk.f32.gmra.mxu2 %vm350_vm1, %v3750_v46  ;;  %v4288_v50 = vunpack.i.l.bf16 %v4287_v48  ;;  %v4289_v51 = vunpack.i.h.bf16 %v4287_v48  ;;  %v4293_v52 = vunpack.i.l.bf16 %v4292_v49  ;;  %v4294_v54 = vunpack.i.h.bf16 %v4292_v49  ;;  %v3752_v62 = vld [vmem:[%s6610_s1 + $0x230] sm:$0xff]  ;;  %v2315_v49 = vld [vmem:[%s6611_s2 + $0x8] sm:$0xff] }
  0xd1   : > { %2180 = vmatpush.msrb.mxu2 %v4313_v43  ;;  %v4314_v46 = vunpack.i.h.bf16 %v4312_v44  ;;  %v4507_v48 = vmov 0   ;;  %v241_v43 = vld [vmem:[%s6610_s1 + $0xa8] sm:$0xff] }
  0xd2   : > { %4129 = vmatpush.msra.mxu3 %v4228_v2  ;;  %1561 = vmatpush.msrb.mxu0 %v4288_v50  ;;  %v3679_v2 = vld [vmem:[%s6610_s1 + $0x1f8] sm:$0xff]  ;;  %v249_v50 = vld [vmem:[%s6610_s1 + $0xe8] sm:$0xff] }
  0xd3   : > { %1868 = vmatpush.msrb.mxu1 %v4293_v52  ;;  %3710 = vmatmul.msk.f32.gmra.mxu3 %vm350_vm1, %v3677_v53  ;;  %v3661_v52 = vld [vmem:[%s6610_s1 + $0x168] sm:$0xff] }
  0xd4   : > { %4130 = vmatpush.msra.mxu3 %v4229_v6  ;;  %1562 = vmatpush.msrb.mxu0 %v4289_v51  ;;  %v3655_v6 = vld [vmem:[%s6610_s1 + $0x138] sm:$0xff] }
  0xd5   : > { %3686 = vmatmul.msk.f32.gmra.mxu0 %vm350_vm1, %v3653_v33  ;;  %1869 = vmatpush.msrb.mxu1 %v4294_v54  ;;  %v678_v33 = vpop.f32.mrf.mxu1 }
  0xd6   : > { %4131 = vmatpush.msra.mxu3 %v4669_v39  ;;  %v3678_v39 = vld [vmem:[%s6610_s1 + $0x1f0] sm:$0xff]  ;;  %4331 = vset.pattern.permute.xlu1 %v4507_v48 }
  0xd7   : > { %v4302_v57 = vpop.permute.xlu0 %4301  ;;  %3723 = vmatmul.msk.f32.gmra.mxu1 %vm350_vm1, %v229_v20  ;;  %v4307_v25 = vpop.permute.xlu1 %4306  ;;  %4330 = vset.pattern.permute.xlu0 %v4507_v48  ;;  %v237_v20 = vld [vmem:[%s6610_s1 + $0x88] sm:$0xff] }
  0xd8   : > { %3784 = vmatmul.msk.f32.gmra.mxu2 %vm350_vm1, %v3751_v56  ;;  %v4303_v59 = vunpack.i.l.bf16 %v4302_v57  ;;  %v4304_v60 = vunpack.i.h.bf16 %v4302_v57  ;;  %v4308_v27 = vunpack.i.l.bf16 %v4307_v25  ;;  %v4309_v9 = vunpack.i.h.bf16 %v4307_v25  ;;  %2353 = vperm.xlu1 %4331, %v2315_v49   ;;  %v2314_v56 = vld [vmem:[%s6611_s2] sm:$0xff]  ;;  %v3759_v57 = vld [vmem:[%s6610_s1 + $0x268] sm:$0xff]  ;;  %v239_v25 = vld [vmem:[%s6610_s1 + $0x98] sm:$0xff] }
  0xd9   : > { %2181 = vmatpush.msrb.mxu2 %v4314_v46  ;;  %4332 = vset.pattern.permute.xlu2 %v4507_v48  ;;  %v2331_v46 = vld [vmem:[%s6611_s2 + $0x88] sm:$0xff]  ;;  %v3764_v48 = vld [vmem:[%s6610_s1 + $0x290] sm:$0xff] }
  0xda   : > { %1563 = vmatpush.msrb.mxu0 %v4303_v59  ;;  %1870 = vmatpush.msrb.mxu1 %v4308_v27  ;;  %v2317_v59 = vld [vmem:[%s6611_s2 + $0x18] sm:$0xff] }
  0xdb   : > { %3711 = vmatmul.msk.f32.gmra.mxu3 %vm350_vm1, %v3678_v39  ;;  %2348 = vperm.xlu0 %4330, %v2314_v56   ;;  %v3662_v39 = vld [vmem:[%s6610_s1 + $0x170] sm:$0xff] }
  0xdc   : > { %1564 = vmatpush.msrb.mxu0 %v4304_v60  ;;  %1871 = vmatpush.msrb.mxu1 %v4309_v9  ;;  %v250_v60 = vld [vmem:[%s6610_s1 + $0xf0] sm:$0xff]  ;;  %v4322_v9 = vpop.permute.xlu2 %4321 }
  0xdd   : > { %3687 = vmatmul.msk.f32.gmra.mxu0 %vm350_vm1, %v3654_v61  ;;  %v5039_v61 = vpop.f32.mrf.mxu1 }
  0xdf   : > { %v1430_v0 = vpop.permute.xlu0 %1429  ;;  %3724 = vmatmul.msk.f32.gmra.mxu1 %vm350_vm1, %v230_v21  ;;  %v4317_v51 = vpop.permute.xlu1 %4316  ;;  %v2322_v21 = vld [vmem:[%s6611_s2 + $0x40] sm:$0xff] }
  0xe0   : > { %1565 = vmatpush.msrb.mxu0 %v1430_v0  ;;  %3785 = vmatmul.msk.f32.gmra.mxu2 %vm350_vm1, %v3752_v62  ;;  %v4318_v53 = vunpack.i.l.bf16 %v4317_v51  ;;  %v4319_v54 = vunpack.i.h.bf16 %v4317_v51  ;;  %v2319_v62 = vld [vmem:[%s6611_s2 + $0x28] sm:$0xff]  ;;  %v2320_v0 = vld [vmem:[%s6611_s2 + $0x30] sm:$0xff] }
  0xe1   : > { %2363 = vperm.xlu1 %4331, %v2317_v59   ;;  %v2321_v59 = vld [vmem:[%s6611_s2 + $0x38] sm:$0xff] }
  0xe2   : > { %1566 = vmatpush.msrb.mxu0 %v4263_v63  ;;  %1872 = vmatpush.msrb.mxu1 %v4318_v53  ;;  %v3760_v63 = vld [vmem:[%s6610_s1 + $0x270] sm:$0xff] }
  0xe3   : > { %3712 = vmatmul.msk.f32.gmra.mxu3 %vm350_vm1, %v3679_v2  ;;  %2373 = vperm.xlu0 %4330, %v2319_v62   ;;  %v3663_v2 = vld [vmem:[%s6610_s1 + $0x178] sm:$0xff] }
  0xe4   : > { %1567 = vmatpush.msrb.mxu0 %v4259_v1  ;;  %1873 = vmatpush.msrb.mxu1 %v4319_v54  ;;  %v251_v1 = vld [vmem:[%s6610_s1 + $0xf8] sm:$0xff] }
  0xe5   : > { %3688 = vmatmul.msk.f32.gmra.mxu0 %vm350_vm1, %v3655_v6  ;;  %v238_v6 = vld [vmem:[%s6610_s1 + $0x90] sm:$0xff] }
  0xe6   : > { %1568 = vmatpush.msrb.mxu0 %v4258_v5  ;;  %v5063_v5 = vpop.f32.mrf.mxu1 }
  0xe7   : > { %3725 = vmatmul.msk.f32.gmra.mxu1 %vm350_vm1, %v231_v3  ;;  %v3762_v3 = vld [vmem:[%s6610_s1 + $0x280] sm:$0xff] }
  0xe8   : > { %3786 = vmatmul.msk.f32.gmra.mxu2 %vm350_vm1, %v3753_v11  ;;  %v3761_v11 = vld [vmem:[%s6610_s1 + $0x278] sm:$0xff] }
  0xe9   : > { %2378 = vperm.xlu1 %4331, %v2320_v0  }
  0xeb   : > { %3738 = vmatmul.msk.f32.vlgmr.msrb.gmra.mxu3 %vm350_vm1, %v244_v12  ;;  %2388 = vperm.xlu0 %4330, %v2322_v21   ;;  %v2323_v12 = vld [vmem:[%s6611_s2 + $0x48] sm:$0xff]  ;;  %v243_v21 = vld [vmem:[%s6610_s1 + $0xb8] sm:$0xff] }
  0xec   : > { %3843 = vmatpush.msk.msrb.mxu3 %vm447_vm0, %v4700_v58  ;;  %v245_v58 = vld [vmem:[%s6610_s1 + $0xc8] sm:$0xff] }
  0xed   : > { %3689 = vmatmul.msk.f32.gmra.mxu0 %vm350_vm1, %v3656_v16 }
  0xee   : > { %1251 = vmatpush.msrb.mxu3 %v4254_v4  ;;  %v5087_v4 = vpop.f32.mrf.mxu1 }
  0xef   : > { %3726 = vmatmul.msk.f32.gmra.mxu1 %vm350_vm1, %v232_v29  ;;  %v3665_v29 = vld [vmem:[%s6610_s1 + $0x188] sm:$0xff] }
  0xf0   : > { %3787 = vmatmul.msk.f32.gmra.mxu2 %vm350_vm1, %v3754_v10  ;;  %1252 = vmatpush.msrb.mxu3 %v4253_v7  ;;  %v2326_v10 = vld [vmem:[%s6611_s2 + $0x60] sm:$0xff] }
  0xf1   : > { %2393 = vperm.xlu1 %4331, %v2323_v12   ;;  %v2337_v12 = vld [vmem:[%s6611_s2 + $0xb8] sm:$0xff] }
  0xf2   : > { %1253 = vmatpush.msrb.mxu3 %v4249_v14  ;;  %v3771_v14 = vld [vmem:[%s6610_s1 + $0x2c8] sm:$0xff] }
  0xf3   : > { %3739 = vmatmul.msk.f32.gmra.mxu3 %vm350_vm1, %v245_v58  ;;  %2403 = vperm.xlu0 %4330, %v2325_v26   ;;  %v4323_v58 = vunpack.i.l.bf16 %v4322_v9  ;;  %v1732_v26 = vpop.permute.xlu2 %1731 }
  0xf4   : > { %1254 = vmatpush.msrb.mxu3 %v4248_v8 }
  0xf5   : > { %3690 = vmatmul.msk.f32.gmra.mxu0 %vm350_vm1, %v3657_v13  ;;  %v4327_v13 = vpop.permute.xlu0 %4326  ;;  %2182 = vmatpush.msrb.mxu2 %v4323_v58  ;;  %v3941_v58 = vld [vmem:[%s6610_s1 + $0x500] sm:$0xff] }
  0xf6   : > { %1255 = vmatpush.msrb.mxu3 %v4244_v28  ;;  %v4324_v28 = vunpack.i.h.bf16 %v4322_v9 }
  0xf7   : > { %3727 = vmatmul.msk.f32.gmra.mxu1 %vm350_vm1, %v233_v34  ;;  %v3763_v34 = vld [vmem:[%s6610_s1 + $0x288] sm:$0xff] }
  0xf8   : > { %3788 = vmatmul.msk.f32.gmra.mxu2 %vm350_vm1, %v3755_v18  ;;  %1256 = vmatpush.msrb.mxu3 %v4243_v17 }
  0xf9   : > { %2408 = vperm.xlu1 %4331, %v2326_v10   ;;  %2183 = vmatpush.msrb.mxu2 %v4324_v28  ;;  %v2340_v28 = vld [vmem:[%s6611_s2 + $0xd0] sm:$0xff] }
  0xfa   : > { %1257 = vmatpush.msrb.mxu3 %v4239_v19 }
  0xfb   : > { %3740 = vmatmul.msk.f32.gmra.mxu3 %vm350_vm1, %v246_v47  ;;  %v240_v47 = vld [vmem:[%s6610_s1 + $0xa0] sm:$0xff] }
  0xfc   : > { %1258 = vmatpush.msrb.mxu3 %v4238_v30  ;;  %v4328_v30 = vunpack.i.l.bf16 %v4327_v13 }
  0xfd   : > { %3691 = vmatmul.msk.f32.gmra.mxu0 %vm350_vm1, %v3658_v32  ;;  %v2316_v32 = vld [vmem:[%s6611_s2 + $0x10] sm:$0xff] }
  0xfe   : > { %1259 = vmatpush.msrb.mxu3 %v4234_v35  ;;  %v2328_v35 = vld [vmem:[%s6611_s2 + $0x70] sm:$0xff]  ;;  %1874 = vmatpush.msrb.mxu1 %v4328_v30 }
  0xff   : > { %3728 = vmatmul.msk.f32.gmra.mxu1 %vm350_vm1, %v234_v38  ;;  %2358 = vperm.xlu2 %4332, %v2316_v32   ;;  %v3772_v38 = vld [vmem:[%s6610_s1 + $0x2d0] sm:$0xff] }
 0x100   : > { %3789 = vmatmul.msk.f32.gmra.mxu2 %vm350_vm1, %v3756_v36  ;;  %1260 = vmatpush.msrb.mxu3 %v4233_v23  ;;  %v2329_v36 = vld [vmem:[%s6611_s2 + $0x78] sm:$0xff] }
 0x101   : > { %2418 = vperm.xlu0 %4330, %v2328_v35   ;;  %2423 = vperm.xlu1 %4331, %v2329_v36   ;;  %v3670_v35 = vld [vmem:[%s6610_s1 + $0x1b0] sm:$0xff] }
 0x103   : > { %3741 = vmatmul.msk.f32.gmra.mxu3 %vm350_vm1, %v247_v37  ;;  %v4329_v37 = vunpack.i.h.bf16 %v4327_v13  ;;  %v2327_v13 = vld [vmem:[%s6611_s2 + $0x68] sm:$0xff] }
 0x105   : > { %3692 = vmatmul.msk.f32.gmra.mxu0 %vm350_vm1, %v3659_v24  ;;  %1875 = vmatpush.msrb.mxu1 %v4329_v37 }
 0x107   : > { %3729 = vmatmul.msk.f32.gmra.mxu1 %vm350_vm1, %v235_v31 }
 0x108   : > { %3790 = vmatmul.msk.f32.gmra.mxu2 %vm350_vm1, %v3757_v41  ;;  %1876 = vmatpush.msrb.mxu1 %v1732_v26  ;;  %v3877_v26 = vld [vmem:[%s6610_s1 + $0x408] sm:$0xff] }
 0x109   : > { %2433 = vperm.xlu0 %4330, %v2331_v46  }
 0x10b   : > { %3742 = vmatmul.msk.f32.gmra.mxu3 %vm350_vm1, %v248_v42  ;;  %v3666_v42 = vld [vmem:[%s6610_s1 + $0x190] sm:$0xff] }
 0x10d   : > { %3693 = vmatmul.msk.f32.gmra.mxu0 %vm350_vm1, %v3660_v40 }
 0x10f   : > { %3730 = vmatmul.msk.f32.gmra.mxu1 %vm350_vm1, %v236_v55 }
 0x110   : > { %3791 = vmatmul.msk.f32.gmra.mxu2 %vm350_vm1, %v3758_v45  ;;  %v2318_v45 = vld [vmem:[%s6611_s2 + $0x20] sm:$0xff] }
 0x111   : > { %2368 = vperm.xlu2 %4332, %v2318_v45   ;;  %v3777_v45 = vld [vmem:[%s6610_s1 + $0x2f8] sm:$0xff] }
 0x113   : > { %3743 = vmatmul.msk.f32.gmra.mxu3 %vm350_vm1, %v249_v50  ;;  %v2332_v50 = vld [vmem:[%s6611_s2 + $0x90] sm:$0xff] }
 0x114   : > { %2438 = vperm.xlu1 %4331, %v2332_v50  }
 0x115   : > { %3694 = vmatmul.msk.f32.gmra.mxu0 %vm350_vm1, %v3661_v52  ;;  %v3773_v52 = vld [vmem:[%s6610_s1 + $0x2d8] sm:$0xff] }
 0x117   : > { %3731 = vmatmul.msk.f32.gmra.mxu1 %vm350_vm1, %v237_v20 }
 0x118   : > { %3792 = vmatmul.msk.f32.gmra.mxu2 %vm350_vm1, %v3759_v57  ;;  %v242_v57 = vld [vmem:[%s6610_s1 + $0xb0] sm:$0xff] }
 0x119   : > { %2383 = vperm.xlu2 %4332, %v2321_v59  }
 0x11b   : > { %3744 = vmatmul.msk.f32.gmra.mxu3 %vm350_vm1, %v250_v60  ;;  %v2334_v60 = vld [vmem:[%s6611_s2 + $0xa0] sm:$0xff] }
 0x11c   : > { %2448 = vperm.xlu0 %4330, %v2334_v60  }
 0x11d   : > { %3695 = vmatmul.msk.f32.gmra.mxu0 %vm350_vm1, %v3662_v39  ;;  %v3765_v39 = vld [vmem:[%s6610_s1 + $0x298] sm:$0xff] }
 0x11f   : > { %3732 = vmatmul.msk.f32.gmra.mxu1 %vm350_vm1, %v238_v6 }
 0x120   : > { %3793 = vmatmul.msk.f32.gmra.mxu2 %vm350_vm1, %v3760_v63  ;;  %v3774_v63 = vld [vmem:[%s6610_s1 + $0x2e0] sm:$0xff] }
 0x123   : > { %3745 = vmatmul.msk.f32.gmra.mxu3 %vm350_vm1, %v251_v1  ;;  %v3668_v1 = vld [vmem:[%s6610_s1 + $0x1a0] sm:$0xff] }
 0x124   : > { %2463 = vperm.xlu0 %4330, %v2337_v12  }
 0x125   : > { %3696 = vmatmul.msk.f32.gmra.mxu0 %vm350_vm1, %v3663_v2 }
 0x127   : > { %3733 = vmatmul.msk.f32.gmra.mxu1 %vm350_vm1, %v239_v25  ;;  %v2040_v25 = vpop.permute.xlu1 %2039 }
 0x128   : > { %3794 = vmatmul.msk.f32.gmra.mxu2 %vm350_vm1, %v3761_v11  ;;  %v2324_v11 = vld [vmem:[%s6611_s2 + $0x50] sm:$0xff] }
 0x129   : > { %v467_v16 = vpop.f32.mrf.mxu0  ;;  %2398 = vperm.xlu2 %4332, %v2324_v11   ;;  %2184 = vmatpush.msrb.mxu2 %v2040_v25  ;;  %v2542_v11 = vld [vmem:[%s6612_s3 + $0x20] sm:$0xff] }
 0x12a   : > { %v679_v27 = vadd.f32 %v678_v33, %v467_v16  ;;  %v3667_v33 = vld [vmem:[%s6610_s1 + $0x198] sm:$0xff]  ;;  %v2338_v16 = vld [vmem:[%s6611_s2 + $0xc0] sm:$0xff] }
 0x12b   : > { %3803 = vmatmul.msk.f32.vlgmr.msra.gmra.mxu3 %vm350_vm1, %v3770_v15  ;;  %v3766_v15 = vld [vmem:[%s6610_s1 + $0x2a0] sm:$0xff] }
 0x12c   : > { %v5113_v17 = vpop.f32.mrf.mxu1  ;;  %2478 = vperm.xlu0 %4330, %v2340_v28  }
 0x12d   : > { %3697 = vmatmul.msk.f32.gmra.mxu0 %vm350_vm1, %v3664_v22 }
 0x12e   : > { %v5100_v7 = vpop.f32.mrf.mxu3 }
 0x12f   : > { %3734 = vmatmul.msk.f32.gmra.mxu1 %vm350_vm1, %v240_v47  ;;  %v3776_v47 = vld [vmem:[%s6610_s1 + $0x2f0] sm:$0xff] }
 0x130   : > { %3795 = vmatmul.msk.f32.gmra.mxu2 %vm350_vm1, %v3762_v3  ;;  %v3775_v3 = vld [vmem:[%s6610_s1 + $0x2e8] sm:$0xff] }
 0x131   : > { %v470_v8 = vpop.f32.mrf.mxu0  ;;  %2413 = vperm.xlu2 %4332, %v2327_v13   ;;  %v2545_v13 = vld [vmem:[%s6612_s3 + $0x38] sm:$0xff] }
 0x132   : > { %v682_v24 = vadd.f32 %v5039_v61, %v470_v8  ;;  %v2335_v61 = vld [vmem:[%s6611_s2 + $0xa8] sm:$0xff] }
 0x133   : > { %v954_v18 = vpop.f32.mrf.mxu2  ;;  %3804 = vmatmul.msk.f32.gmra.mxu3 %vm350_vm1, %v3771_v14  ;;  %2453 = vperm.xlu1 %4331, %v2335_v61  }
 0x134   : > { %v5116_v19 = vadd.f32 %v954_v18, %v679_v27  ;;  %v5145_v40 = vpop.f32.mrf.mxu1  ;;  %v3669_v27 = vld [vmem:[%s6610_s1 + $0x1a8] sm:$0xff] }
 0x135   : > { %3698 = vmatmul.msk.f32.gmra.mxu0 %vm350_vm1, %v3665_v29  ;;  %v3767_v29 = vld [vmem:[%s6610_s1 + $0x2a8] sm:$0xff] }
 0x136   : > { %v5131_v23 = vpop.f32.mrf.mxu3 }
 0x137   : > { %3735 = vmatmul.msk.f32.gmra.mxu1 %vm350_vm1, %v241_v43 }
 0x138   : > { %3796 = vmatmul.msk.f32.gmra.mxu2 %vm350_vm1, %v3763_v34 }
 0x139   : > { %v473_v41 = vpop.f32.mrf.mxu0 }
 0x13a   : > { %v685_v51 = vadd.f32 %v5063_v5, %v473_v41  ;;  %v2343_v41 = vld [vmem:[%s6611_s2 + $0xe8] sm:$0xff] }
 0x13b   : > { %v957_v44 = vpop.f32.mrf.mxu2  ;;  %3805 = vmatmul.msk.f32.gmra.mxu3 %vm350_vm1, %v3772_v38  ;;  %2468 = vperm.xlu1 %4331, %v2338_v16   ;;  %v2330_v38 = vld [vmem:[%s6611_s2 + $0x80] sm:$0xff] }
 0x13c   : > { %v5148_v31 = vadd.f32 %v957_v44, %v682_v24  ;;  %v5177_v54 = vpop.f32.mrf.mxu1  ;;  %v3942_v24 = vld [vmem:[%s6610_s1 + $0x508] sm:$0xff]  ;;  %2428 = vperm.xlu2 %4332, %v2330_v38   ;;  %2493 = vperm.xlu0 %4330, %v2343_v41   ;;  %v4008_v38 = vld [vmem:[%s6610_s1 + $0x610] sm:$0xff] }
 0x13d   : > { %3699 = vmatmul.msk.f32.gmra.mxu0 %vm350_vm1, %v3666_v42  ;;  %v3768_v42 = vld [vmem:[%s6610_s1 + $0x2b0] sm:$0xff] }
 0x13e   : > { %v5163_v49 = vpop.f32.mrf.mxu3  ;;  %v2548_v41 = vld [vmem:[%s6612_s3 + $0x50] sm:$0xff] }
 0x13f   : > { %3736 = vmatmul.msk.f32.gmra.mxu1 %vm350_vm1, %v242_v57  ;;  %v2539_v57 = vld [vmem:[%s6612_s3 + $0x8] sm:$0xff] }
 0x140   : > { %3797 = vmatmul.msk.f32.gmra.mxu2 %vm350_vm1, %v3764_v48  ;;  %v3671_v48 = vld [vmem:[%s6610_s1 + $0x1b8] sm:$0xff] }
 0x141   : > { %v476_v53 = vpop.f32.mrf.mxu0 }
 0x142   : > { %v688_v62 = vadd.f32 %v5087_v4, %v476_v53  ;;  %v3943_v53 = vld [vmem:[%s6610_s1 + $0x510] sm:$0xff] }
 0x143   : > { %v960_v55 = vpop.f32.mrf.mxu2  ;;  %3806 = vmatmul.msk.f32.gmra.mxu3 %vm350_vm1, %v3773_v52 }
 0x144   : > { %v5180_v56 = vadd.f32 %v960_v55, %v685_v51  ;;  %v5209_v5 = vpop.f32.mrf.mxu1  ;;  %v3769_v55 = vld [vmem:[%s6610_s1 + $0x2b8] sm:$0xff] }
 0x145   : > { %3700 = vmatmul.msk.f32.gmra.mxu0 %vm350_vm1, %v3667_v33  ;;  %v2333_v33 = vld [vmem:[%s6611_s2 + $0x98] sm:$0xff] }
 0x146   : > { %v5198_v20 = vpop.f32.mrf.mxu3  ;;  %2443 = vperm.xlu2 %4332, %v2333_v33  }
 0x147   : > { %3737 = vmatmul.msk.f32.gmra.mxu1 %vm350_vm1, %v243_v21  ;;  %v4006_v21 = vld [vmem:[%s6610_s1 + $0x600] sm:$0xff] }
 0x148   : > { %3798 = vmatmul.msk.f32.gmra.mxu2 %vm350_vm1, %v3765_v39  ;;  %v3811_v39 = vld [vmem:[%s6610_s1 + $0x300] sm:$0xff] }
 0x14a   : > { %v479_v0 = vpop.f32.mrf.mxu0 }
 0x14b   : > { %v963_v2 = vpop.f32.mrf.mxu2  ;;  %3807 = vmatmul.msk.f32.gmra.mxu3 %vm350_vm1, %v3774_v63  ;;  %v691_v4 = vadd.f32 %v5113_v17, %v479_v0  ;;  %v2341_v17 = vld [vmem:[%s6611_s2 + $0xd8] sm:$0xff] }
 0x14c   : > { %v5212_v6 = vadd.f32 %v963_v2, %v688_v62  ;;  %v5244_v8 = vpop.f32.mrf.mxu1  ;;  %2483 = vperm.xlu1 %4331, %v2341_v17   ;;  %v3876_v62 = vld [vmem:[%s6610_s1 + $0x400] sm:$0xff]  ;;  %v3944_v2 = vld [vmem:[%s6610_s1 + $0x518] sm:$0xff] }
 0x14d   : > { %3701 = vmatmul.msk.f32.gmra.mxu0 %vm350_vm1, %v3668_v1 }
 0x14e   : > { %v5230_v22 = vpop.f32.mrf.mxu3 }
 0x14f   : > { %3974 = vmatmul.msk.f32.vlgmr.msrb.gmra.mxu1 %vm350_vm1, %v3941_v58  ;;  %v2541_v58 = vld [vmem:[%s6612_s3 + $0x18] sm:$0xff] }
 0x150   : > { %3799 = vmatmul.msk.f32.gmra.mxu2 %vm350_vm1, %v3766_v15 }
 0x152   : > { %v482_v10 = vpop.f32.mrf.mxu0 }
 0x153   : > { %v966_v9 = vpop.f32.mrf.mxu2  ;;  %3808 = vmatmul.msk.f32.gmra.mxu3 %vm350_vm1, %v3775_v3  ;;  %v694_v30 = vadd.f32 %v5145_v40, %v482_v10  ;;  %v2344_v40 = vld [vmem:[%s6611_s2 + $0xf0] sm:$0xff] }
 0x154   : > { %v5242_v14 = vadd.f32 %v966_v9, %v691_v4  ;;  %v5276_v37 = vpop.f32.mrf.mxu1  ;;  %2498 = vperm.xlu1 %4331, %v2344_v40   ;;  %v3812_v4 = vld [vmem:[%s6610_s1 + $0x308] sm:$0xff] }
 0x155   : > { %3702 = vmatmul.msk.f32.gmra.mxu0 %vm350_vm1, %v3669_v27  ;;  %v3945_v27 = vld [vmem:[%s6610_s1 + $0x520] sm:$0xff]  ;;  %v2339_v9 = vld [vmem:[%s6611_s2 + $0xc8] sm:$0xff] }
 0x156   : > { %v5262_v18 = vpop.f32.mrf.mxu3 }
 0x157   : > { %3975 = vmatmul.msk.f32.gmra.mxu1 %vm350_vm1, %v3942_v24  ;;  %v2342_v24 = vld [vmem:[%s6611_s2 + $0xe0] sm:$0xff] }
 0x158   : > { %3800 = vmatmul.msk.f32.gmra.mxu2 %vm350_vm1, %v3767_v29 }
 0x15a   : > { %v485_v32 = vpop.f32.mrf.mxu0 }
 0x15b   : > { %v969_v34 = vpop.f32.mrf.mxu2  ;;  %3809 = vmatmul.msk.f32.gmra.mxu3 %vm350_vm1, %v3776_v47  ;;  %v697_v43 = vadd.f32 %v5177_v54, %v485_v32  ;;  %v2538_v54 = vld [vmem:[%s6612_s3] sm:$0xff]  ;;  %v3878_v32 = vld [vmem:[%s6610_s1 + $0x410] sm:$0xff] }
 0x15c   : > { %v5274_v36 = vadd.f32 %v969_v34, %v694_v30  ;;  %v5308_v52 = vpop.f32.mrf.mxu1  ;;  %2572 = vperm.xlu0 %4330, %v2538_v54   ;;  %2577 = vperm.xlu1 %4331, %v2539_v57   ;;  %v3813_v30 = vld [vmem:[%s6610_s1 + $0x310] sm:$0xff]  ;;  %v2345_v54 = vld [vmem:[%s6611_s2 + $0xf8] sm:$0xff]  ;;  %v2551_v57 = vld [vmem:[%s6612_s3 + $0x68] sm:$0xff] }
 0x15d   : > { %3703 = vmatmul.msk.f32.gmra.mxu0 %vm350_vm1, %v3670_v35 }
 0x15e   : > { %v5294_v44 = vpop.f32.mrf.mxu3 }
 0x15f   : > { %3976 = vmatmul.msk.f32.gmra.mxu1 %vm350_vm1, %v3943_v53 }
 0x160   : > { %3801 = vmatmul.msk.f32.gmra.mxu2 %vm350_vm1, %v3768_v42  ;;  %v2544_v42 = vld [vmem:[%s6612_s3 + $0x30] sm:$0xff] }
 0x162   : > { %v488_v46 = vpop.f32.mrf.mxu0 }
 0x163   : > { %v972_v50 = vpop.f32.mrf.mxu2  ;;  %3810 = vmatmul.msk.f32.gmra.mxu3 %vm350_vm1, %v3777_v45  ;;  %v700_v60 = vadd.f32 %v5209_v5, %v488_v46  ;;  %v2336_v5 = vld [vmem:[%s6611_s2 + $0xb0] sm:$0xff]  ;;  %v3814_v46 = vld [vmem:[%s6610_s1 + $0x318] sm:$0xff] }
 0x164   : > { %v5306_v51 = vadd.f32 %v972_v50, %v697_v43  ;;  %v5340_v1 = vpop.f32.mrf.mxu1  ;;  %2458 = vperm.xlu2 %4332, %v2336_v5   ;;  %2592 = vperm.xlu1 %4331, %v2542_v11   ;;  %v3879_v50 = vld [vmem:[%s6610_s1 + $0x418] sm:$0xff]  ;;  %v3880_v5 = vld [vmem:[%s6610_s1 + $0x420] sm:$0xff] }
 0x165   : > { %3704 = vmatmul.msk.f32.gmra.mxu0 %vm350_vm1, %v3671_v48  ;;  %2587 = vperm.xlu0 %4330, %v2541_v58   ;;  %v3881_v58 = vld [vmem:[%s6610_s1 + $0x428] sm:$0xff] }
 0x166   : > { %v5326_v59 = vpop.f32.mrf.mxu3 }
 0x167   : > { %3977 = vmatmul.msk.f32.gmra.mxu1 %vm350_vm1, %v3944_v2 }
 0x168   : > { %3802 = vmatmul.msk.f32.gmra.mxu2 %vm350_vm1, %v3769_v55  ;;  %v4009_v55 = vld [vmem:[%s6610_s1 + $0x618] sm:$0xff] }
 0x16a   : > { %v491_v61 = vpop.f32.mrf.mxu0 }
 0x16b   : > { %v975_v63 = vpop.f32.mrf.mxu2  ;;  %3844 = vmatmul.msk.f32.vlgmr.msrb.gmra.mxu3 %vm350_vm1, %v3811_v39  ;;  %v703_v16 = vadd.f32 %v5244_v8, %v491_v61  ;;  %v4007_v8 = vld [vmem:[%s6610_s1 + $0x608] sm:$0xff] }
 0x16c   : > { %v5338_v0 = vadd.f32 %v975_v63, %v700_v60  ;;  %2473 = vperm.xlu2 %4332, %v2339_v9   ;;  %2607 = vperm.xlu1 %4331, %v2545_v13   ;;  %v2547_v60 = vld [vmem:[%s6612_s3 + $0x48] sm:$0xff]  ;;  %v3815_v63 = vld [vmem:[%s6610_s1 + $0x320] sm:$0xff]  ;;  %v5499_v13 = vpop.permute.xlu1 %2353 }
 0x16d   : > { %3909 = vmatmul.msk.f32.vlgmr.msrb.gmra.mxu0 %vm350_vm1, %v3876_v62  ;;  %2602 = vperm.xlu0 %4330, %v2544_v42   ;;  %v3816_v9 = vld [vmem:[%s6610_s1 + $0x328] sm:$0xff]  ;;  %v5530_v42 = vpop.permute.xlu2 %2358 }
 0x16e   : > { %v750_v12 = vpop.f32.mrf.mxu3 }
 0x16f   : > { %v5357_v15 = vadd.f32 %v750_v12, %v5100_v7  ;;  %v5370_v7 = vpop.f32.mrf.mxu1  ;;  %3978 = vmatmul.msk.f32.gmra.mxu1 %vm350_vm1, %v3945_v27  ;;  %v2540_v12 = vld [vmem:[%s6612_s3 + $0x10] sm:$0xff] }
 0x170   : > { %4039 = vmatmul.msk.f32.vlgmr.msrb.gmra.mxu2 %vm350_vm1, %v4006_v21 }
 0x172   : > { %v494_v25 = vpop.f32.mrf.mxu0 }
 0x173   : > { %v978_v3 = vpop.f32.mrf.mxu2  ;;  %3845 = vmatmul.msk.f32.gmra.mxu3 %vm350_vm1, %v3812_v4  ;;  %v706_v17 = vadd.f32 %v5276_v37, %v494_v25  ;;  %v3946_v37 = vld [vmem:[%s6610_s1 + $0x528] sm:$0xff]  ;;  %v2554_v4 = vld [vmem:[%s6612_s3 + $0x80] sm:$0xff] }
 0x174   : > { %v5368_v10 = vadd.f32 %v978_v3, %v703_v16  ;;  %2488 = vperm.xlu2 %4332, %v2342_v24   ;;  %2622 = vperm.xlu1 %4331, %v2548_v41   ;;  %v4010_v16 = vld [vmem:[%s6610_s1 + $0x620] sm:$0xff] }
 0x175   : > { %3910 = vmatmul.msk.f32.gmra.mxu0 %vm350_vm1, %v3877_v26  ;;  %2617 = vperm.xlu0 %4330, %v2547_v60   ;;  %v2550_v25 = vld [vmem:[%s6612_s3 + $0x60] sm:$0xff]  ;;  %v2556_v60 = vld [vmem:[%s6612_s3 + $0x90] sm:$0xff] }
 0x176   : > { %v753_v28 = vpop.f32.mrf.mxu3 }
 0x177   : > { %v5390_v29 = vadd.f32 %v753_v28, %v5131_v23  ;;  %v5403_v23 = vpop.f32.mrf.mxu1  ;;  %3979 = vmatmul.msk.f32.gmra.mxu1 %vm350_vm1, %v3946_v37  ;;  %v2553_v37 = vld [vmem:[%s6612_s3 + $0x78] sm:$0xff] }
 0x178   : > { %4040 = vmatmul.msk.f32.gmra.mxu2 %vm350_vm1, %v4007_v8 }
 0x17a   : > { %v497_v47 = vpop.f32.mrf.mxu0 }
 0x17b   : > { %v981_v35 = vpop.f32.mrf.mxu2  ;;  %3846 = vmatmul.msk.f32.gmra.mxu3 %vm350_vm1, %v3813_v30  ;;  %v709_v45 = vadd.f32 %v5308_v52, %v497_v47  ;;  %v3947_v52 = vld [vmem:[%s6610_s1 + $0x530] sm:$0xff]  ;;  %v3949_v30 = vld [vmem:[%s6610_s1 + $0x540] sm:$0xff]  ;;  %v4011_v47 = vld [vmem:[%s6610_s1 + $0x628] sm:$0xff] }
 0x17c   : > { %v5401_v34 = vadd.f32 %v981_v35, %v706_v17  ;;  %2503 = vperm.xlu2 %4332, %v2345_v54   ;;  %2637 = vperm.xlu1 %4331, %v2551_v57   ;;  %v5501_v17 = vpop.permute.xlu0 %2348  ;;  %v2557_v35 = vld [vmem:[%s6612_s3 + $0x98] sm:$0xff]  ;;  %v2546_v57 = vld [vmem:[%s6612_s3 + $0x40] sm:$0xff] }
 0x17d   : > { %3911 = vmatmul.msk.f32.gmra.mxu0 %vm350_vm1, %v3878_v32  ;;  %2632 = vperm.xlu0 %4330, %v2550_v25   ;;  %v2543_v32 = vld [vmem:[%s6612_s3 + $0x28] sm:$0xff] }
 0x17e   : > { %v756_v40 = vpop.f32.mrf.mxu3 }
 0x17f   : > { %v5423_v43 = vadd.f32 %v756_v40, %v5163_v49  ;;  %v5436_v49 = vpop.f32.mrf.mxu1  ;;  %3980 = vmatmul.msk.f32.gmra.mxu1 %vm350_vm1, %v3947_v52  ;;  %v3817_v40 = vld [vmem:[%s6610_s1 + $0x330] sm:$0xff] }
 0x180   : > { %4041 = vmatmul.msk.f32.gmra.mxu2 %vm350_vm1, %v4008_v38  ;;  %v4012_v52 = vld [vmem:[%s6610_s1 + $0x630] sm:$0xff] }
 0x182   : > { %v500_v48 = vpop.f32.mrf.mxu0 }
 0x183   : > { %v984_v53 = vpop.f32.mrf.mxu2  ;;  %3847 = vmatmul.msk.f32.gmra.mxu3 %vm350_vm1, %v3814_v46  ;;  %v712_v62 = vadd.f32 %v5340_v1, %v500_v48  ;;  %v3948_v1 = vld [vmem:[%s6610_s1 + $0x538] sm:$0xff]  ;;  %v3882_v46 = vld [vmem:[%s6610_s1 + $0x430] sm:$0xff] }
 0x184   : > { %v5434_v33 = vadd.f32 %v984_v53, %v709_v45  ;;  %2582 = vperm.xlu2 %4332, %v2540_v12   ;;  %2652 = vperm.xlu1 %4331, %v2554_v4   ;;  %v3950_v53 = vld [vmem:[%s6610_s1 + $0x548] sm:$0xff]  ;;  %v5552_v54 = vpop.permute.xlu0 %2373  ;;  %v4013_v4 = vld [vmem:[%s6610_s1 + $0x638] sm:$0xff] }
 0x185   : > { %3912 = vmatmul.msk.f32.gmra.mxu0 %vm350_vm1, %v3879_v50  ;;  %2647 = vperm.xlu0 %4330, %v2553_v37   ;;  %v5541_v50 = vpop.permute.xlu1 %2363 }
 0x186   : > { %v759_v39 = vpop.f32.mrf.mxu3 }
 0x187   : > { %v5456_v61 = vadd.f32 %v759_v39, %v5198_v20  ;;  %v5469_v20 = vpop.f32.mrf.mxu1  ;;  %3981 = vmatmul.msk.f32.gmra.mxu1 %vm350_vm1, %v3948_v1  ;;  %v5575_v1 = vpop.permute.xlu2 %2368 }
 0x188   : > { %4042 = vmatmul.msk.f32.gmra.mxu2 %vm350_vm1, %v4009_v55  ;;  %v2560_v55 = vld [vmem:[%s6612_s3 + $0xb0] sm:$0xff] }
 0x18a   : > { %v503_v2 = vpop.f32.mrf.mxu0 }
 0x18b   : > { %v987_v21 = vpop.f32.mrf.mxu2  ;;  %3848 = vmatmul.msk.f32.gmra.mxu3 %vm350_vm1, %v3815_v63  ;;  %v715_v27 = vadd.f32 %v5370_v7, %v503_v2  ;;  %v3818_v2 = vld [vmem:[%s6610_s1 + $0x338] sm:$0xff] }
 0x18c   : > { %v5467_v11 = vadd.f32 %v987_v21, %v712_v62  ;;  %2597 = vperm.xlu2 %4332, %v2543_v32   ;;  %2667 = vperm.xlu1 %4331, %v2557_v35   ;;  %v3883_v21 = vld [vmem:[%s6610_s1 + $0x438] sm:$0xff]  ;;  %v3884_v35 = vld [vmem:[%s6610_s1 + $0x440] sm:$0xff] }
 0x18d   : > { %3913 = vmatmul.msk.f32.gmra.mxu0 %vm350_vm1, %v3880_v5  ;;  %2662 = vperm.xlu0 %4330, %v2556_v60   ;;  %v5589_v25 = vpop.permute.xlu1 %2378  ;;  %v3820_v60 = vld [vmem:[%s6610_s1 + $0x348] sm:$0xff] }
 0x18e   : > { %v762_v26 = vpop.f32.mrf.mxu3 }
 0x18f   : > { %v5489_v3 = vadd.f32 %v762_v26, %v5230_v22  ;;  %v5506_v7 = vpop.f32.mrf.mxu1  ;;  %3982 = vmatmul.msk.f32.gmra.mxu1 %vm350_vm1, %v3949_v30  ;;  %v2563_v26 = vld [vmem:[%s6612_s3 + $0xc8] sm:$0xff] }
 0x190   : > { %4043 = vmatmul.msk.f32.gmra.mxu2 %vm350_vm1, %v4010_v16 }
 0x192   : > { %v506_v8 = vpop.f32.mrf.mxu0 }
 0x193   : > { %v990_v28 = vpop.f32.mrf.mxu2  ;;  %3849 = vmatmul.msk.f32.gmra.mxu3 %vm350_vm1, %v3816_v9  ;;  %v718_v41 = vadd.f32 %v5403_v23, %v506_v8  ;;  %v2559_v9 = vld [vmem:[%s6612_s3 + $0xa8] sm:$0xff] }
 0x194   : > { %v5504_v22 = vadd.f32 %v990_v28, %v715_v27  ;;  %2612 = vperm.xlu2 %4332, %v2546_v57   ;;  %2682 = vperm.xlu1 %4331, %v2560_v55   ;;  %v2549_v27 = vld [vmem:[%s6612_s3 + $0x58] sm:$0xff] }
 0x195   : > { %3914 = vmatmul.msk.f32.gmra.mxu0 %vm350_vm1, %v3881_v58  ;;  %v5600_v58 = vpop.permute.xlu0 %2388  ;;  %2677 = vperm.xlu0 %4330, %v2559_v9   ;;  %v5643_v57 = vpop.permute.xlu1 %2393 }
 0x196   : > { %v765_v24 = vpop.f32.mrf.mxu3 }
 0x197   : > { %v5526_v38 = vadd.f32 %v765_v24, %v5262_v18  ;;  %v5543_v23 = vpop.f32.mrf.mxu1  ;;  %3983 = vmatmul.msk.f32.gmra.mxu1 %vm350_vm1, %v3950_v53  ;;  %v5617_v24 = vpop.permute.xlu2 %2383 }
 0x198   : > { %4044 = vmatmul.msk.f32.gmra.mxu2 %vm350_vm1, %v4011_v47  ;;  %v3819_v47 = vld [vmem:[%s6610_s1 + $0x340] sm:$0xff] }
 0x19a   : > { %v509_v45 = vpop.f32.mrf.mxu0 }
 0x19b   : > { %v993_v48 = vpop.f32.mrf.mxu2  ;;  %3850 = vmatmul.msk.f32.gmra.mxu3 %vm350_vm1, %v3817_v40  ;;  %v721_v63 = vadd.f32 %v5436_v49, %v509_v45  ;;  %v3951_v49 = vld [vmem:[%s6610_s1 + $0x550] sm:$0xff]  ;;  %v4014_v40 = vld [vmem:[%s6610_s1 + $0x640] sm:$0xff] }
 0x19c   : > { %v5539_v18 = vadd.f32 %v993_v48, %v718_v41  ;;  %2627 = vperm.xlu2 %4332, %v2549_v27   ;;  %2697 = vperm.xlu1 %4331, %v2563_v26   ;;  %v2566_v45 = vld [vmem:[%s6612_s3 + $0xe0] sm:$0xff]  ;;  %v2555_v26 = vld [vmem:[%s6612_s3 + $0x88] sm:$0xff]  ;;  %v2565_v27 = vld [vmem:[%s6612_s3 + $0xd8] sm:$0xff] }
 0x19d   : > { %3915 = vmatmul.msk.f32.gmra.mxu0 %vm350_vm1, %v3882_v46  ;;  %v2552_v46 = vld [vmem:[%s6612_s3 + $0x70] sm:$0xff]  ;;  %v2562_v48 = vld [vmem:[%s6612_s3 + $0xc0] sm:$0xff] }
 0x19e   : > { %v768_v39 = vpop.f32.mrf.mxu3  ;;  %2692 = vperm.xlu0 %4330, %v2562_v48   ;;  %v2558_v48 = vld [vmem:[%s6612_s3 + $0xa0] sm:$0xff] }
 0x19f   : > { %v5565_v62 = vadd.f32 %v768_v39, %v5294_v44  ;;  %v5580_v16 = vpop.f32.mrf.mxu1  ;;  %3984 = vmatmul.msk.f32.gmra.mxu1 %vm350_vm1, %v3951_v49  ;;  %v5648_v39 = vpop.permute.xlu0 %2403 }
 0x1a0   : > { %4045 = vmatmul.msk.f32.gmra.mxu2 %vm350_vm1, %v4012_v52  ;;  %v5665_v49 = vpop.permute.xlu2 %2398 }
 0x1a2   : > { %v512_v5 = vpop.f32.mrf.mxu0 }
 0x1a3   : > { %v996_v12 = vpop.f32.mrf.mxu2  ;;  %3851 = vmatmul.msk.f32.gmra.mxu3 %vm350_vm1, %v3818_v2  ;;  %v724_v30 = vadd.f32 %v5469_v20, %v512_v5  ;;  %v3952_v20 = vld [vmem:[%s6610_s1 + $0x558] sm:$0xff] }
 0x1a4   : > { %v5578_v44 = vadd.f32 %v996_v12, %v721_v63  ;;  %2642 = vperm.xlu2 %4332, %v2552_v46   ;;  %2712 = vperm.xlu1 %4331, %v2566_v45   ;;  %v4015_v12 = vld [vmem:[%s6610_s1 + $0x648] sm:$0xff]  ;;  %v4016_v46 = vld [vmem:[%s6610_s1 + $0x650] sm:$0xff] }
 0x1a5   : > { %3916 = vmatmul.msk.f32.gmra.mxu0 %vm350_vm1, %v3883_v21  ;;  %v3953_v21 = vld [vmem:[%s6610_s1 + $0x560] sm:$0xff]  ;;  %v3954_v45 = vld [vmem:[%s6610_s1 + $0x568] sm:$0xff] }
 0x1a6   : > { %v771_v8 = vpop.f32.mrf.mxu3  ;;  %2707 = vperm.xlu0 %4330, %v2565_v27   ;;  %v3955_v27 = vld [vmem:[%s6610_s1 + $0x570] sm:$0xff] }
 0x1a7   : > { %v5604_v28 = vadd.f32 %v771_v8, %v5326_v59  ;;  %v5619_v41 = vpop.f32.mrf.mxu1  ;;  %3985 = vmatmul.msk.f32.gmra.mxu1 %vm350_vm1, %v3952_v20 }
 0x1a8   : > { %4046 = vmatmul.msk.f32.gmra.mxu2 %vm350_vm1, %v4013_v4  ;;  %v2569_v4 = vld [vmem:[%s6612_s3 + $0xf8] sm:$0xff] }
 0x1aa   : > { %v515_v32 = vpop.f32.mrf.mxu0 }
 0x1ab   : > { %v999_v37 = vpop.f32.mrf.mxu2  ;;  %3852 = vmatmul.msk.f32.gmra.mxu3 %vm350_vm1, %v3819_v47  ;;  %v727_v55 = vadd.f32 %v5506_v7, %v515_v32  ;;  %v3821_v47 = vld [vmem:[%s6610_s1 + $0x350] sm:$0xff] }
 0x1ac   : > { %v5615_v59 = vadd.f32 %v999_v37, %v724_v30  ;;  %2657 = vperm.xlu2 %4332, %v2555_v26   ;;  %2727 = vperm.xlu1 %4331, %v2569_v4   ;;  %v5688_v37 = vpop.permute.xlu1 %2408 }
 0x1ad   : > { %3917 = vmatmul.msk.f32.gmra.mxu0 %vm350_vm1, %v3884_v35  ;;  %v3886_v35 = vld [vmem:[%s6610_s1 + $0x450] sm:$0xff] }
 0x1ae   : > { %v1026_v53 = vpop.f32.mrf.mxu3 }
 0x1af   : > { %v5639_v52 = vadd.f32 %v1026_v53, %v5357_v15  ;;  %v3885_v15 = vld [vmem:[%s6610_s1 + $0x448] sm:$0xff]  ;;  %v5656_v7 = vpop.f32.mrf.mxu1  ;;  %3986 = vmatmul.msk.f32.gmra.mxu1 %vm350_vm1, %v3953_v21  ;;  %v2568_v53 = vld [vmem:[%s6612_s3 + $0xf0] sm:$0xff] }
 0x1b0   : > { %4047 = vmatmul.msk.f32.gmra.mxu2 %vm350_vm1, %v4014_v40  ;;  %2722 = vperm.xlu0 %4330, %v2568_v53  }
 0x1b1   : > { %6615 = vst [vmem:[#allocation3_spill] sm:$0xff] %v5639_v52 }
 0x1b2   : > { %v518_v63 = vpop.f32.mrf.mxu0 }
 0x1b3   : > { %v1002_v2 = vpop.f32.mrf.mxu2  ;;  %3853 = vmatmul.msk.f32.gmra.mxu3 %vm350_vm1, %v3820_v60  ;;  %v730_v30 = vadd.f32 %v5543_v23, %v518_v63 }
 0x1b4   : > { %v5654_v5 = vadd.f32 %v1002_v2, %v727_v55  ;;  %2672 = vperm.xlu2 %4332, %v2558_v48   ;;  %v3822_v2 = vld [vmem:[%s6610_s1 + $0x358] sm:$0xff]  ;;  %v5727_v26 = vpop.permute.xlu1 %2423  ;;  %v3888_v48 = vld [vmem:[%s6610_s1 + $0x460] sm:$0xff] }
 0x1b5   : > { %3918 = vmatmul.msk.f32.gmra.mxu0 %vm350_vm1, %v3885_v15  ;;  %v5716_v15 = vpop.permute.xlu2 %2413 }
 0x1b6   : > { %v1029_v9 = vpop.f32.mrf.mxu3 }
 0x1b7   : > { %v5678_v8 = vadd.f32 %v1029_v9, %v5390_v29  ;;  %v5690_v29 = vpop.permute.xlu0 %2418  ;;  %v5695_v23 = vpop.f32.mrf.mxu1  ;;  %3987 = vmatmul.msk.f32.gmra.mxu1 %vm350_vm1, %v3954_v45  ;;  %v4017_v9 = vld [vmem:[%s6610_s1 + $0x658] sm:$0xff]  ;;  %v3823_v45 = vld [vmem:[%s6610_s1 + $0x360] sm:$0xff] }
 0x1b8   : > { %4048 = vmatmul.msk.f32.gmra.mxu2 %vm350_vm1, %v4015_v12  ;;  %v3887_v12 = vld [vmem:[%s6610_s1 + $0x458] sm:$0xff] }
 0x1b9   : > { %6616 = vst [vmem:[#allocation4_spill] sm:$0xff] %v5678_v8 }
 0x1ba   : > { %v521_v32 = vpop.f32.mrf.mxu0 }
 0x1bb   : > { %v1005_v20 = vpop.f32.mrf.mxu2  ;;  %3854 = vmatmul.msk.f32.gmra.mxu3 %vm350_vm1, %v3821_v47  ;;  %v733_v63 = vadd.f32 %v5580_v16, %v521_v32  ;;  %v2561_v47 = vld [vmem:[%s6612_s3 + $0xb8] sm:$0xff] }
 0x1bc   : > { %v5693_v40 = vadd.f32 %v1005_v20, %v730_v30  ;;  %2687 = vperm.xlu2 %4332, %v2561_v47  }
 0x1bd   : > { %3919 = vmatmul.msk.f32.gmra.mxu0 %vm350_vm1, %v3886_v35  ;;  %v5755_v53 = vpop.permute.xlu2 %2428 }
 0x1be   : > { %v1032_v55 = vpop.f32.mrf.mxu3 }
 0x1bf   : > { %v5712_v60 = vadd.f32 %v1032_v55, %v5423_v43  ;;  %v5729_v16 = vpop.f32.mrf.mxu1  ;;  %v5738_v30 = vpop.permute.xlu0 %2433  ;;  %3988 = vmatmul.msk.f32.gmra.mxu1 %vm350_vm1, %v3955_v27 }
 0x1c0   : > { %4049 = vmatmul.msk.f32.gmra.mxu2 %vm350_vm1, %v4016_v46 }
 0x1c1   : > { %6617 = vst [vmem:[#allocation5_spill] sm:$0xff] %v5712_v60  ;;  %v3891_v60 = vld [vmem:[%s6610_s1 + $0x478] sm:$0xff] }
 0x1c2   : > { %v524_v21 = vpop.f32.mrf.mxu0 }
 0x1c3   : > { %v1008_v4 = vpop.f32.mrf.mxu2  ;;  %3855 = vmatmul.msk.f32.gmra.mxu3 %vm350_vm1, %v3822_v2  ;;  %v736_v20 = vadd.f32 %v5619_v41, %v524_v21  ;;  %v3956_v41 = vld [vmem:[%s6610_s1 + $0x578] sm:$0xff]  ;;  %v4018_v2 = vld [vmem:[%s6610_s1 + $0x660] sm:$0xff]  ;;  %v5769_v21 = vpop.permute.xlu1 %2438 }
 0x1c4   : > { %v5725_v43 = vadd.f32 %v1008_v4, %v733_v63 }
 0x1c5   : > { %3920 = vmatmul.msk.f32.gmra.mxu0 %vm350_vm1, %v3887_v12  ;;  %v2564_v12 = vld [vmem:[%s6612_s3 + $0xd0] sm:$0xff] }
 0x1c6   : > { %v1035_v32 = vpop.f32.mrf.mxu3  ;;  %2702 = vperm.xlu2 %4332, %v2564_v12   ;;  %v2567_v12 = vld [vmem:[%s6612_s3 + $0xe8] sm:$0xff] }
 0x1c7   : > { %v5745_v35 = vadd.f32 %v1035_v32, %v5456_v61  ;;  %v5760_v63 = vpop.f32.mrf.mxu1  ;;  %v5774_v27 = vpop.permute.xlu0 %2448  ;;  %3989 = vmatmul.msk.f32.gmra.mxu1 %vm350_vm1, %v3956_v41  ;;  %v3824_v32 = vld [vmem:[%s6610_s1 + $0x368] sm:$0xff] }
 0x1c8   : > { %4050 = vmatmul.msk.f32.gmra.mxu2 %vm350_vm1, %v4017_v9 }
 0x1c9   : > { %6618 = vst [vmem:[#allocation6_spill] sm:$0xff] %v5745_v35 }
 0x1ca   : > { %v527_v46 = vpop.f32.mrf.mxu0 }
 0x1cb   : > { %v1011_v55 = vpop.f32.mrf.mxu2  ;;  %3856 = vmatmul.msk.f32.gmra.mxu3 %vm350_vm1, %v3823_v45  ;;  %v739_v47 = vadd.f32 %v5656_v7, %v527_v46  ;;  %v3889_v45 = vld [vmem:[%s6610_s1 + $0x468] sm:$0xff]  ;;  %v3957_v46 = vld [vmem:[%s6610_s1 + $0x580] sm:$0xff] }
 0x1cc   : > { %v5758_v61 = vadd.f32 %v1011_v55, %v736_v20  ;;  %v4019_v7 = vld [vmem:[%s6610_s1 + $0x668] sm:$0xff] }
 0x1cd   : > { %3921 = vmatmul.msk.f32.gmra.mxu0 %vm350_vm1, %v3888_v48 }
 0x1ce   : > { %v1038_v4 = vpop.f32.mrf.mxu3  ;;  %2717 = vperm.xlu2 %4332, %v2567_v12  }
 0x1cf   : > { %v5778_v9 = vadd.f32 %v1038_v4, %v5489_v3  ;;  %v5791_v3 = vpop.permute.xlu2 %2443  ;;  %v5793_v41 = vpop.f32.mrf.mxu1  ;;  %3990 = vmatmul.msk.f32.gmra.mxu1 %vm350_vm1, %v3957_v46 }
 0x1d0   : > { %4051 = vmatmul.msk.f32.gmra.mxu2 %vm350_vm1, %v4018_v2 }
 0x1d1   : > { %6619 = vst [vmem:[#allocation7_spill] sm:$0xff] %v5778_v9  ;;  %v3890_v9 = vld [vmem:[%s6610_s1 + $0x470] sm:$0xff] }
 0x1d2   : > { %v530_v20 = vpop.f32.mrf.mxu0 }
 0x1d3   : > { %v1014_v48 = vpop.f32.mrf.mxu2  ;;  %3857 = vmatmul.msk.f32.gmra.mxu3 %vm350_vm1, %v3824_v32  ;;  %v5811_v32 = vpop.permute.xlu1 %2453 }
 0x1d4   : > { %v5789_v55 = vadd.f32 %v1014_v48, %v739_v47  ;;  %v742_v47 = vadd.f32 %v5695_v23, %v530_v20  ;;  %v5816_v48 = vpop.permute.xlu0 %2463  ;;  %v4020_v20 = vld [vmem:[%s6610_s1 + $0x670] sm:$0xff] }
 0x1d5   : > { %3922 = vmatmul.msk.f32.gmra.mxu0 %vm350_vm1, %v3889_v45  ;;  %v3825_v45 = vld [vmem:[%s6610_s1 + $0x370] sm:$0xff]  ;;  %6621 = vst [vmem:[#allocation9_spill] sm:$0xff] %v5816_v48 }
 0x1d6   : > { %v1041_v2 = vpop.f32.mrf.mxu3 }
 0x1d7   : > { %v5807_v4 = vadd.f32 %v1041_v2, %v5526_v38  ;;  %v5824_v23 = vpop.f32.mrf.mxu1  ;;  %v3958_v2 = vld [vmem:[%s6610_s1 + $0x588] sm:$0xff]  ;;  %v5833_v12 = vpop.permute.xlu2 %2458 }
 0x1d8   : > { %4052 = vmatmul.msk.f32.gmra.mxu2 %vm350_vm1, %v4019_v7  ;;  %6622 = vst [vmem:[#allocation10_spill] sm:$0xff] %v5833_v12  ;;  %3991 = vmatmul.msk.f32.gmra.mxu1 %vm350_vm1, %v3958_v2 }
 0x1d9   : > { %6620 = vst [vmem:[#allocation8_spill] sm:$0xff] %v5807_v4 }
 0x1da   : > { %v533_v46 = vpop.f32.mrf.mxu0 }
 0x1db   : > { %v1017_v38 = vpop.f32.mrf.mxu2  ;;  %3858 = vmatmul.msk.f32.gmra.mxu3 %vm350_vm1, %v3825_v45  ;;  %v745_v45 = vadd.f32 %v5729_v16, %v533_v46  ;;  %v4021_v16 = vld [vmem:[%s6610_s1 + $0x678] sm:$0xff]  ;;  %v3959_v46 = vld [vmem:[%s6610_s1 + $0x590] sm:$0xff] }
 0x1dc   : > { %v5822_v7 = vadd.f32 %v1017_v38, %v742_v47  ;;  %v5844_v38 = vpop.permute.xlu1 %2468  ;;  %v5849_v2 = vpop.permute.xlu0 %2478 }
 0x1dd   : > { %3923 = vmatmul.msk.f32.gmra.mxu0 %vm350_vm1, %v3890_v9  ;;  %v3826_v9 = vld [vmem:[%s6610_s1 + $0x378] sm:$0xff]  ;;  %6624 = vst [vmem:[#allocation12_spill] sm:$0xff] %v5844_v38 }
 0x1de   : > { %v1044_v4 = vpop.f32.mrf.mxu3  ;;  %6625 = vst [vmem:[#allocation13_spill] sm:$0xff] %v5849_v2  ;;  %v3892_v2 = vld [vmem:[%s6610_s1 + $0x480] sm:$0xff] }
 0x1df   : > { %v5837_v47 = vadd.f32 %v1044_v4, %v5565_v62  ;;  %v5854_v4 = vpop.f32.mrf.mxu1 }
 0x1e0   : > { %4053 = vmatmul.msk.f32.gmra.mxu2 %vm350_vm1, %v4020_v20  ;;  %3992 = vmatmul.msk.f32.gmra.mxu1 %vm350_vm1, %v3959_v46 }
 0x1e1   : > { %6623 = vst [vmem:[#allocation11_spill] sm:$0xff] %v5837_v47 }
 0x1e2   : > { %v536_v35 = vpop.f32.mrf.mxu0 }
 0x1e3   : > { %v1020_v8 = vpop.f32.mrf.mxu2  ;;  %3859 = vmatmul.msk.f32.gmra.mxu3 %vm350_vm1, %v3826_v9 }
 0x1e4   : > { %v5852_v62 = vadd.f32 %v1020_v8, %v745_v45  ;;  %v748_v8 = vadd.f32 %v5760_v63, %v536_v35  ;;  %v5869_v45 = vpop.permute.xlu2 %2473  ;;  %v5880_v46 = vpop.permute.xlu1 %2483  ;;  %v4022_v63 = vld [vmem:[%s6610_s1 + $0x680] sm:$0xff] }
 0x1e5   : > { %3924 = vmatmul.msk.f32.gmra.mxu0 %vm350_vm1, %v3891_v60  ;;  %6627 = vst [vmem:[#allocation15_spill] sm:$0xff] %v5869_v45  ;;  %v3827_v60 = vld [vmem:[%s6610_s1 + $0x380] sm:$0xff]  ;;  %v5884_v35 = vpop.permute.xlu0 %2493 }
 0x1e6   : > { %v1047_v20 = vpop.f32.mrf.mxu3  ;;  %6628 = vst [vmem:[#allocation16_spill] sm:$0xff] %v5880_v46 }
 0x1e7   : > { %v5865_v47 = vadd.f32 %v1047_v20, %v5604_v28  ;;  %6629 = vst [vmem:[#allocation17_spill] sm:$0xff] %v5884_v35  ;;  %v3960_v20 = vld [vmem:[%s6610_s1 + $0x598] sm:$0xff] }
 0x1e8   : > { %4054 = vmatmul.msk.f32.gmra.mxu2 %vm350_vm1, %v4021_v16  ;;  %v5882_v16 = vpop.f32.mrf.mxu1  ;;  %3993 = vmatmul.msk.f32.gmra.mxu1 %vm350_vm1, %v3960_v20 }
 0x1e9   : > { %6626 = vst [vmem:[#allocation14_spill] sm:$0xff] %v5865_v47 }
 0x1ea   : > { %v1570_v9 = vpop.f32.mrf.mxu0 }
 0x1eb   : > { %v1023_v38 = vpop.f32.mrf.mxu2  ;;  %3860 = vmatmul.msk.f32.gmra.mxu3 %vm350_vm1, %v3827_v60 }
 0x1ec   : > { %v5878_v28 = vadd.f32 %v1023_v38, %v748_v8  ;;  %v3828_v8 = vld [vmem:[%s6610_s1 + $0x388] sm:$0xff]  ;;  %v5899_v35 = vpop.permute.xlu2 %2488 }
 0x1ed   : > { %3925 = vmatmul.msk.f32.gmra.mxu0 %vm350_vm1, %v3892_v2  ;;  %6630 = vst [vmem:[#allocation18_spill] sm:$0xff] %v5899_v35  ;;  %v3893_v2 = vld [vmem:[%s6610_s1 + $0x488] sm:$0xff]  ;;  %v3961_v35 = vld [vmem:[%s6610_s1 + $0x5a0] sm:$0xff] }
 0x1ee   : > { %v1262_v47 = vpop.f32.mrf.mxu3 }
 0x1ef   : > { %v1358_v38 = vadd.f32 %v1262_v47, %v5116_v19  ;;  %v4023_v19 = vld [vmem:[%s6610_s1 + $0x688] sm:$0xff] }
 0x1f0   : > { %4055 = vmatmul.msk.f32.gmra.mxu2 %vm350_vm1, %v4022_v63  ;;  %v5910_v47 = vpop.f32.mrf.mxu1  ;;  %v5912_v63 = vpop.permute.xlu1 %2498  ;;  %3994 = vmatmul.msk.f32.gmra.mxu1 %vm350_vm1, %v3961_v35  ;;  %v4024_v35 = vld [vmem:[%s6610_s1 + $0x690] sm:$0xff] }
 0x1f1   : > { %v1666_v60 = vadd.f32 %v1570_v9, %v1358_v38  ;;  %6631 = vst [vmem:[#allocation19_spill] sm:$0xff] %v5912_v63  ;;  %v2573_v38 = vpop.permute.xlu0 %2572  ;;  %v3894_v63 = vld [vmem:[%s6610_s1 + $0x490] sm:$0xff] }
 0x1f2   : > { %v1573_v46 = vpop.f32.mrf.mxu0 }
 0x1f3   : > { %v2186_v45 = vpop.f32.mrf.mxu2  ;;  %v1974_v48 = vadd.f32 %v5793_v41, %v1666_v60  ;;  %3861 = vmatmul.msk.f32.gmra.mxu3 %vm350_vm1, %v3828_v8 }
 0x1f5   : > { %3926 = vmatmul.msk.f32.gmra.mxu0 %vm350_vm1, %v3893_v2  ;;  %v2282_v9 = vadd.f32 %v2186_v45, %v1974_v48  ;;  %v3829_v48 = vld [vmem:[%s6610_s1 + $0x390] sm:$0xff] }
 0x1f6   : > { %v1265_v20 = vpop.f32.mrf.mxu3 }
 0x1f7   : > { %v1359_v41 = vadd.f32 %v1265_v20, %v5148_v31  ;;  %v2506_v8 = vmul.f32 %v5501_v17, %v2282_v9  ;;  %v5929_v17 = vpop.permute.xlu2 %2503 }
 0x1f8   : > { %4056 = vmatmul.msk.f32.gmra.mxu2 %vm350_vm1, %v4023_v19  ;;  %v5935_v9 = vpop.f32.mrf.mxu1 }
 0x1f9   : > { %v2730_v45 = vadd.f32 %v2573_v38, %v2506_v8  ;;  %v1667_v60 = vadd.f32 %v1573_v46, %v1359_v41  ;;  %v3962_v41 = vld [vmem:[%s6610_s1 + $0x5a8] sm:$0xff]  ;;  %v2578_v8 = vpop.permute.xlu1 %2577 }
 0x1fa   : > { %v1576_v2 = vpop.f32.mrf.mxu0  ;;  %3995 = vmatmul.msk.f32.gmra.mxu1 %vm350_vm1, %v3962_v41 }
 0x1fb   : > { %v2189_v52 = vpop.f32.mrf.mxu2  ;;  %v2762_v12 = vsub.f32 0.0, %v2730_v45  ;;  %v1975_v31 = vadd.f32 %v5824_v23, %v1667_v60  ;;  %3862 = vmatmul.msk.f32.gmra.mxu3 %vm350_vm1, %v3829_v48 }
 0x1fd   : > { %3927 = vmatmul.msk.f32.gmra.mxu0 %vm350_vm1, %v3894_v63  ;;  %v2794_v46 = vmul.f32 1.442695, %v2762_v12  ;;  %v2283_v19 = vadd.f32 %v2189_v52, %v1975_v31  ;;  %v3830_v12 = vld [vmem:[%s6610_s1 + $0x398] sm:$0xff] }
 0x1fe   : > { %v1268_v20 = vpop.f32.mrf.mxu3  ;;  %v4025_v31 = vld [vmem:[%s6610_s1 + $0x698] sm:$0xff] }
 0x1ff   : > { %4333 = vpow2.f32 %v2794_v46  ;;  %v1360_v38 = vadd.f32 %v1268_v20, %v5180_v56  ;;  %v2507_v23 = vmul.f32 %v5499_v13, %v2283_v19  ;;  %v3895_v56 = vld [vmem:[%s6610_s1 + $0x498] sm:$0xff]  ;;  %v2583_v19 = vpop.permute.xlu2 %2582 }
 0x200   : > { %4057 = vmatmul.msk.f32.gmra.mxu2 %vm350_vm1, %v4024_v35 }
 0x201   : > { %v2731_v52 = vadd.f32 %v2578_v8, %v2507_v23  ;;  %v1668_v63 = vadd.f32 %v1576_v2, %v1360_v38  ;;  %v5958_v23 = vpop.f32.mrf.mxu1  ;;  %v3831_v8 = vld [vmem:[%s6610_s1 + $0x3a0] sm:$0xff] }
 0x202   : > { %v1579_v48 = vpop.f32.mrf.mxu0 }
 0x203   : > { %v2192_v13 = vpop.f32.mrf.mxu2  ;;  %v2763_v45 = vsub.f32 0.0, %v2731_v52  ;;  %v1976_v60 = vadd.f32 %v5854_v4, %v1668_v63  ;;  %3863 = vmatmul.msk.f32.gmra.mxu3 %vm350_vm1, %v3830_v12  ;;  %v3963_v12 = vld [vmem:[%s6610_s1 + $0x5b0] sm:$0xff] }
 0x204   : > { %3996 = vmatmul.msk.f32.gmra.mxu1 %vm350_vm1, %v3963_v12 }
 0x205   : > { %3928 = vmatmul.msk.f32.gmra.mxu0 %vm350_vm1, %v3895_v56  ;;  %v4334_v35 = vpop.eup %4333  ;;  %v2796_v46 = vmul.f32 1.442695, %v2763_v45  ;;  %v2284_v2 = vadd.f32 %v2192_v13, %v1976_v60  ;;  %v4026_v60 = vld [vmem:[%s6610_s1 + $0x6a0] sm:$0xff] }
 0x206   : > { %v5956_v20 = vadd.f32 1.0, %v4334_v35  ;;  %v1271_v38 = vpop.f32.mrf.mxu3 }
 0x207   : > { %4335 = vpow2.f32 %v2796_v46  ;;  %v1361_v4 = vadd.f32 %v1271_v38, %v5212_v6  ;;  %v2508_v41 = vmul.f32 %v5530_v42, %v2284_v2  ;;  %v3896_v6 = vld [vmem:[%s6610_s1 + $0x4a0] sm:$0xff] }
 0x208   : > { %4058 = vmatmul.msk.f32.gmra.mxu2 %vm350_vm1, %v4025_v31  ;;  %4337 = vrcp.f32 %v5956_v20  ;;  %vm2895_vm3 = vweird.f32 %v5956_v20 }
 0x209   : > { %v2732_v52 = vadd.f32 %v2583_v19, %v2508_v41  ;;  %v1669_v63 = vadd.f32 %v1579_v48, %v1361_v4  ;;  %v5982_v38 = vpop.f32.mrf.mxu1  ;;  %v3832_v41 = vld [vmem:[%s6610_s1 + $0x3a8] sm:$0xff] }
 0x20a   : > { %v1582_v56 = vpop.f32.mrf.mxu0 }
 0x20b   : > { %v2195_v42 = vpop.f32.mrf.mxu2  ;;  %v2764_v13 = vsub.f32 0.0, %v2732_v52  ;;  %v1977_v45 = vadd.f32 %v5882_v16, %v1669_v63  ;;  %3864 = vmatmul.msk.f32.gmra.mxu3 %vm350_vm1, %v3831_v8 }
 0x20d   : > { %3929 = vmatmul.msk.f32.gmra.mxu0 %vm350_vm1, %v3896_v6  ;;  %v4336_v48 = vpop.eup %4335  ;;  %v2798_v31 = vmul.f32 1.442695, %v2764_v13  ;;  %v2285_v35 = vadd.f32 %v2195_v42, %v1977_v45  ;;  %v3897_v6 = vld [vmem:[%s6610_s1 + $0x4a8] sm:$0xff]  ;;  %v2899_v42 = vand.u32 2147483647, %v5956_v20  ;;  %v2901_v13 = vand.u32 2147483648, %v5956_v20  ;;  %v2588_v45 = vpop.permute.xlu0 %2587 }
 0x20e   : > { %v4338_v46 = vpop.eup %4337  ;;  %v5980_v2 = vadd.f32 1.0, %v4336_v48  ;;  %v1274_v19 = vpop.f32.mrf.mxu3 }
 0x20f   : > { %v2891_v4 = vmul.f32 %v4338_v46, %v5956_v20  ;;  %4339 = vpow2.f32 %v2798_v31  ;;  %v1362_v16 = vadd.f32 %v1274_v19, %v5242_v14  ;;  %v2509_v12 = vmul.f32 %v5541_v50, %v2285_v35  ;;  %v3964_v14 = vld [vmem:[%s6610_s1 + $0x5b8] sm:$0xff]  ;;  %v4027_v31 = vld [vmem:[%s6610_s1 + $0x6a8] sm:$0xff]  ;;  %v3833_v20 = vld [vmem:[%s6610_s1 + $0x3b0] sm:$0xff] }
 0x210   : > { %4059 = vmatmul.msk.f32.gmra.mxu2 %vm350_vm1, %v4026_v60  ;;  %4341 = vrcp.f32 %v5980_v2  ;;  %3997 = vmatmul.msk.f32.gmra.mxu1 %vm350_vm1, %v3964_v14  ;;  %vm2896_vm2 = vweird.f32 %v4338_v46  ;;  %vm2900_vm6 = vcmp.eq.f32.partialorder %v2899_v42, 8.507059e+37  ;;  %vm2910_vm8 = vweird.f32 %v5980_v2 }
 0x211   : > { %v2892_v8 = vsub.f32 1.0, %v2891_v4  ;;  %v1670_v52 = vadd.f32 %v1582_v56, %v1362_v16  ;;  %v2733_v56 = vadd.f32 %v2588_v45, %v2509_v12  ;;  %vm2897_vm5 = vmor %vm2895_vm3, %vm2896_vm2 }
 0x212   : > { %v1585_v63 = vpop.f32.mrf.mxu0 }
 0x213   : > { %v2198_v60 = vpop.f32.mrf.mxu2  ;;  %v2893_v50 = vmul.f32 %v4338_v46, %v2892_v8  ;;  %v1978_v48 = vadd.f32 %v5910_v47, %v1670_v52  ;;  %3865 = vmatmul.msk.f32.gmra.mxu3 %vm350_vm1, %v3832_v41  ;;  %v2765_v4 = vsub.f32 0.0, %v2733_v56  ;;  %v2902_v8 = vor.u32 1.1754944e-38, %v2901_v13  ;;  %v3965_v56 = vld [vmem:[%s6610_s1 + $0x5c0] sm:$0xff] }
 0x215   : > { %3930 = vmatmul.msk.f32.gmra.mxu0 %vm350_vm1, %v3897_v6  ;;  %v4340_v35 = vpop.eup %4339  ;;  %v2894_v19 = vadd.f32 %v4338_v46, %v2893_v50  ;;  %v2286_v16 = vadd.f32 %v2198_v60, %v1978_v48  ;;  %v2800_v45 = vmul.f32 1.442695, %v2765_v4  ;;  %v6013_v6 = vpop.f32.mrf.mxu1  ;;  %v3898_v60 = vld [vmem:[%s6610_s1 + $0x4b0] sm:$0xff]  ;;  %v2916_v48 = vand.u32 2147483648, %v5980_v2 }
 0x216   : > { %v4342_v14 = vpop.eup %4341  ;;  %v6009_v12 = vadd.f32 1.0, %v4340_v35  ;;  %v1277_v47 = vpop.f32.mrf.mxu3 }
 0x217   : > { %v2898_v41 = vsel %vm2897_vm5, %v4338_v46, %v2894_v19  ;;  %v2906_v52 = vmul.f32 %v4342_v14, %v5980_v2  ;;  %v2510_v42 = vmul.f32 %v5575_v1, %v2286_v16  ;;  %v1363_v35 = vadd.f32 %v1277_v47, %v5274_v36 }
 0x218   : > { %4060 = vmatmul.msk.f32.gmra.mxu2 %vm350_vm1, %v4027_v31  ;;  %v2903_v50 = vsel %vm2900_vm6, %v2902_v8, %v2898_v41  ;;  %4343 = vrcp.f32 %v6009_v12  ;;  %v2593_v31 = vpop.permute.xlu1 %2592  ;;  %3998 = vmatmul.msk.f32.gmra.mxu1 %vm350_vm1, %v3965_v56  ;;  %vm2911_vm7 = vweird.f32 %v4342_v14  ;;  %v2914_v1 = vand.u32 2147483647, %v5980_v2  ;;  %v4028_v41 = vld [vmem:[%s6610_s1 + $0x6b0] sm:$0xff] }
 0x219   : > { %3371 = vst.msk [vmem:[%s6019_s22] sm:$0xff] %vm3370_vm4, %v2903_v50  ;;  %v2907_v46 = vsub.f32 1.0, %v2906_v52  ;;  %4345 = vpow2.f32 %v2800_v45  ;;  %v2734_v16 = vadd.f32 %v2593_v31, %v2510_v42  ;;  %v1671_v8 = vadd.f32 %v1585_v63, %v1363_v35  ;;  %vm2912_vm9 = vmor %vm2910_vm8, %vm2911_vm7 }
 0x21a   : > { %v1588_v13 = vpop.f32.mrf.mxu0  ;;  %v2917_v45 = vor.u32 1.1754944e-38, %v2916_v48  ;;  %vm2915_vm10 = vcmp.eq.f32.partialorder %v2914_v1, 8.507059e+37  ;;  %v3899_v1 = vld [vmem:[%s6610_s1 + $0x4b8] sm:$0xff]  ;;  %vm2925_vm12 = vweird.f32 %v6009_v12 }
 0x21b   : > { %v2201_v19 = vpop.f32.mrf.mxu2  ;;  %v2908_v4 = vmul.f32 %v4342_v14, %v2907_v46  ;;  %3866 = vmatmul.msk.f32.gmra.mxu3 %vm350_vm1, %v3833_v20  ;;  %v2766_v36 = vsub.f32 0.0, %v2734_v16  ;;  %v1979_v50 = vadd.f32 %v5935_v9, %v1671_v8  ;;  %v3834_v9 = vld [vmem:[%s6610_s1 + $0x3b8] sm:$0xff]  ;;  %v3966_v16 = vld [vmem:[%s6610_s1 + $0x5c8] sm:$0xff] }
 0x21d   : > { %3931 = vmatmul.msk.f32.gmra.mxu0 %vm350_vm1, %v3898_v60  ;;  %v2909_v52 = vadd.f32 %v4342_v14, %v2908_v4  ;;  %v2802_v56 = vmul.f32 1.442695, %v2766_v36  ;;  %v6043_v60 = vpop.f32.mrf.mxu1  ;;  %v2287_v35 = vadd.f32 %v2201_v19, %v1979_v50  ;;  %v2929_v19 = vand.u32 2147483647, %v6009_v12  ;;  %v4029_v50 = vld [vmem:[%s6610_s1 + $0x6b8] sm:$0xff] }
 0x21e   : > { %v4344_v47 = vpop.eup %4343  ;;  %v1280_v46 = vpop.f32.mrf.mxu3 }
 0x21f   : > { %v4346_v42 = vpop.eup %4345  ;;  %v2913_v20 = vsel %vm2912_vm9, %v4342_v14, %v2909_v52  ;;  %v2921_v63 = vmul.f32 %v4344_v47, %v6009_v12  ;;  %v1364_v4 = vadd.f32 %v1280_v46, %v5306_v51  ;;  %4347 = vpow2.f32 %v2802_v56 }
 0x220   : > { %4061 = vmatmul.msk.f32.gmra.mxu2 %vm350_vm1, %v4028_v41  ;;  %v2918_v31 = vsel %vm2915_vm10, %v2917_v45, %v2913_v20  ;;  %v6045_v2 = vadd.f32 1.0, %v4346_v42  ;;  %v2931_v51 = vand.u32 2147483648, %v6009_v12  ;;  %3999 = vmatmul.msk.f32.gmra.mxu1 %vm350_vm1, %v3966_v16  ;;  %vm2926_vm11 = vweird.f32 %v4344_v47  ;;  %v2598_v45 = vpop.permute.xlu2 %2597 }
 0x221   : > { %3372 = vst.msk [vmem:[%s6019_s22 + $0x8] sm:$0xff] %vm3370_vm4, %v2918_v31  ;;  %v2922_v14 = vsub.f32 1.0, %v2921_v63  ;;  %v2511_v52 = vmul.f32 %v5552_v54, %v2287_v35  ;;  %v1672_v36 = vadd.f32 %v1588_v13, %v1364_v4  ;;  %vm2927_vm13 = vmor %vm2925_vm12, %vm2926_vm11  ;;  %vm2930_vm14 = vcmp.eq.f32.partialorder %v2929_v19, 8.507059e+37 }
 0x222   : > { %v1591_v48 = vpop.f32.mrf.mxu0  ;;  %4349 = vrcp.f32 %v6045_v2  ;;  %v2932_v54 = vor.u32 1.1754944e-38, %v2931_v51  ;;  %v3900_v51 = vld [vmem:[%s6610_s1 + $0x4c0] sm:$0xff]  ;;  %vm2940_vm0 = vweird.f32 %v6045_v2 }
 0x223   : > { %v2204_v8 = vpop.f32.mrf.mxu2  ;;  %v2923_v41 = vmul.f32 %v4344_v47, %v2922_v14  ;;  %3867 = vmatmul.msk.f32.gmra.mxu3 %vm350_vm1, %v3834_v9  ;;  %v2735_v42 = vadd.f32 %v2598_v45, %v2511_v52  ;;  %v1980_v20 = vadd.f32 %v5958_v23, %v1672_v36  ;;  %v3835_v23 = vld [vmem:[%s6610_s1 + $0x3c0] sm:$0xff] }
 0x225   : > { %3932 = vmatmul.msk.f32.gmra.mxu0 %vm350_vm1, %v3899_v1  ;;  %v2924_v46 = vadd.f32 %v4344_v47, %v2923_v41  ;;  %v4348_v63 = vpop.eup %4347  ;;  %v2767_v31 = vsub.f32 0.0, %v2735_v42  ;;  %v2288_v35 = vadd.f32 %v2204_v8, %v1980_v20  ;;  %v6073_v9 = vpop.f32.mrf.mxu1  ;;  %v3967_v8 = vld [vmem:[%s6610_s1 + $0x5d0] sm:$0xff]  ;;  %v4030_v42 = vld [vmem:[%s6610_s1 + $0x6c0] sm:$0xff] }
 0x226   : > { %v1283_v13 = vpop.f32.mrf.mxu3  ;;  %v6075_v1 = vadd.f32 1.0, %v4348_v63  ;;  %v2603_v41 = vpop.permute.xlu0 %2602 }
 0x227   : > { %v2928_v56 = vsel %vm2927_vm13, %v4344_v47, %v2924_v46  ;;  %v1365_v4 = vadd.f32 %v1283_v13, %v5338_v0  ;;  %v2804_v16 = vmul.f32 1.442695, %v2767_v31  ;;  %v2512_v19 = vmul.f32 %v5589_v25, %v2288_v35 }
 0x228   : > { %4062 = vmatmul.msk.f32.gmra.mxu2 %vm350_vm1, %v4029_v50  ;;  %v4350_v14 = vpop.eup %4349  ;;  %v2933_v12 = vsel %vm2930_vm14, %v2932_v54, %v2928_v56  ;;  %4351 = vrcp.f32 %v6075_v1  ;;  %4000 = vmatmul.msk.f32.gmra.mxu1 %vm350_vm1, %v3967_v8  ;;  %v2944_v25 = vand.u32 2147483647, %v6045_v2  ;;  %v2946_v46 = vand.u32 2147483648, %v6045_v2 }
 0x229   : > { %3373 = vst.msk [vmem:[%s6019_s22 + $0x10] sm:$0xff] %vm3370_vm4, %v2933_v12  ;;  %v2936_v47 = vmul.f32 %v4350_v14, %v6045_v2  ;;  %4353 = vpow2.f32 %v2804_v16  ;;  %v2736_v45 = vadd.f32 %v2603_v41, %v2512_v19  ;;  %v1673_v50 = vadd.f32 %v1591_v48, %v1365_v4 }
 0x22a   : > { %v1594_v0 = vpop.f32.mrf.mxu0  ;;  %vm2941_vm15 = vweird.f32 %v4350_v14  ;;  %vm2945_vm3 = vcmp.eq.f32.partialorder %v2944_v25, 8.507059e+37  ;;  %v2961_v25 = vand.u32 2147483648, %v6075_v1  ;;  %vm2955_vm6 = vweird.f32 %v6075_v1 }
 0x22b   : > { %v2207_v52 = vpop.f32.mrf.mxu2  ;;  %v2937_v36 = vsub.f32 1.0, %v2936_v47  ;;  %3868 = vmatmul.msk.f32.gmra.mxu3 %vm350_vm1, %v3835_v23  ;;  %v2768_v54 = vsub.f32 0.0, %v2736_v45  ;;  %v1981_v13 = vadd.f32 %v5982_v38, %v1673_v50  ;;  %vm2942_vm2 = vmor %vm2940_vm0, %vm2941_vm15  ;;  %v2947_v23 = vor.u32 1.1754944e-38, %v2946_v46  ;;  %v3836_v38 = vld [vmem:[%s6610_s1 + $0x3c8] sm:$0xff]  ;;  %v2608_v46 = vpop.permute.xlu1 %2607 }
 0x22c   : > { %v2959_v50 = vand.u32 2147483647, %v6075_v1 }
 0x22d   : > { %3933 = vmatmul.msk.f32.gmra.mxu0 %vm350_vm1, %v3900_v51  ;;  %v2938_v20 = vmul.f32 %v4350_v14, %v2937_v36  ;;  %v2806_v56 = vmul.f32 1.442695, %v2768_v54  ;;  %v2289_v31 = vadd.f32 %v2207_v52, %v1981_v13  ;;  %v6103_v4 = vpop.f32.mrf.mxu1  ;;  %v3968_v51 = vld [vmem:[%s6610_s1 + $0x5d8] sm:$0xff] }
 0x22e   : > { %v1286_v48 = vpop.f32.mrf.mxu3  ;;  %v4352_v12 = vpop.eup %4351  ;;  %vm2960_vm8 = vcmp.eq.f32.partialorder %v2959_v50, 8.507059e+37 }
 0x22f   : > { %v2939_v63 = vadd.f32 %v4350_v14, %v2938_v20  ;;  %v1366_v35 = vadd.f32 %v1286_v48, %v5368_v10  ;;  %v4354_v47 = vpop.eup %4353  ;;  %v2951_v16 = vmul.f32 %v4352_v12, %v6075_v1  ;;  %4355 = vpow2.f32 %v2806_v56  ;;  %v3901_v10 = vld [vmem:[%s6610_s1 + $0x4c8] sm:$0xff] }
 0x230   : > { %4063 = vmatmul.msk.f32.gmra.mxu2 %vm350_vm1, %v4030_v42  ;;  %v6115_v41 = vadd.f32 1.0, %v4354_v47  ;;  %v2513_v52 = vmul.f32 %v5617_v24, %v2289_v31  ;;  %4001 = vmatmul.msk.f32.gmra.mxu1 %vm350_vm1, %v3968_v51  ;;  %v4031_v24 = vld [vmem:[%s6610_s1 + $0x6c8] sm:$0xff]  ;;  %vm2956_vm5 = vweird.f32 %v4352_v12  ;;  %v3969_v51 = vld [vmem:[%s6610_s1 + $0x5e0] sm:$0xff] }
 0x231   : > { %v2943_v2 = vsel %vm2942_vm2, %v4350_v14, %v2939_v63  ;;  %v1674_v36 = vadd.f32 %v1594_v0, %v1366_v35  ;;  %v2952_v45 = vsub.f32 1.0, %v2951_v16  ;;  %vm2957_vm7 = vmor %vm2955_vm6, %vm2956_vm5 }
 0x232   : > { %v1597_v19 = vpop.f32.mrf.mxu0  ;;  %v2948_v8 = vsel %vm2945_vm3, %v2947_v23, %v2943_v2  ;;  %4357 = vrcp.f32 %v6115_v41  ;;  %v2737_v42 = vadd.f32 %v2608_v46, %v2513_v52  ;;  %v2962_v23 = vor.u32 1.1754944e-38, %v2961_v25 }
 0x233   : > { %v2210_v14 = vpop.f32.mrf.mxu2  ;;  %3374 = vst.msk [vmem:[%s6019_s22 + $0x18] sm:$0xff] %vm3370_vm4, %v2948_v8  ;;  %3869 = vmatmul.msk.f32.gmra.mxu3 %vm350_vm1, %v3836_v38  ;;  %v2953_v0 = vmul.f32 %v4352_v12, %v2952_v45  ;;  %v1982_v20 = vadd.f32 %v6013_v6, %v1674_v36  ;;  %v3837_v6 = vld [vmem:[%s6610_s1 + $0x3d0] sm:$0xff]  ;;  %v2976_v25 = vand.u32 2147483648, %v6115_v41  ;;  %vm2970_vm10 = vweird.f32 %v6115_v41 }
 0x234   : > { %v2769_v63 = vsub.f32 0.0, %v2737_v42  ;;  %v4032_v45 = vld [vmem:[%s6610_s1 + $0x6d0] sm:$0xff] }
 0x235   : > { %3934 = vmatmul.msk.f32.gmra.mxu0 %vm350_vm1, %v3901_v10  ;;  %v4356_v13 = vpop.eup %4355  ;;  %v2954_v48 = vadd.f32 %v4352_v12, %v2953_v0  ;;  %v2290_v56 = vadd.f32 %v2210_v14, %v1982_v20  ;;  %v6133_v35 = vpop.f32.mrf.mxu1  ;;  %v3902_v10 = vld [vmem:[%s6610_s1 + $0x4d0] sm:$0xff]  ;;  %v2974_v20 = vand.u32 2147483647, %v6115_v41 }
 0x236   : > { %v1289_v54 = vpop.f32.mrf.mxu3  ;;  %v6135_v38 = vadd.f32 1.0, %v4356_v13  ;;  %v2808_v47 = vmul.f32 1.442695, %v2769_v63 }
 0x237   : > { %v1367_v31 = vadd.f32 %v1289_v54, %v5401_v34  ;;  %v2958_v1 = vsel %vm2957_vm7, %v4352_v12, %v2954_v48  ;;  %v2514_v2 = vmul.f32 %v5600_v58, %v2290_v56  ;;  %v2613_v12 = vpop.permute.xlu2 %2612  ;;  %v3838_v56 = vld [vmem:[%s6610_s1 + $0x3d8] sm:$0xff]  ;;  %vm2975_vm12 = vcmp.eq.f32.partialorder %v2974_v20, 8.507059e+37  ;;  %v2623_v20 = vpop.permute.xlu1 %2622 }
 0x238   : > { %4064 = vmatmul.msk.f32.gmra.mxu2 %vm350_vm1, %v4031_v24  ;;  %v4358_v8 = vpop.eup %4357  ;;  %v2963_v52 = vsel %vm2960_vm8, %v2962_v23, %v2958_v1  ;;  %4359 = vrcp.f32 %v6135_v38  ;;  %4002 = vmatmul.msk.f32.gmra.mxu1 %vm350_vm1, %v3969_v51  ;;  %v2618_v1 = vpop.permute.xlu0 %2617  ;;  %vm2985_vm14 = vweird.f32 %v6135_v38 }
 0x239   : > { %v1675_v16 = vadd.f32 %v1597_v19, %v1367_v31  ;;  %3375 = vst.msk [vmem:[%s6019_s22 + $0x20] sm:$0xff] %vm3370_vm4, %v2963_v52  ;;  %v2966_v58 = vmul.f32 %v4358_v8, %v6115_v41  ;;  %4361 = vpow2.f32 %v2808_v47  ;;  %v2738_v19 = vadd.f32 %v2613_v12, %v2514_v2  ;;  %v3903_v2 = vld [vmem:[%s6610_s1 + $0x4d8] sm:$0xff] }
 0x23a   : > { %v1600_v34 = vpop.f32.mrf.mxu0  ;;  %vm2971_vm9 = vweird.f32 %v4358_v8  ;;  %v2989_v12 = vand.u32 2147483647, %v6135_v38 }
 0x23b   : > { %v2213_v36 = vpop.f32.mrf.mxu2  ;;  %3870 = vmatmul.msk.f32.gmra.mxu3 %vm350_vm1, %v3837_v6  ;;  %v1983_v14 = vadd.f32 %v6043_v60, %v1675_v16  ;;  %v2967_v50 = vsub.f32 1.0, %v2966_v58  ;;  %v2770_v46 = vsub.f32 0.0, %v2738_v19  ;;  %vm2972_vm11 = vmor %vm2970_vm10, %vm2971_vm9  ;;  %v2977_v16 = vor.u32 1.1754944e-38, %v2976_v25 }
 0x23c   : > { %v2991_v19 = vand.u32 2147483648, %v6135_v38  ;;  %vm2990_vm0 = vcmp.eq.f32.partialorder %v2989_v12, 8.507059e+37 }
 0x23d   : > { %3935 = vmatmul.msk.f32.gmra.mxu0 %vm350_vm1, %v3902_v10  ;;  %v2291_v24 = vadd.f32 %v2213_v36, %v1983_v14  ;;  %v2968_v42 = vmul.f32 %v4358_v8, %v2967_v50  ;;  %v6162_v60 = vpop.f32.mrf.mxu1  ;;  %v2810_v48 = vmul.f32 1.442695, %v2770_v46  ;;  %v4033_v14 = vld [vmem:[%s6610_s1 + $0x6d8] sm:$0xff] }
 0x23e   : > { %v1292_v0 = vpop.f32.mrf.mxu3  ;;  %v4360_v13 = vpop.eup %4359 }
 0x23f   : > { %v1368_v54 = vadd.f32 %v1292_v0, %v5434_v33  ;;  %v2515_v63 = vmul.f32 %v5643_v57, %v2291_v24  ;;  %v4362_v31 = vpop.eup %4361  ;;  %v2969_v23 = vadd.f32 %v4358_v8, %v2968_v42  ;;  %v2981_v6 = vmul.f32 %v4360_v13, %v6135_v38  ;;  %v3970_v57 = vld [vmem:[%s6610_s1 + $0x5e8] sm:$0xff] }
 0x240   : > { %4065 = vmatmul.msk.f32.gmra.mxu2 %vm350_vm1, %v4032_v45  ;;  %v6177_v10 = vadd.f32 1.0, %v4362_v31  ;;  %4363 = vpow2.f32 %v2810_v48  ;;  %4003 = vmatmul.msk.f32.gmra.mxu1 %vm350_vm1, %v3970_v57  ;;  %vm2986_vm13 = vweird.f32 %v4360_v13 }
 0x241   : > { %v1676_v33 = vadd.f32 %v1600_v34, %v1368_v54  ;;  %v2739_v41 = vadd.f32 %v2618_v1, %v2515_v63  ;;  %v2973_v34 = vsel %vm2972_vm11, %v4358_v8, %v2969_v23  ;;  %v2982_v52 = vsub.f32 1.0, %v2981_v6  ;;  %vm2987_vm15 = vmor %vm2985_vm14, %vm2986_vm13  ;;  %v3839_v63 = vld [vmem:[%s6610_s1 + $0x3e0] sm:$0xff]  ;;  %v3971_v6 = vld [vmem:[%s6610_s1 + $0x5f0] sm:$0xff] }
 0x242   : > { %v1603_v47 = vpop.f32.mrf.mxu0  ;;  %v2978_v58 = vsel %vm2975_vm12, %v2977_v16, %v2973_v34  ;;  %4365 = vrcp.f32 %v6177_v10  ;;  %v2992_v54 = vor.u32 1.1754944e-38, %v2991_v19  ;;  %v3904_v23 = vld [vmem:[%s6610_s1 + $0x4e0] sm:$0xff]  ;;  %v3004_v19 = vand.u32 2147483647, %v6177_v10 }
 0x243   : > { %v2216_v51 = vpop.f32.mrf.mxu2  ;;  %v1984_v36 = vadd.f32 %v6073_v9, %v1676_v33  ;;  %3871 = vmatmul.msk.f32.gmra.mxu3 %vm350_vm1, %v3838_v56  ;;  %3376 = vst.msk [vmem:[%s6019_s22 + $0x28] sm:$0xff] %vm3370_vm4, %v2978_v58  ;;  %v2983_v8 = vmul.f32 %v4360_v13, %v2982_v52  ;;  %v2771_v9 = vsub.f32 0.0, %v2739_v41  ;;  %v4034_v41 = vld [vmem:[%s6610_s1 + $0x6e0] sm:$0xff]  ;;  %vm3000_vm3 = vweird.f32 %v6177_v10 }
 0x244   : > { %vm3005_vm6 = vcmp.eq.f32.partialorder %v3004_v19, 8.507059e+37  ;;  %v3906_v19 = vld [vmem:[%s6610_s1 + $0x4f0] sm:$0xff] }
 0x245   : > { %3936 = vmatmul.msk.f32.gmra.mxu0 %vm350_vm1, %v3903_v2  ;;  %v2292_v45 = vadd.f32 %v2216_v51, %v1984_v36  ;;  %v2984_v25 = vadd.f32 %v4360_v13, %v2983_v8  ;;  %v2812_v46 = vmul.f32 1.442695, %v2771_v9  ;;  %v6194_v0 = vpop.f32.mrf.mxu1  ;;  %v3006_v51 = vand.u32 2147483648, %v6177_v10 }
 0x246   : > { %v1295_v50 = vpop.f32.mrf.mxu3  ;;  %v4364_v42 = vpop.eup %4363 }
 0x247   : > { %v2516_v24 = vmul.f32 %v5665_v49, %v2292_v45  ;;  %v1369_v48 = vadd.f32 %v1295_v50, %v5467_v11  ;;  %v2988_v38 = vsel %vm2987_vm15, %v4360_v13, %v2984_v25  ;;  %v6200_v56 = vadd.f32 1.0, %v4364_v42  ;;  %v3840_v45 = vld [vmem:[%s6610_s1 + $0x3e8] sm:$0xff]  ;;  %v3972_v42 = vld [vmem:[%s6610_s1 + $0x5f8] sm:$0xff] }
 0x248   : > { %4066 = vmatmul.msk.f32.gmra.mxu2 %vm350_vm1, %v4033_v14  ;;  %4367 = vpow2.f32 %v2812_v46  ;;  %v4366_v1 = vpop.eup %4365  ;;  %v2993_v11 = vsel %vm2990_vm0, %v2992_v54, %v2988_v38  ;;  %4004 = vmatmul.msk.f32.gmra.mxu1 %vm350_vm1, %v3971_v6  ;;  %v2628_v54 = vpop.permute.xlu2 %2627 }
 0x249   : > { %v2740_v49 = vadd.f32 %v2623_v20, %v2516_v24  ;;  %v1677_v33 = vadd.f32 %v1603_v47, %v1369_v48  ;;  %3377 = vst.msk [vmem:[%s6019_s22 + $0x30] sm:$0xff] %vm3370_vm4, %v2993_v11  ;;  %v2996_v13 = vmul.f32 %v4366_v1, %v6177_v10  ;;  %4369 = vrcp.f32 %v6200_v56 }
 0x24a   : > { %v1606_v31 = vpop.f32.mrf.mxu0  ;;  %vm3001_vm2 = vweird.f32 %v4366_v1  ;;  %v3021_v6 = vand.u32 2147483648, %v6200_v56  ;;  %vm3015_vm8 = vweird.f32 %v6200_v56 }
 0x24b   : > { %v2219_v2 = vpop.f32.mrf.mxu2  ;;  %3872 = vmatmul.msk.f32.gmra.mxu3 %vm350_vm1, %v3839_v63  ;;  %v2772_v57 = vsub.f32 0.0, %v2740_v49  ;;  %v1985_v16 = vadd.f32 %v6103_v4, %v1677_v33  ;;  %v2997_v47 = vsub.f32 1.0, %v2996_v13  ;;  %vm3002_vm5 = vmor %vm3000_vm3, %vm3001_vm2 }
 0x24d   : > { %3937 = vmatmul.msk.f32.gmra.mxu0 %vm350_vm1, %v3904_v23  ;;  %v2814_v34 = vmul.f32 1.442695, %v2772_v57  ;;  %v2293_v52 = vadd.f32 %v2219_v2, %v1985_v16  ;;  %v2998_v12 = vmul.f32 %v4366_v1, %v2997_v47  ;;  %v6223_v4 = vpop.f32.mrf.mxu1  ;;  %v4035_v23 = vld [vmem:[%s6610_s1 + $0x6e8] sm:$0xff]  ;;  %v3019_v2 = vand.u32 2147483647, %v6200_v56 }
 0x24e   : > { %v1298_v36 = vpop.f32.mrf.mxu3  ;;  %v4368_v58 = vpop.eup %4367 }
 0x24f   : > { %v1370_v14 = vadd.f32 %v1298_v36, %v5504_v22  ;;  %v6225_v8 = vadd.f32 1.0, %v4368_v58  ;;  %4371 = vpow2.f32 %v2814_v34  ;;  %v2517_v9 = vmul.f32 %v5648_v39, %v2293_v52  ;;  %v4370_v50 = vpop.eup %4369  ;;  %v3905_v22 = vld [vmem:[%s6610_s1 + $0x4e8] sm:$0xff]  ;;  %v3841_v36 = vld [vmem:[%s6610_s1 + $0x3f0] sm:$0xff] }
 0x250   : > { %4067 = vmatmul.msk.f32.gmra.mxu2 %vm350_vm1, %v4034_v41  ;;  %v2999_v25 = vadd.f32 %v4366_v1, %v2998_v12  ;;  %v3007_v39 = vor.u32 1.1754944e-38, %v3006_v51  ;;  %v3011_v20 = vmul.f32 %v4370_v50, %v6200_v56  ;;  %4005 = vmatmul.msk.f32.gmra.mxu1 %vm350_vm1, %v3972_v42  ;;  %vm3016_vm7 = vweird.f32 %v4370_v50  ;;  %v2633_v56 = vpop.permute.xlu0 %2632 }
 0x251   : > { %v1678_v46 = vadd.f32 %v1606_v31, %v1370_v14  ;;  %4373 = vrcp.f32 %v6225_v8  ;;  %v2741_v63 = vadd.f32 %v2628_v54, %v2517_v9  ;;  %vm3017_vm9 = vmor %vm3015_vm8, %vm3016_vm7  ;;  %v3022_v58 = vor.u32 1.1754944e-38, %v3021_v6 }
 0x252   : > { %v1609_v24 = vpop.f32.mrf.mxu0  ;;  %v3003_v48 = vsel %vm3002_vm5, %v4366_v1, %v2999_v25  ;;  %v3012_v49 = vsub.f32 1.0, %v3011_v20  ;;  %vm3020_vm10 = vcmp.eq.f32.partialorder %v3019_v2, 8.507059e+37  ;;  %v3036_v42 = vand.u32 2147483648, %v6225_v8  ;;  %v3907_v2 = vld [vmem:[%s6610_s1 + $0x4f8] sm:$0xff] }
 0x253   : > { %v2222_v10 = vpop.f32.mrf.mxu2  ;;  %3873 = vmatmul.msk.f32.gmra.mxu3 %vm350_vm1, %v3840_v45  ;;  %v3008_v38 = vsel %vm3005_vm6, %v3007_v39, %v3003_v48  ;;  %v1986_v31 = vadd.f32 %v6133_v35, %v1678_v46  ;;  %v2773_v11 = vsub.f32 0.0, %v2741_v63  ;;  %vm3030_vm12 = vweird.f32 %v6225_v8 }
 0x254   : > { %3378 = vst.msk [vmem:[%s6019_s22 + $0x38] sm:$0xff] %vm3370_vm4, %v3008_v38  ;;  %v3013_v33 = vmul.f32 %v4370_v50, %v3012_v49  ;;  %v3037_v6 = vor.u32 1.1754944e-38, %v3036_v42 }
 0x255   : > { %3938 = vmatmul.msk.f32.gmra.mxu0 %vm350_vm1, %v3905_v22  ;;  %v4372_v1 = vpop.eup %4371  ;;  %v2294_v13 = vadd.f32 %v2222_v10, %v1986_v31  ;;  %v2816_v35 = vmul.f32 1.442695, %v2773_v11  ;;  %v6256_v47 = vpop.f32.mrf.mxu1  ;;  %v3034_v22 = vand.u32 2147483647, %v6225_v8 }
 0x256   : > { %v1301_v57 = vpop.f32.mrf.mxu3  ;;  %v6252_v16 = vadd.f32 1.0, %v4372_v1  ;;  %v3014_v34 = vadd.f32 %v4370_v50, %v3013_v33 }
 0x257   : > { %v1371_v41 = vadd.f32 %v1301_v57, %v5539_v18  ;;  %v4374_v51 = vpop.eup %4373  ;;  %v2518_v52 = vmul.f32 %v5688_v37, %v2294_v13  ;;  %vm3035_vm14 = vcmp.eq.f32.partialorder %v3034_v22, 8.507059e+37 }
 0x258   : > { %4068 = vmatmul.msk.f32.gmra.mxu2 %vm350_vm1, %v4035_v23  ;;  %v3026_v12 = vmul.f32 %v4374_v51, %v6225_v8  ;;  %4375 = vrcp.f32 %v6252_v16  ;;  %v3018_v14 = vsel %vm3017_vm9, %v4370_v50, %v3014_v34  ;;  %v4036_v50 = vld [vmem:[%s6610_s1 + $0x6f0] sm:$0xff]  ;;  %vm3031_vm11 = vweird.f32 %v4374_v51  ;;  %v3842_v8 = vld [vmem:[%s6610_s1 + $0x3f8] sm:$0xff]  ;;  %v2638_v34 = vpop.permute.xlu1 %2637 }
 0x259   : > { %4377 = vpow2.f32 %v2816_v35  ;;  %v3023_v9 = vsel %vm3020_vm10, %v3022_v58, %v3018_v14  ;;  %v2742_v25 = vadd.f32 %v2633_v56, %v2518_v52  ;;  %v1679_v46 = vadd.f32 %v1609_v24, %v1371_v41  ;;  %vm3032_vm13 = vmor %vm3030_vm12, %vm3031_vm11 }
 0x25a   : > { %v1612_v18 = vpop.f32.mrf.mxu0  ;;  %v3027_v45 = vsub.f32 1.0, %v3026_v12  ;;  %3379 = vst.msk [vmem:[%s6019_s22 + $0x40] sm:$0xff] %vm3370_vm4, %v3023_v9  ;;  %v3049_v52 = vand.u32 2147483647, %v6252_v16  ;;  %v4037_v12 = vld [vmem:[%s6610_s1 + $0x6f8] sm:$0xff]  ;;  %vm3045_vm0 = vweird.f32 %v6252_v16 }
 0x25b   : > { %v2225_v37 = vpop.f32.mrf.mxu2  ;;  %3874 = vmatmul.msk.f32.gmra.mxu3 %vm350_vm1, %v3841_v36  ;;  %v2774_v20 = vsub.f32 0.0, %v2742_v25  ;;  %v1987_v54 = vadd.f32 %v6162_v60, %v1679_v46 }
 0x25c   : > { %v3028_v39 = vmul.f32 %v4374_v51, %v3027_v45  ;;  %vm3050_vm3 = vcmp.eq.f32.partialorder %v3049_v52, 8.507059e+37 }
 0x25d   : > { %3939 = vmatmul.msk.f32.gmra.mxu0 %vm350_vm1, %v3906_v19  ;;  %v2818_v63 = vmul.f32 1.442695, %v2774_v20  ;;  %v2295_v38 = vadd.f32 %v2225_v37, %v1987_v54  ;;  %v6281_v31 = vpop.f32.mrf.mxu1  ;;  %v2643_v54 = vpop.permute.xlu2 %2642 }
 0x25e   : > { %v1304_v24 = vpop.f32.mrf.mxu3  ;;  %v4376_v10 = vpop.eup %4375  ;;  %v3029_v48 = vadd.f32 %v4374_v51, %v3028_v39 }
 0x25f   : > { %v1372_v49 = vadd.f32 %v1304_v24, %v5578_v44  ;;  %v4378_v23 = vpop.eup %4377  ;;  %v3041_v60 = vmul.f32 %v4376_v10, %v6252_v16  ;;  %4379 = vpow2.f32 %v2818_v63  ;;  %v2519_v44 = vmul.f32 %v5716_v15, %v2295_v38 }
 0x260   : > { %4069 = vmatmul.msk.f32.gmra.mxu2 %vm350_vm1, %v4036_v50  ;;  %v3033_v11 = vsel %vm3032_vm13, %v4374_v51, %v3029_v48  ;;  %v6287_v1 = vadd.f32 1.0, %v4378_v23  ;;  %v3051_v51 = vand.u32 2147483648, %v6252_v16  ;;  %vm3046_vm15 = vweird.f32 %v4376_v10 }
 0x261   : > { %v3038_v13 = vsel %vm3035_vm14, %v3037_v6, %v3033_v11  ;;  %v3042_v57 = vsub.f32 1.0, %v3041_v60  ;;  %v1680_v35 = vadd.f32 %v1612_v18, %v1372_v49  ;;  %v2743_v36 = vadd.f32 %v2638_v34, %v2519_v44  ;;  %vm3047_vm2 = vmor %vm3045_vm0, %vm3046_vm15 }
 0x262   : > { %v1615_v33 = vpop.f32.mrf.mxu0  ;;  %3380 = vst.msk [vmem:[%s6019_s22 + $0x48] sm:$0xff] %vm3370_vm4, %v3038_v13  ;;  %4381 = vrcp.f32 %v6287_v1  ;;  %v3052_v9 = vor.u32 1.1754944e-38, %v3051_v51  ;;  %v3064_v23 = vand.u32 2147483647, %v6287_v1  ;;  %vm3060_vm5 = vweird.f32 %v6287_v1 }
 0x263   : > { %v2228_v41 = vpop.f32.mrf.mxu2  ;;  %3875 = vmatmul.msk.f32.gmra.mxu3 %vm350_vm1, %v3842_v8  ;;  %v3043_v15 = vmul.f32 %v4376_v10, %v3042_v57  ;;  %v1988_v58 = vadd.f32 %v6194_v0, %v1680_v35  ;;  %v2775_v19 = vsub.f32 0.0, %v2743_v36 }
 0x264   : > { %vm3065_vm7 = vcmp.eq.f32.partialorder %v3064_v23, 8.507059e+37 }
 0x265   : > { %3940 = vmatmul.msk.f32.gmra.mxu0 %vm350_vm1, %v3907_v2  ;;  %v3044_v18 = vadd.f32 %v4376_v10, %v3043_v15  ;;  %v2296_v14 = vadd.f32 %v2228_v41, %v1988_v58  ;;  %v4380_v37 = vpop.eup %4379  ;;  %v2820_v46 = vmul.f32 1.442695, %v2775_v19  ;;  %v6310_v42 = vpop.f32.mrf.mxu1 }
 0x266   : > { %v1307_v56 = vpop.f32.mrf.mxu3  ;;  %v6307_v25 = vadd.f32 1.0, %v4380_v37 }
 0x267   : > { %v1373_v45 = vadd.f32 %v1307_v56, %v5615_v59  ;;  %v3048_v0 = vsel %vm3047_vm2, %v4376_v10, %v3044_v18  ;;  %v2520_v22 = vmul.f32 %v5690_v29, %v2296_v14  ;;  %v3066_v29 = vand.u32 2147483648, %v6287_v1 }
 0x268   : > { %4070 = vmatmul.msk.f32.gmra.mxu2 %vm350_vm1, %v4037_v12  ;;  %v4382_v16 = vpop.eup %4381  ;;  %v3053_v50 = vsel %vm3050_vm3, %v3052_v9, %v3048_v0  ;;  %4383 = vrcp.f32 %v6307_v25  ;;  %v3079_v12 = vand.u32 2147483647, %v6307_v25  ;;  %v3081_v18 = vand.u32 2147483648, %v6307_v25 }
 0x269   : > { %v1681_v39 = vadd.f32 %v1615_v33, %v1373_v45  ;;  %3381 = vst.msk [vmem:[%s6019_s22 + $0x50] sm:$0xff] %vm3370_vm4, %v3053_v50  ;;  %v3056_v24 = vmul.f32 %v4382_v16, %v6287_v1  ;;  %4385 = vpow2.f32 %v2820_v46  ;;  %v2744_v10 = vadd.f32 %v2643_v54, %v2520_v22  ;;  %v2653_v22 = vpop.permute.xlu1 %2652 }
 0x26a   : > { %v1618_v20 = vpop.f32.mrf.mxu0  ;;  %vm3061_vm1 = vweird.f32 %v4382_v16  ;;  %v3067_v57 = vor.u32 1.1754944e-38, %v3066_v29  ;;  %vm3075_vm9 = vweird.f32 %v6307_v25  ;;  %vm3080_vm11 = vcmp.eq.f32.partialorder %v3079_v12, 8.507059e+37 }
 0x26b   : > { %v2231_v59 = vpop.f32.mrf.mxu2  ;;  %v3057_v48 = vsub.f32 1.0, %v3056_v24  ;;  %v1989_v63 = vadd.f32 %v6223_v4, %v1681_v39  ;;  %v2776_v38 = vsub.f32 0.0, %v2744_v10  ;;  %v2648_v4 = vpop.permute.xlu0 %2647  ;;  %vm3062_vm6 = vmor %vm3060_vm5, %vm3061_vm1 }
 0x26d   : > { %v3058_v49 = vmul.f32 %v4382_v16, %v3057_v48  ;;  %v2297_v6 = vadd.f32 %v2231_v59, %v1989_v63  ;;  %v2822_v8 = vmul.f32 1.442695, %v2776_v38  ;;  %v6325_v36 = vpop.f32.mrf.mxu1 }
 0x26e   : > { %v1310_v60 = vpop.f32.mrf.mxu3  ;;  %v4384_v44 = vpop.eup %4383 }
 0x26f   : > { %v1374_v11 = vadd.f32 %v1310_v60, %v5654_v5  ;;  %v3059_v33 = vadd.f32 %v4382_v16, %v3058_v49  ;;  %v2521_v2 = vmul.f32 %v5727_v26, %v2297_v6  ;;  %v4386_v13 = vpop.eup %4385  ;;  %v3071_v35 = vmul.f32 %v4384_v44, %v6307_v25 }
 0x270   : > { %4387 = vpow2.f32 %v2822_v8  ;;  %v6323_v51 = vadd.f32 1.0, %v4386_v13  ;;  %vm3076_vm8 = vweird.f32 %v4384_v44 }
 0x271   : > { %v1682_v41 = vadd.f32 %v1618_v20, %v1374_v11  ;;  %v3063_v52 = vsel %vm3062_vm6, %v4382_v16, %v3059_v33  ;;  %v2745_v5 = vadd.f32 %v2648_v4, %v2521_v2  ;;  %v3072_v26 = vsub.f32 1.0, %v3071_v35  ;;  %vm3077_vm10 = vmor %vm3075_vm9, %vm3076_vm8 }
 0x272   : > { %v1621_v34 = vpop.f32.mrf.mxu0  ;;  %v3068_v1 = vsel %vm3065_vm7, %v3067_v57, %v3063_v52  ;;  %4389 = vrcp.f32 %v6323_v51  ;;  %v3082_v16 = vor.u32 1.1754944e-38, %v3081_v18  ;;  %v3094_v49 = vand.u32 2147483647, %v6323_v51 }
 0x273   : > { %v2234_v15 = vpop.f32.mrf.mxu2  ;;  %v1990_v58 = vadd.f32 %v6256_v47, %v1682_v41  ;;  %3382 = vst.msk [vmem:[%s6019_s22 + $0x58] sm:$0xff] %vm3370_vm4, %v3068_v1  ;;  %v3073_v19 = vmul.f32 %v4384_v44, %v3072_v26  ;;  %v2777_v14 = vsub.f32 0.0, %v2745_v5  ;;  %v3096_v23 = vand.u32 2147483648, %v6323_v51  ;;  %v2658_v41 = vpop.permute.xlu2 %2657 }
 0x274   : > { %vm3090_vm13 = vweird.f32 %v6323_v51  ;;  %vm3095_vm15 = vcmp.eq.f32.partialorder %v3094_v49, 8.507059e+37 }
 0x275   : > { %v2298_v56 = vadd.f32 %v2234_v15, %v1990_v58  ;;  %v3074_v45 = vadd.f32 %v4384_v44, %v3073_v19  ;;  %v2824_v0 = vmul.f32 1.442695, %v2777_v14  ;;  %v6343_v63 = vpop.f32.mrf.mxu1 }
 0x276   : > { %v1313_v37 = vpop.f32.mrf.mxu3  ;;  %v4388_v9 = vpop.eup %4387 }
 0x277   : > { %v2522_v47 = vmul.f32 %v5755_v53, %v2298_v56  ;;  %v1375_v46 = vadd.f32 %v1313_v37, %v5693_v40  ;;  %v6336_v50 = vadd.f32 1.0, %v4388_v9  ;;  %v3078_v39 = vsel %vm3077_vm10, %v4384_v44, %v3074_v45 }
 0x278   : > { %4391 = vpow2.f32 %v2824_v0  ;;  %v4390_v24 = vpop.eup %4389  ;;  %v3083_v59 = vsel %vm3080_vm11, %v3082_v16, %v3078_v39 }
 0x279   : > { %v2746_v20 = vadd.f32 %v2653_v22, %v2522_v47  ;;  %v1683_v54 = vadd.f32 %v1621_v34, %v1375_v46  ;;  %4393 = vrcp.f32 %v6336_v50  ;;  %3383 = vst.msk [vmem:[%s6019_s22 + $0x60] sm:$0xff] %vm3370_vm4, %v3083_v59  ;;  %v3086_v40 = vmul.f32 %v4390_v24, %v6323_v51  ;;  %v2663_v22 = vpop.permute.xlu0 %2662 }
 0x27a   : > { %v1624_v25 = vpop.f32.mrf.mxu0  ;;  %vm3091_vm12 = vweird.f32 %v4390_v24  ;;  %v3097_v34 = vor.u32 1.1754944e-38, %v3096_v23  ;;  %v3109_v51 = vand.u32 2147483647, %v6336_v50  ;;  %v3111_v26 = vand.u32 2147483648, %v6336_v50 }
 0x27b   : > { %v2237_v10 = vpop.f32.mrf.mxu2  ;;  %v2778_v53 = vsub.f32 0.0, %v2746_v20  ;;  %v1991_v48 = vadd.f32 %v6281_v31, %v1683_v54  ;;  %v3087_v29 = vsub.f32 1.0, %v3086_v40  ;;  %vm3092_vm14 = vmor %vm3090_vm13, %vm3091_vm12  ;;  %vm3105_vm2 = vweird.f32 %v6336_v50 }
 0x27c   : > { %v3112_v46 = vor.u32 1.1754944e-38, %v3111_v26  ;;  %vm3110_vm1 = vcmp.eq.f32.partialorder %v3109_v51, 8.507059e+37 }
 0x27d   : > { %v2826_v38 = vmul.f32 1.442695, %v2778_v53  ;;  %v2299_v6 = vadd.f32 %v2237_v10, %v1991_v48  ;;  %v3088_v11 = vmul.f32 %v4390_v24, %v3087_v29  ;;  %v6362_v37 = vpop.f32.mrf.mxu1 }
 0x27e   : > { %v1316_v60 = vpop.f32.mrf.mxu3  ;;  %v4392_v8 = vpop.eup %4391 }
 0x27f   : > { %4395 = vpow2.f32 %v2826_v38  ;;  %v1376_v44 = vadd.f32 %v1316_v60, %v5725_v43  ;;  %v4394_v33 = vpop.eup %4393  ;;  %v6348_v2 = vadd.f32 1.0, %v4392_v8  ;;  %v2523_v31 = vmul.f32 %v5738_v30, %v2299_v6 }
 0x280   : > { %v3089_v13 = vadd.f32 %v4390_v24, %v3088_v11  ;;  %v3101_v4 = vmul.f32 %v4394_v33, %v6336_v50  ;;  %vm3106_vm0 = vweird.f32 %v4394_v33 }
 0x281   : > { %v1684_v57 = vadd.f32 %v1624_v25, %v1376_v44  ;;  %4397 = vrcp.f32 %v6348_v2  ;;  %v2747_v15 = vadd.f32 %v2658_v41, %v2523_v31  ;;  %vm3107_vm3 = vmor %vm3105_vm2, %vm3106_vm0  ;;  %v3124_v40 = vand.u32 2147483647, %v6348_v2 }
 0x282   : > { %v1627_v35 = vpop.f32.mrf.mxu0  ;;  %v3093_v52 = vsel %vm3092_vm14, %v4390_v24, %v3089_v13  ;;  %v3102_v5 = vsub.f32 1.0, %v3101_v4  ;;  %vm3120_vm6 = vweird.f32 %v6348_v2 }
 0x283   : > { %v2240_v43 = vpop.f32.mrf.mxu2  ;;  %v1992_v30 = vadd.f32 %v6310_v42, %v1684_v57  ;;  %v3098_v1 = vsel %vm3095_vm15, %v3097_v34, %v3093_v52  ;;  %v2779_v18 = vsub.f32 0.0, %v2747_v15  ;;  %vm3125_vm8 = vcmp.eq.f32.partialorder %v3124_v40, 8.507059e+37 }
 0x284   : > { %3384 = vst.msk [vmem:[%s6019_s22 + $0x68] sm:$0xff] %vm3370_vm4, %v3098_v1  ;;  %v3103_v12 = vmul.f32 %v4394_v33, %v3102_v5 }
 0x285   : > { %v4396_v58 = vpop.eup %4395  ;;  %v2300_v19 = vadd.f32 %v2240_v43, %v1992_v30  ;;  %v2828_v9 = vmul.f32 1.442695, %v2779_v18 }
 0x286   : > { %v6360_v14 = vadd.f32 1.0, %v4396_v58  ;;  %v1319_v56 = vpop.f32.mrf.mxu3  ;;  %v3104_v42 = vadd.f32 %v4394_v33, %v3103_v12 }
 0x287   : > { %v2524_v45 = vmul.f32 %v5769_v21, %v2300_v19  ;;  %v1377_v0 = vadd.f32 %v1319_v56, %v5758_v61  ;;  %v4398_v47 = vpop.eup %4397  ;;  %v3126_v61 = vand.u32 2147483648, %v6348_v2 }
 0x288   : > { %4399 = vrcp.f32 %v6360_v14  ;;  %v3108_v16 = vsel %vm3107_vm3, %v4394_v33, %v3104_v42  ;;  %v3116_v50 = vmul.f32 %v4398_v47, %v6348_v2  ;;  %vm3121_vm5 = vweird.f32 %v4398_v47  ;;  %v6378_v33 = vpop.f32.mrf.mxu1  ;;  %v2668_v2 = vpop.permute.xlu1 %2667 }
 0x289   : > { %4401 = vpow2.f32 %v2828_v9  ;;  %v3113_v20 = vsel %vm3110_vm1, %v3112_v46, %v3108_v16  ;;  %v2748_v54 = vadd.f32 %v2663_v22, %v2524_v45  ;;  %v1685_v24 = vadd.f32 %v1627_v35, %v1377_v0  ;;  %vm3122_vm7 = vmor %vm3120_vm6, %vm3121_vm5 }
 0x28a   : > { %v1630_v39 = vpop.f32.mrf.mxu0  ;;  %3385 = vst.msk [vmem:[%s6019_s22 + $0x70] sm:$0xff] %vm3370_vm4, %v3113_v20  ;;  %v3117_v21 = vsub.f32 1.0, %v3116_v50  ;;  %v3127_v8 = vor.u32 1.1754944e-38, %v3126_v61  ;;  %v3139_v35 = vand.u32 2147483647, %v6360_v14  ;;  %v3141_v41 = vand.u32 2147483648, %v6360_v14 }
 0x28b   : > { %v2243_v25 = vpop.f32.mrf.mxu2  ;;  %v2780_v59 = vsub.f32 0.0, %v2748_v54  ;;  %v1993_v53 = vadd.f32 %v6325_v36, %v1685_v24  ;;  %vm3135_vm10 = vweird.f32 %v6360_v14 }
 0x28c   : > { %v3118_v10 = vmul.f32 %v4398_v47, %v3117_v21  ;;  %vm3140_vm12 = vcmp.eq.f32.partialorder %v3139_v35, 8.507059e+37  ;;  %v3142_v1 = vor.u32 1.1754944e-38, %v3141_v41 }
 0x28d   : > { %v2830_v29 = vmul.f32 1.442695, %v2780_v59  ;;  %v2301_v60 = vadd.f32 %v2243_v25, %v1993_v53 }
 0x28e   : > { %v4400_v48 = vpop.eup %4399  ;;  %v1322_v38 = vpop.f32.mrf.mxu3  ;;  %v3119_v23 = vadd.f32 %v4398_v47, %v3118_v10 }
 0x28f   : > { %v4402_v49 = vpop.eup %4401  ;;  %v3131_v6 = vmul.f32 %v4400_v48, %v6360_v14  ;;  %4403 = vpow2.f32 %v2830_v29  ;;  %v1378_v44 = vadd.f32 %v1322_v38, %v5789_v55  ;;  %v2525_v13 = vmul.f32 %v5791_v3, %v2301_v60 }
 0x290   : > { %v6375_v11 = vadd.f32 1.0, %v4402_v49  ;;  %v3123_v36 = vsel %vm3122_vm7, %v4398_v47, %v3119_v23  ;;  %vm3136_vm9 = vweird.f32 %v4400_v48  ;;  %v6396_v0 = vpop.f32.mrf.mxu1  ;;  %v2673_v47 = vpop.permute.xlu2 %2672 }
 0x291   : > { %v3132_v31 = vsub.f32 1.0, %v3131_v6  ;;  %v3128_v57 = vsel %vm3125_vm8, %v3127_v8, %v3123_v36  ;;  %v2749_v43 = vadd.f32 %v2668_v2, %v2525_v13  ;;  %v1686_v52 = vadd.f32 %v1630_v39, %v1378_v44  ;;  %vm3137_vm11 = vmor %vm3135_vm10, %vm3136_vm9 }
 0x292   : > { %v1633_v4 = vpop.f32.mrf.mxu0  ;;  %4405 = vrcp.f32 %v6375_v11  ;;  %3386 = vst.msk [vmem:[%s6019_s22 + $0x78] sm:$0xff] %vm3370_vm4, %v3128_v57  ;;  %v3154_v16 = vand.u32 2147483647, %v6375_v11  ;;  %vm3150_vm14 = vweird.f32 %v6375_v11 }
 0x293   : > { %v2246_v34 = vpop.f32.mrf.mxu2  ;;  %v3133_v55 = vmul.f32 %v4400_v48, %v3132_v31  ;;  %v2781_v3 = vsub.f32 0.0, %v2749_v43  ;;  %v1994_v15 = vadd.f32 %v6343_v63, %v1686_v52  ;;  %v6632_v52 = vld [vmem:[#allocation10_spill] sm:$0xff] }
 0x294   : > { %vm3155_vm0 = vcmp.eq.f32.partialorder %v3154_v16, 8.507059e+37 }
 0x295   : > { %v3134_v5 = vadd.f32 %v4400_v48, %v3133_v55  ;;  %v4404_v30 = vpop.eup %4403  ;;  %v2832_v12 = vmul.f32 1.442695, %v2781_v3  ;;  %v2302_v18 = vadd.f32 %v2246_v34, %v1994_v15 }
 0x296   : > { %v1325_v51 = vpop.f32.mrf.mxu3  ;;  %v6388_v58 = vadd.f32 1.0, %v4404_v30 }
 0x297   : > { %v3138_v26 = vsel %vm3137_vm11, %v4400_v48, %v3134_v5  ;;  %v1379_v42 = vadd.f32 %v1325_v51, %v5822_v7  ;;  %v2526_v9 = vmul.f32 %v5774_v27, %v2302_v18  ;;  %v3156_v7 = vand.u32 2147483648, %v6375_v11 }
 0x298   : > { %v4406_v19 = vpop.eup %4405  ;;  %v3143_v56 = vsel %vm3140_vm12, %v3142_v1, %v3138_v26  ;;  %4407 = vrcp.f32 %v6388_v58  ;;  %v3169_v8 = vand.u32 2147483647, %v6388_v58  ;;  %v1950_v31 = vpop.f32.mrf.mxu1  ;;  %vm3165_vm3 = vweird.f32 %v6388_v58 }
 0x299   : > { %3387 = vst.msk [vmem:[%s6019_s22 + $0x80] sm:$0xff] %vm3370_vm4, %v3143_v56  ;;  %v3146_v14 = vmul.f32 %v4406_v19, %v6375_v11  ;;  %4409 = vpow2.f32 %v2832_v12  ;;  %v1687_v22 = vadd.f32 %v1633_v4, %v1379_v42  ;;  %v2750_v50 = vadd.f32 %v2673_v47, %v2526_v9 }
 0x29a   : > { %v1636_v63 = vpop.f32.mrf.mxu0  ;;  %vm3151_vm13 = vweird.f32 %v4406_v19  ;;  %v3157_v10 = vor.u32 1.1754944e-38, %v3156_v7  ;;  %v3171_v11 = vand.u32 2147483648, %v6388_v58  ;;  %vm3170_vm5 = vcmp.eq.f32.partialorder %v3169_v8, 8.507059e+37 }
 0x29b   : > { %v2249_v45 = vpop.f32.mrf.mxu2  ;;  %v3147_v46 = vsub.f32 1.0, %v3146_v14  ;;  %v1995_v20 = vadd.f32 %v6362_v37, %v1687_v22  ;;  %v2782_v54 = vsub.f32 0.0, %v2750_v50  ;;  %vm3152_vm15 = vmor %vm3150_vm14, %vm3151_vm13  ;;  %v6634_v50 = vld [vmem:[#allocation9_spill] sm:$0xff] }
 0x29c   : > { %v3172_v35 = vor.u32 1.1754944e-38, %v3171_v11  ;;  %v6635_v11 = vld [vmem:[#allocation4_spill] sm:$0xff] }
 0x29d   : > { %v3148_v39 = vmul.f32 %v4406_v19, %v3147_v46  ;;  %v2303_v27 = vadd.f32 %v2249_v45, %v1995_v20  ;;  %v2834_v53 = vmul.f32 1.442695, %v2782_v54  ;;  %v6633_v46 = vld [vmem:[#allocation3_spill] sm:$0xff]  ;;  %v2688_v20 = vpop.permute.xlu2 %2687 }
 0x29e   : > { %v1328_v25 = vpop.f32.mrf.mxu3  ;;  %v4408_v21 = vpop.eup %4407 }
 0x29f   : > { %v3149_v24 = vadd.f32 %v4406_v19, %v3148_v39  ;;  %v1380_v61 = vadd.f32 %v1328_v25, %v5852_v62  ;;  %v4410_v59 = vpop.eup %4409  ;;  %v3161_v40 = vmul.f32 %v4408_v21, %v6388_v58  ;;  %v2527_v37 = vmul.f32 %v5811_v32, %v2303_v27  ;;  %v2678_v62 = vpop.permute.xlu0 %2677 }
 0x2a0   : > { %v6404_v29 = vadd.f32 1.0, %v4410_v59  ;;  %4411 = vpow2.f32 %v2834_v53  ;;  %vm3166_vm2 = vweird.f32 %v4408_v21  ;;  %v1953_v47 = vpop.f32.mrf.mxu1 }
 0x2a1   : > { %v3153_v48 = vsel %vm3152_vm15, %v4406_v19, %v3149_v24  ;;  %v1688_v38 = vadd.f32 %v1636_v63, %v1380_v61  ;;  %v3162_v6 = vsub.f32 1.0, %v3161_v40  ;;  %v2751_v36 = vadd.f32 %v2678_v62, %v2527_v37  ;;  %vm3167_vm1 = vmor %vm3165_vm3, %vm3166_vm2 }
 0x2a2   : > { %v1639_v49 = vpop.f32.mrf.mxu0  ;;  %v3158_v23 = vsel %vm3155_vm0, %v3157_v10, %v3153_v48  ;;  %4413 = vrcp.f32 %v6404_v29  ;;  %v3184_v56 = vand.u32 2147483647, %v6404_v29  ;;  %v3186_v42 = vand.u32 2147483648, %v6404_v29 }
 0x2a3   : > { %v2252_v60 = vpop.f32.mrf.mxu2  ;;  %3388 = vst.msk [vmem:[%s6019_s22 + $0x88] sm:$0xff] %vm3370_vm4, %v3158_v23  ;;  %v3163_v44 = vmul.f32 %v4408_v21, %v3162_v6  ;;  %v1996_v32 = vadd.f32 %v6378_v33, %v1688_v38  ;;  %v2783_v4 = vsub.f32 0.0, %v2751_v36  ;;  %v2683_v33 = vpop.permute.xlu1 %2682  ;;  %vm3180_vm7 = vweird.f32 %v6404_v29 }
 0x2a4   : > { %v3187_v54 = vor.u32 1.1754944e-38, %v3186_v42  ;;  %vm3185_vm9 = vcmp.eq.f32.partialorder %v3184_v56, 8.507059e+37  ;;  %v6637_v56 = vld [vmem:[#allocation5_spill] sm:$0xff] }
 0x2a5   : > { %v3164_v13 = vadd.f32 %v4408_v21, %v3163_v44  ;;  %v2304_v2 = vadd.f32 %v2252_v60, %v1996_v32  ;;  %v2836_v43 = vmul.f32 1.442695, %v2783_v4  ;;  %v6636_v32 = vld [vmem:[#allocation12_spill] sm:$0xff] }
 0x2a6   : > { %v1331_v57 = vpop.f32.mrf.mxu3  ;;  %v4412_v34 = vpop.eup %4411 }
 0x2a7   : > { %v1381_v41 = vadd.f32 %v1331_v57, %v5878_v28  ;;  %v3168_v55 = vsel %vm3167_vm1, %v4408_v21, %v3164_v13  ;;  %v2528_v5 = vmul.f32 %v6632_v52, %v2304_v2  ;;  %v6416_v30 = vadd.f32 1.0, %v4412_v34  ;;  %v2693_v2 = vpop.permute.xlu0 %2692 }
 0x2a8   : > { %v4414_v3 = vpop.eup %4413  ;;  %v3173_v15 = vsel %vm3170_vm5, %v3172_v35, %v3168_v55  ;;  %4415 = vpow2.f32 %v2836_v43  ;;  %v1956_v13 = vpop.f32.mrf.mxu1 }
 0x2a9   : > { %v1689_v1 = vadd.f32 %v1639_v49, %v1381_v41  ;;  %3389 = vst.msk [vmem:[%s6019_s22 + $0x90] sm:$0xff] %vm3370_vm4, %v3173_v15  ;;  %v3176_v26 = vmul.f32 %v4414_v3, %v6404_v29  ;;  %v2752_v58 = vadd.f32 %v2683_v33, %v2528_v5  ;;  %4417 = vrcp.f32 %v6416_v30 }
 0x2aa   : > { %v1642_v51 = vpop.f32.mrf.mxu0  ;;  %vm3181_vm6 = vweird.f32 %v4414_v3  ;;  %v3199_v37 = vand.u32 2147483647, %v6416_v30  ;;  %v3201_v38 = vand.u32 2147483648, %v6416_v30  ;;  %vm3195_vm11 = vweird.f32 %v6416_v30 }
 0x2ab   : > { %v2255_v28 = vpop.f32.mrf.mxu2  ;;  %v3177_v12 = vsub.f32 1.0, %v3176_v26  ;;  %v2784_v18 = vsub.f32 0.0, %v2752_v58  ;;  %v1997_v19 = vadd.f32 %v6396_v0, %v1689_v1  ;;  %vm3182_vm8 = vmor %vm3180_vm7, %vm3181_vm6 }
 0x2ac   : > { %v3202_v57 = vor.u32 1.1754944e-38, %v3201_v38  ;;  %vm3200_vm13 = vcmp.eq.f32.partialorder %v3199_v37, 8.507059e+37  ;;  %v6639_v38 = vld [vmem:[#allocation6_spill] sm:$0xff] }
 0x2ad   : > { %v3178_v14 = vmul.f32 %v4414_v3, %v3177_v12  ;;  %v2838_v63 = vmul.f32 1.442695, %v2784_v18  ;;  %v2305_v9 = vadd.f32 %v2255_v28, %v1997_v19 }
 0x2ae   : > { %v1334_v45 = vpop.f32.mrf.mxu3  ;;  %v4416_v16 = vpop.eup %4415 }
 0x2af   : > { %v1382_v22 = vadd.f32 %v1334_v45, %v6633_v46  ;;  %v3179_v7 = vadd.f32 %v4414_v3, %v3178_v14  ;;  %4419 = vpow2.f32 %v2838_v63  ;;  %v2529_v0 = vmul.f32 %v6634_v50, %v2305_v9  ;;  %v4418_v39 = vpop.eup %4417 }
 0x2b0   : > { %v6428_v25 = vadd.f32 1.0, %v4416_v16  ;;  %v3191_v61 = vmul.f32 %v4418_v39, %v6416_v30  ;;  %vm3196_vm10 = vweird.f32 %v4418_v39 }
 0x2b1   : > { %v1690_v21 = vadd.f32 %v1642_v51, %v1382_v22  ;;  %v3183_v27 = vsel %vm3182_vm8, %v4414_v3, %v3179_v7  ;;  %v2753_v59 = vadd.f32 %v2688_v20, %v2529_v0  ;;  %vm3197_vm12 = vmor %vm3195_vm11, %vm3196_vm10  ;;  %v6638_v22 = vld [vmem:[#allocation15_spill] sm:$0xff]  ;;  %v1959_v0 = vpop.f32.mrf.mxu1 }
 0x2b2   : > { %v1645_v24 = vpop.f32.mrf.mxu0  ;;  %v3188_v40 = vsel %vm3185_vm9, %v3187_v54, %v3183_v27  ;;  %4421 = vrcp.f32 %v6428_v25  ;;  %v3192_v53 = vsub.f32 1.0, %v3191_v61  ;;  %v3214_v15 = vand.u32 2147483647, %v6428_v25 }
 0x2b3   : > { %v2258_v10 = vpop.f32.mrf.mxu2  ;;  %3390 = vst.msk [vmem:[%s6019_s22 + $0x98] sm:$0xff] %vm3370_vm4, %v3188_v40  ;;  %v2785_v48 = vsub.f32 0.0, %v2753_v59  ;;  %v1998_v29 = vadd.f32 %v1950_v31, %v1690_v21  ;;  %v3216_v30 = vand.u32 2147483648, %v6428_v25  ;;  %vm3210_vm15 = vweird.f32 %v6428_v25 }
 0x2b4   : > { %v3193_v23 = vmul.f32 %v4418_v39, %v3192_v53  ;;  %vm3215_vm2 = vcmp.eq.f32.partialorder %v3214_v15, 8.507059e+37  ;;  %v6641_v15 = vld [vmem:[#allocation7_spill] sm:$0xff] }
 0x2b5   : > { %v4420_v49 = vpop.eup %4419  ;;  %v2840_v6 = vmul.f32 1.442695, %v2785_v48  ;;  %v2306_v60 = vadd.f32 %v2258_v10, %v1998_v29  ;;  %v3217_v9 = vor.u32 1.1754944e-38, %v3216_v30 }
 0x2b6   : > { %v1337_v62 = vpop.f32.mrf.mxu3  ;;  %v6436_v8 = vadd.f32 1.0, %v4420_v49  ;;  %v3194_v36 = vadd.f32 %v4418_v39, %v3193_v23 }
 0x2b7   : > { %v1383_v44 = vadd.f32 %v1337_v62, %v6635_v11  ;;  %4423 = vpow2.f32 %v2840_v6  ;;  %v2530_v31 = vmul.f32 %v6636_v32, %v2306_v60  ;;  %v6640_v11 = vld [vmem:[#allocation13_spill] sm:$0xff] }
 0x2b8   : > { %v4422_v4 = vpop.eup %4421  ;;  %4425 = vrcp.f32 %v6436_v8  ;;  %v3198_v41 = vsel %vm3197_vm12, %v4418_v39, %v3194_v36  ;;  %v2698_v39 = vpop.permute.xlu1 %2697  ;;  %v3229_v54 = vand.u32 2147483647, %v6436_v8  ;;  %vm3225_vm1 = vweird.f32 %v6436_v8 }
 0x2b9   : > { %v3206_v34 = vmul.f32 %v4422_v4, %v6428_v25  ;;  %v2754_v55 = vadd.f32 %v2693_v2, %v2530_v31  ;;  %v3203_v52 = vsel %vm3200_vm13, %v3202_v57, %v3198_v41  ;;  %v1691_v5 = vadd.f32 %v1645_v24, %v1383_v44  ;;  %v2703_v31 = vpop.permute.xlu2 %2702  ;;  %v1962_v41 = vpop.f32.mrf.mxu1 }
 0x2ba   : > { %v1648_v35 = vpop.f32.mrf.mxu0  ;;  %3391 = vst.msk [vmem:[%s6019_s22 + $0xa0] sm:$0xff] %vm3370_vm4, %v3203_v52  ;;  %vm3211_vm14 = vweird.f32 %v4422_v4  ;;  %v3231_v25 = vand.u32 2147483648, %v6436_v8  ;;  %vm3230_vm6 = vcmp.eq.f32.partialorder %v3229_v54, 8.507059e+37 }
 0x2bb   : > { %v2261_v43 = vpop.f32.mrf.mxu2  ;;  %v3207_v3 = vsub.f32 1.0, %v3206_v34  ;;  %v2786_v33 = vsub.f32 0.0, %v2754_v55  ;;  %v1999_v1 = vadd.f32 %v1953_v47, %v1691_v5  ;;  %vm3212_vm0 = vmor %vm3210_vm15, %vm3211_vm14 }
 0x2bc   : > { %v3232_v29 = vor.u32 1.1754944e-38, %v3231_v25  ;;  %v6643_v25 = vld [vmem:[#allocation8_spill] sm:$0xff] }
 0x2bd   : > { %v4424_v51 = vpop.eup %4423  ;;  %v3208_v26 = vmul.f32 %v4422_v4, %v3207_v3  ;;  %v2842_v58 = vmul.f32 1.442695, %v2786_v33  ;;  %v2307_v19 = vadd.f32 %v2261_v43, %v1999_v1 }
 0x2be   : > { %v1340_v28 = vpop.f32.mrf.mxu3  ;;  %v4426_v12 = vpop.eup %4425  ;;  %v6447_v18 = vadd.f32 1.0, %v4424_v51 }
 0x2bf   : > { %v1384_v42 = vadd.f32 %v1340_v28, %v6637_v56  ;;  %v3209_v14 = vadd.f32 %v4422_v4, %v3208_v26  ;;  %v3221_v63 = vmul.f32 %v4426_v12, %v6436_v8  ;;  %4427 = vpow2.f32 %v2842_v58 }
 0x2c0   : > { %4429 = vrcp.f32 %v6447_v18  ;;  %v2531_v16 = vmul.f32 %v6638_v22, %v2307_v19  ;;  %vm3226_vm3 = vweird.f32 %v4426_v12  ;;  %v3244_v57 = vand.u32 2147483647, %v6447_v18  ;;  %v6642_v19 = vld [vmem:[#allocation16_spill] sm:$0xff] }
 0x2c1   : > { %v3213_v47 = vsel %vm3212_vm0, %v4422_v4, %v3209_v14  ;;  %v3222_v46 = vsub.f32 1.0, %v3221_v63  ;;  %v1692_v7 = vadd.f32 %v1648_v35, %v1384_v42  ;;  %vm3227_vm5 = vmor %vm3225_vm1, %vm3226_vm3  ;;  %vm3240_vm8 = vweird.f32 %v6447_v18  ;;  %v2708_v63 = vpop.permute.xlu0 %2707 }
 0x2c2   : > { %v1651_v45 = vpop.f32.mrf.mxu0  ;;  %v3218_v20 = vsel %vm3215_vm2, %v3217_v9, %v3213_v47  ;;  %v2755_v24 = vadd.f32 %v2698_v39, %v2531_v16  ;;  %vm3245_vm10 = vcmp.eq.f32.partialorder %v3244_v57, 8.507059e+37 }
 0x2c3   : > { %v2264_v50 = vpop.f32.mrf.mxu2  ;;  %3392 = vst.msk [vmem:[%s6019_s22 + $0xa8] sm:$0xff] %vm3370_vm4, %v3218_v20  ;;  %v3223_v21 = vmul.f32 %v4426_v12, %v3222_v46  ;;  %v2000_v27 = vadd.f32 %v1956_v13, %v1692_v7  ;;  %v3246_v13 = vand.u32 2147483648, %v6447_v18  ;;  %v1965_v20 = vpop.f32.mrf.mxu1 }
 0x2c4   : > { %v2787_v10 = vsub.f32 0.0, %v2755_v24 }
 0x2c5   : > { %v4428_v61 = vpop.eup %4427  ;;  %v3224_v59 = vadd.f32 %v4426_v12, %v3223_v21  ;;  %v2308_v40 = vadd.f32 %v2264_v50, %v2000_v27  ;;  %v3247_v3 = vor.u32 1.1754944e-38, %v3246_v13 }
 0x2c6   : > { %v1343_v53 = vpop.f32.mrf.mxu3  ;;  %v4430_v48 = vpop.eup %4429  ;;  %v6459_v37 = vadd.f32 1.0, %v4428_v61  ;;  %v2844_v60 = vmul.f32 1.442695, %v2787_v10 }
 0x2c7   : > { %v1385_v49 = vadd.f32 %v1343_v53, %v6639_v38  ;;  %v3228_v23 = vsel %vm3227_vm5, %v4426_v12, %v3224_v59  ;;  %v3236_v6 = vmul.f32 %v4430_v48, %v6447_v18  ;;  %v2532_v44 = vmul.f32 %v6640_v11, %v2308_v40  ;;  %v6644_v59 = vld [vmem:[#allocation18_spill] sm:$0xff]  ;;  %v2713_v53 = vpop.permute.xlu1 %2712 }
 0x2c8   : > { %v3233_v62 = vsel %vm3230_vm6, %v3232_v29, %v3228_v23  ;;  %4431 = vrcp.f32 %v6459_v37  ;;  %vm3241_vm7 = vweird.f32 %v4430_v48  ;;  %v3259_v9 = vand.u32 2147483647, %v6459_v37 }
 0x2c9   : > { %3393 = vst.msk [vmem:[%s6019_s22 + $0xb0] sm:$0xff] %vm3370_vm4, %v3233_v62  ;;  %v3237_v8 = vsub.f32 1.0, %v3236_v6  ;;  %4433 = vpow2.f32 %v2844_v60  ;;  %v1693_v4 = vadd.f32 %v1651_v45, %v1385_v49  ;;  %v2756_v35 = vadd.f32 %v2703_v31, %v2532_v44  ;;  %vm3242_vm9 = vmor %vm3240_vm8, %vm3241_vm7 }
 0x2ca   : > { %v1654_v32 = vpop.f32.mrf.mxu0  ;;  %v3261_v45 = vand.u32 2147483648, %v6459_v37  ;;  %vm3255_vm12 = vweird.f32 %v6459_v37  ;;  %vm3260_vm14 = vcmp.eq.f32.partialorder %v3259_v9, 8.507059e+37 }
 0x2cb   : > { %v2267_v36 = vpop.f32.mrf.mxu2  ;;  %v3238_v2 = vmul.f32 %v4430_v48, %v3237_v8  ;;  %v2001_v34 = vadd.f32 %v1959_v0, %v1693_v4  ;;  %v2788_v43 = vsub.f32 0.0, %v2756_v35  ;;  %v6645_v4 = vld [vmem:[#allocation11_spill] sm:$0xff] }
 0x2cc   : > { %v3262_v54 = vor.u32 1.1754944e-38, %v3261_v45 }
 0x2cd   : > { %v3239_v55 = vadd.f32 %v4430_v48, %v3238_v2  ;;  %v2309_v33 = vadd.f32 %v2267_v36, %v2001_v34  ;;  %v2846_v58 = vmul.f32 1.442695, %v2788_v43 }
 0x2ce   : > { %v1346_v52 = vpop.f32.mrf.mxu3  ;;  %v4432_v5 = vpop.eup %4431 }
 0x2cf   : > { %v1386_v30 = vadd.f32 %v1346_v52, %v6641_v15  ;;  %v4434_v1 = vpop.eup %4433  ;;  %v3243_v51 = vsel %vm3242_vm9, %v4430_v48, %v3239_v55  ;;  %v3251_v26 = vmul.f32 %v4432_v5, %v6459_v37  ;;  %v2533_v18 = vmul.f32 %v6642_v19, %v2309_v33  ;;  %v1968_v55 = vpop.f32.mrf.mxu1 }
 0x2d0   : > { %v3248_v28 = vsel %vm3245_vm10, %v3247_v3, %v3243_v51  ;;  %v6472_v12 = vadd.f32 1.0, %v4434_v1  ;;  %4435 = vpow2.f32 %v2846_v58  ;;  %vm3256_vm11 = vweird.f32 %v4432_v5  ;;  %v2718_v52 = vpop.permute.xlu2 %2717 }
 0x2d1   : > { %v1694_v56 = vadd.f32 %v1654_v32, %v1386_v30  ;;  %3394 = vst.msk [vmem:[%s6019_s22 + $0xb8] sm:$0xff] %vm3370_vm4, %v3248_v28  ;;  %v3252_v42 = vsub.f32 1.0, %v3251_v26  ;;  %v2757_v46 = vadd.f32 %v2708_v63, %v2533_v18  ;;  %vm3257_vm13 = vmor %vm3255_vm12, %vm3256_vm11 }
 0x2d2   : > { %4437 = vrcp.f32 %v6472_v12  ;;  %v1657_v16 = vpop.f32.mrf.mxu0  ;;  %v3274_v8 = vand.u32 2147483647, %v6472_v12  ;;  %v3276_v11 = vand.u32 2147483648, %v6472_v12  ;;  %vm3270_vm0 = vweird.f32 %v6472_v12 }
 0x2d3   : > { %v2270_v14 = vpop.f32.mrf.mxu2  ;;  %v3253_v47 = vmul.f32 %v4432_v5, %v3252_v42  ;;  %v2002_v22 = vadd.f32 %v1962_v41, %v1694_v56  ;;  %v2789_v50 = vsub.f32 0.0, %v2757_v46  ;;  %v6646_v41 = vld [vmem:[#allocation17_spill] sm:$0xff] }
 0x2d4   : > { %vm3275_vm3 = vcmp.eq.f32.partialorder %v3274_v8, 8.507059e+37 }
 0x2d5   : > { %v3254_v7 = vadd.f32 %v4432_v5, %v3253_v47  ;;  %v2310_v0 = vadd.f32 %v2270_v14, %v2002_v22  ;;  %v2848_v61 = vmul.f32 1.442695, %v2789_v50  ;;  %v6647_v47 = vld [vmem:[#allocation14_spill] sm:$0xff] }
 0x2d6   : > { %v1349_v39 = vpop.f32.mrf.mxu3  ;;  %v4436_v24 = vpop.eup %4435 }
 0x2d7   : > { %v1387_v21 = vadd.f32 %v1349_v39, %v6643_v25  ;;  %v3258_v27 = vsel %vm3257_vm13, %v4432_v5, %v3254_v7  ;;  %v2534_v10 = vmul.f32 %v6644_v59, %v2310_v0  ;;  %v6483_v29 = vadd.f32 1.0, %v4436_v24  ;;  %v2723_v39 = vpop.permute.xlu0 %2722  ;;  %v1971_v24 = vpop.f32.mrf.mxu1 }
 0x2d8   : > { %v4438_v40 = vpop.eup %4437  ;;  %v3263_v48 = vsel %vm3260_vm14, %v3262_v54, %v3258_v27  ;;  %4439 = vpow2.f32 %v2848_v61  ;;  %v3277_v5 = vor.u32 1.1754944e-38, %v3276_v11 }
 0x2d9   : > { %v1695_v37 = vadd.f32 %v1657_v16, %v1387_v21  ;;  %3395 = vst.msk [vmem:[%s6019_s22 + $0xc0] sm:$0xff] %vm3370_vm4, %v3263_v48  ;;  %v3266_v38 = vmul.f32 %v4438_v40, %v6472_v12  ;;  %v2758_v49 = vadd.f32 %v2713_v53, %v2534_v10  ;;  %4441 = vrcp.f32 %v6483_v29  ;;  %v6648_v16 = vld [vmem:[#allocation19_spill] sm:$0xff] }
 0x2da   : > { %vm3271_vm15 = vweird.f32 %v4438_v40  ;;  %v1660_v13 = vpop.f32.mrf.mxu0  ;;  %v3289_v19 = vand.u32 2147483647, %v6483_v29  ;;  %v3291_v18 = vand.u32 2147483648, %v6483_v29  ;;  %vm3285_vm5 = vweird.f32 %v6483_v29 }
 0x2db   : > { %v2273_v23 = vpop.f32.mrf.mxu2  ;;  %v3267_v6 = vsub.f32 1.0, %v3266_v38  ;;  %v2790_v60 = vsub.f32 0.0, %v2758_v49  ;;  %v2003_v62 = vadd.f32 %v1965_v20, %v1695_v37  ;;  %vm3272_vm2 = vmor %vm3270_vm0, %vm3271_vm15 }
 0x2dc   : > { %v3292_v20 = vor.u32 1.1754944e-38, %v3291_v18  ;;  %vm3290_vm7 = vcmp.eq.f32.partialorder %v3289_v19, 8.507059e+37 }
 0x2dd   : > { %v3268_v44 = vmul.f32 %v4438_v40, %v3267_v6  ;;  %v2850_v36 = vmul.f32 1.442695, %v2790_v60  ;;  %v2311_v32 = vadd.f32 %v2273_v23, %v2003_v62 }
 0x2de   : > { %v1352_v31 = vpop.f32.mrf.mxu3  ;;  %v4440_v57 = vpop.eup %4439 }
 0x2df   : > { %v1388_v2 = vadd.f32 %v1352_v31, %v6645_v4  ;;  %v3269_v35 = vadd.f32 %v4438_v40, %v3268_v44  ;;  %4443 = vpow2.f32 %v2850_v36  ;;  %v2535_v34 = vmul.f32 %v6646_v41, %v2311_v32  ;;  %v4442_v43 = vpop.eup %4441  ;;  %v2728_v31 = vpop.permute.xlu1 %2727 }
 0x2e0   : > { %v6494_v3 = vadd.f32 1.0, %v4440_v57  ;;  %v3281_v30 = vmul.f32 %v4442_v43, %v6483_v29  ;;  %vm3286_vm1 = vweird.f32 %v4442_v43 }
 0x2e1   : > { %v1696_v33 = vadd.f32 %v1660_v13, %v1388_v2  ;;  %v3273_v15 = vsel %vm3272_vm2, %v4438_v40, %v3269_v35  ;;  %v2759_v1 = vadd.f32 %v2718_v52, %v2535_v34  ;;  %vm3287_vm6 = vmor %vm3285_vm5, %vm3286_vm1 }
 0x2e2   : > { %v3278_v26 = vsel %vm3275_vm3, %v3277_v5, %v3273_v15  ;;  %4445 = vrcp.f32 %v6494_v3  ;;  %v3282_v58 = vsub.f32 1.0, %v3281_v30  ;;  %v1663_v50 = vpop.f32.mrf.mxu0  ;;  %v3306_v53 = vand.u32 2147483648, %v6494_v3 }
 0x2e3   : > { %v2276_v51 = vpop.f32.mrf.mxu2  ;;  %3396 = vst.msk [vmem:[%s6019_s22 + $0xc8] sm:$0xff] %vm3370_vm4, %v3278_v26  ;;  %v2791_v28 = vsub.f32 0.0, %v2759_v1  ;;  %v2004_v12 = vadd.f32 %v1968_v55, %v1696_v33  ;;  %v3304_v38 = vand.u32 2147483647, %v6494_v3  ;;  %vm3300_vm9 = vweird.f32 %v6494_v3 }
 0x2e4   : > { %v3283_v42 = vmul.f32 %v4442_v43, %v3282_v58  ;;  %v3307_v11 = vor.u32 1.1754944e-38, %v3306_v53  ;;  %v3510_v53 = vld [vmem:[%s6019_s22 + $0x18] sm:$0xff] (%p4565_p3) }
 0x2e5   : > { %v4444_v56 = vpop.eup %4443  ;;  %v2852_v14 = vmul.f32 1.442695, %v2791_v28  ;;  %v2312_v63 = vadd.f32 %v2276_v51, %v2004_v12  ;;  %vm3305_vm11 = vcmp.eq.f32.partialorder %v3304_v38, 8.507059e+37  ;;  %3511 = vst [vmem:[%s6530_s29 + $0x78] sm:$0xff] (%p4565_p3), %v3510_v53  ;;  %v3518_v38 = vld [vmem:[%s6019_s22 + $0x38] sm:$0xff] (%p4565_p3) }
 0x2e6   : > { %v1355_v9 = vpop.f32.mrf.mxu3  ;;  %v2886_v45 = vadd.f32 1.0, %v4444_v56  ;;  %v3284_v22 = vadd.f32 %v4442_v43, %v3283_v42  ;;  %3519 = vst [vmem:[%s6530_s29 + $0x118] sm:$0xff] (%p4565_p3), %v3518_v38 }
 0x2e7   : > { %v1389_v46 = vadd.f32 %v1355_v9, %v6647_v47  ;;  %4447 = vpow2.f32 %v2852_v14  ;;  %v2536_v7 = vmul.f32 %v6648_v16, %v2312_v63 }
 0x2e8   : > { %v4446_v0 = vpop.eup %4445  ;;  %4449 = vrcp.f32 %v2886_v45  ;;  %v3288_v54 = vsel %vm3287_vm6, %v4442_v43, %v3284_v22  ;;  %v3321_v4 = vand.u32 2147483648, %v2886_v45  ;;  %v3319_v57 = vand.u32 2147483647, %v2886_v45 }
 0x2e9   : > { %v3296_v25 = vmul.f32 %v4446_v0, %v6494_v3  ;;  %v2760_v21 = vadd.f32 %v2723_v39, %v2536_v7  ;;  %v3293_v27 = vsel %vm3290_vm7, %v3292_v20, %v3288_v54  ;;  %v1697_v61 = vadd.f32 %v1663_v50, %v1389_v46 }
 0x2ea   : > { %3397 = vst.msk [vmem:[%s6019_s22 + $0xd0] sm:$0xff] %vm3370_vm4, %v3293_v27  ;;  %vm3301_vm8 = vweird.f32 %v4446_v0  ;;  %vm3315_vm13 = vweird.f32 %v2886_v45  ;;  %v3322_v52 = vor.u32 1.1754944e-38, %v3321_v4  ;;  %vm3320_vm15 = vcmp.eq.f32.partialorder %v3319_v57, 8.507059e+37  ;;  %v3544_v4 = vld [vmem:[%s6019_s22 + $0xa0] sm:$0xff] (%p4565_p3)  ;;  %v3548_v57 = vld [vmem:[%s6019_s22 + $0xb0] sm:$0xff] (%p4565_p3) }
 0x2eb   : > { %v3297_v59 = vsub.f32 1.0, %v3296_v25  ;;  %v2792_v10 = vsub.f32 0.0, %v2760_v21  ;;  %v2279_v40 = vpop.f32.mrf.mxu2  ;;  %v2005_v48 = vadd.f32 %v1971_v24, %v1697_v61  ;;  %vm3302_vm10 = vmor %vm3300_vm9, %vm3301_vm8  ;;  %3545 = vst [vmem:[%s6530_s29 + $0x320] sm:$0xff] (%p4565_p3), %v3544_v4 }
 0x2ec   : > { %3549 = vst [vmem:[%s6530_s29 + $0x370] sm:$0xff] (%p4565_p3), %v3548_v57 }
 0x2ed   : > { %v4448_v29 = vpop.eup %4447  ;;  %v3298_v37 = vmul.f32 %v4446_v0, %v3297_v59  ;;  %v2854_v49 = vmul.f32 1.442695, %v2792_v10  ;;  %v2313_v60 = vadd.f32 %v2279_v40, %v2005_v48  ;;  %v3504_v59 = vld [vmem:[%s6019_s22] sm:$0xff] (%p4565_p3)  ;;  %v3506_v10 = vld [vmem:[%s6019_s22 + $0x8] sm:$0xff] (%p4565_p3)  ;;  %v3508_v40 = vld [vmem:[%s6019_s22 + $0x10] sm:$0xff] (%p4565_p3) }
 0x2ee   : > { %v4450_v23 = vpop.eup %4449  ;;  %v2887_v6 = vadd.f32 1.0, %v4448_v29  ;;  %3505 = vst [vmem:[%s6530_s29] sm:$0xff] (%p4565_p3), %v3504_v59  ;;  %v3512_v48 = vld [vmem:[%s6019_s22 + $0x20] sm:$0xff] (%p4565_p3)  ;;  %v3514_v29 = vld [vmem:[%s6019_s22 + $0x28] sm:$0xff] (%p4565_p3) }
 0x2ef   : > { %v3299_v62 = vadd.f32 %v4446_v0, %v3298_v37  ;;  %v3311_v8 = vmul.f32 %v4450_v23, %v2886_v45  ;;  %4451 = vpow2.f32 %v2854_v49  ;;  %v2537_v32 = vmul.f32 %v5929_v17, %v2313_v60  ;;  %3507 = vst [vmem:[%s6530_s29 + $0x28] sm:$0xff] (%p4565_p3), %v3506_v10  ;;  %v3516_v37 = vld [vmem:[%s6019_s22 + $0x30] sm:$0xff] (%p4565_p3)  ;;  %v3520_v49 = vld [vmem:[%s6019_s22 + $0x40] sm:$0xff] (%p4565_p3)  ;;  %v3526_v60 = vld [vmem:[%s6019_s22 + $0x58] sm:$0xff] (%p4565_p3) }
 0x2f0   : > { %4453 = vrcp.f32 %v2887_v6  ;;  %vm3316_vm12 = vweird.f32 %v4450_v23  ;;  %v3336_v1 = vand.u32 2147483648, %v2887_v6  ;;  %v3334_v26 = vand.u32 2147483647, %v2887_v6  ;;  %3509 = vst [vmem:[%s6530_s29 + $0x50] sm:$0xff] (%p4565_p3), %v3508_v40 }
 0x2f1   : > { %v3303_v44 = vsel %vm3302_vm10, %v4446_v0, %v3299_v62  ;;  %v3312_v36 = vsub.f32 1.0, %v3311_v8  ;;  %v2761_v35 = vadd.f32 %v2728_v31, %v2537_v32  ;;  %vm3317_vm14 = vmor %vm3315_vm13, %vm3316_vm12  ;;  %vm3330_vm2 = vweird.f32 %v2887_v6  ;;  %3513 = vst [vmem:[%s6530_s29 + $0xa0] sm:$0xff] (%p4565_p3), %v3512_v48  ;;  %v3528_v62 = vld [vmem:[%s6019_s22 + $0x60] sm:$0xff] (%p4565_p3)  ;;  %v3530_v8 = vld [vmem:[%s6019_s22 + $0x68] sm:$0xff] (%p4565_p3) }
 0x2f2   : > { %v3308_v13 = vsel %vm3305_vm11, %v3307_v11, %v3303_v44  ;;  %v3337_v12 = vor.u32 1.1754944e-38, %v3336_v1  ;;  %vm3335_vm1 = vcmp.eq.f32.partialorder %v3334_v26, 8.507059e+37  ;;  %3515 = vst [vmem:[%s6530_s29 + $0xc8] sm:$0xff] (%p4565_p3), %v3514_v29  ;;  %v3532_v11 = vld [vmem:[%s6019_s22 + $0x70] sm:$0xff] (%p4565_p3)  ;;  %v3534_v44 = vld [vmem:[%s6019_s22 + $0x78] sm:$0xff] (%p4565_p3)  ;;  %v3538_v32 = vld [vmem:[%s6019_s22 + $0x88] sm:$0xff] (%p4565_p3) }
 0x2f3   : > { %3398 = vst.msk [vmem:[%s6019_s22 + $0xd8] sm:$0xff] %vm3370_vm4, %v3308_v13  ;;  %v3313_v2 = vmul.f32 %v4450_v23, %v3312_v36  ;;  %v2793_v55 = vsub.f32 0.0, %v2761_v35  ;;  %v3536_v36 = vld [vmem:[%s6019_s22 + $0x80] sm:$0xff] (%p4565_p3)  ;;  %v3540_v31 = vld [vmem:[%s6019_s22 + $0x90] sm:$0xff] (%p4565_p3)  ;;  %v3542_v13 = vld [vmem:[%s6019_s22 + $0x98] sm:$0xff] (%p4565_p3) }
 0x2f4   : > { %3517 = vst [vmem:[%s6530_s29 + $0xf0] sm:$0xff] (%p4565_p3), %v3516_v37  ;;  %v3550_v35 = vld [vmem:[%s6019_s22 + $0xb8] sm:$0xff] (%p4565_p3) }
 0x2f5   : > { %v4452_v41 = vpop.eup %4451  ;;  %v3314_v34 = vadd.f32 %v4450_v23, %v3313_v2  ;;  %v2856_v33 = vmul.f32 1.442695, %v2793_v55  ;;  %3521 = vst [vmem:[%s6530_s29 + $0x140] sm:$0xff] (%p4565_p3), %v3520_v49  ;;  %v3546_v2 = vld [vmem:[%s6019_s22 + $0xa8] sm:$0xff] (%p4565_p3)  ;;  %v3556_v55 = vld [vmem:[%s6019_s22 + $0xd0] sm:$0xff] (%p4565_p3) }
 0x2f6   : > { %v4454_v43 = vpop.eup %4453  ;;  %v2888_v5 = vadd.f32 1.0, %v4452_v41  ;;  %3527 = vst [vmem:[%s6530_s29 + $0x1b8] sm:$0xff] (%p4565_p3), %v3526_v60  ;;  %v3552_v41 = vld [vmem:[%s6019_s22 + $0xc0] sm:$0xff] (%p4565_p3) }
 0x2f7   : > { %v3318_v3 = vsel %vm3317_vm14, %v4450_v23, %v3314_v34  ;;  %v3326_v17 = vmul.f32 %v4454_v43, %v2887_v6  ;;  %vm3331_vm0 = vweird.f32 %v4454_v43  ;;  %v3522_v23 = vld [vmem:[%s6019_s22 + $0x48] sm:$0xff] (%p4565_p3)  ;;  %v3524_v6 = vld [vmem:[%s6019_s22 + $0x50] sm:$0xff] (%p4565_p3)  ;;  %3529 = vst [vmem:[%s6530_s29 + $0x1e0] sm:$0xff] (%p4565_p3), %v3528_v62 }
 0x2f8   : > { %v3323_v15 = vsel %vm3320_vm15, %v3322_v52, %v3318_v3  ;;  %4455 = vrcp.f32 %v2888_v5  ;;  %vm3332_vm3 = vmor %vm3330_vm2, %vm3331_vm0  ;;  %v3351_v9 = vand.u32 2147483648, %v2888_v5  ;;  %v3349_v47 = vand.u32 2147483647, %v2888_v5  ;;  %3523 = vst [vmem:[%s6530_s29 + $0x168] sm:$0xff] (%p4565_p3), %v3522_v23  ;;  %v3554_v34 = vld [vmem:[%s6019_s22 + $0xc8] sm:$0xff] (%p4565_p3) }
 0x2f9   : > { %3399 = vst.msk [vmem:[%s6019_s22 + $0xe0] sm:$0xff] %vm3370_vm4, %v3323_v15  ;;  %v3327_v30 = vsub.f32 1.0, %v3326_v17  ;;  %4457 = vpow2.f32 %v2856_v33  ;;  %vm3345_vm6 = vweird.f32 %v2888_v5 }
 0x2fa   : > { %v3352_v22 = vor.u32 1.1754944e-38, %v3351_v9  ;;  %vm3350_vm8 = vcmp.eq.f32.partialorder %v3349_v47, 8.507059e+37  ;;  %3525 = vst [vmem:[%s6530_s29 + $0x190] sm:$0xff] (%p4565_p3), %v3524_v6 }
 0x2fb   : > { %v3328_v51 = vmul.f32 %v4454_v43, %v3327_v30  ;;  %3531 = vst [vmem:[%s6530_s29 + $0x208] sm:$0xff] (%p4565_p3), %v3530_v8 }
 0x2fc   : > { %3533 = vst [vmem:[%s6530_s29 + $0x230] sm:$0xff] (%p4565_p3), %v3532_v11 }
 0x2fd   : > { %v3329_v58 = vadd.f32 %v4454_v43, %v3328_v51  ;;  %3535 = vst [vmem:[%s6530_s29 + $0x258] sm:$0xff] (%p4565_p3), %v3534_v44 }
 0x2fe   : > { %v4456_v28 = vpop.eup %4455  ;;  %3537 = vst [vmem:[%s6530_s29 + $0x280] sm:$0xff] (%p4565_p3), %v3536_v36 }
 0x2ff   : > { %v4458_v19 = vpop.eup %4457  ;;  %v3333_v18 = vsel %vm3332_vm3, %v4454_v43, %v3329_v58  ;;  %v3341_v56 = vmul.f32 %v4456_v28, %v2888_v5  ;;  %vm3346_vm5 = vweird.f32 %v4456_v28  ;;  %3539 = vst [vmem:[%s6530_s29 + $0x2a8] sm:$0xff] (%p4565_p3), %v3538_v32  ;;  %v3558_v43 = vld [vmem:[%s6019_s22 + $0xd8] sm:$0xff] (%p4565_p3) }
 0x300   : > { %v3338_v42 = vsel %vm3335_vm1, %v3337_v12, %v3333_v18  ;;  %v2889_v14 = vadd.f32 1.0, %v4458_v19  ;;  %vm3347_vm7 = vmor %vm3345_vm6, %vm3346_vm5  ;;  %3541 = vst [vmem:[%s6530_s29 + $0x2d0] sm:$0xff] (%p4565_p3), %v3540_v31  ;;  %v3560_v52 = vld [vmem:[%s6019_s22 + $0xe0] sm:$0xff] (%p4565_p3) }
 0x301   : > { %3400 = vst.msk [vmem:[%s6019_s22 + $0xe8] sm:$0xff] %vm3370_vm4, %v3338_v42  ;;  %v3342_v63 = vsub.f32 1.0, %v3341_v56 }
 0x302   : > { %4459 = vrcp.f32 %v2889_v14  ;;  %v3366_v20 = vand.u32 2147483648, %v2889_v14  ;;  %v3364_v25 = vand.u32 2147483647, %v2889_v14  ;;  %vm3360_vm10 = vweird.f32 %v2889_v14  ;;  %3543 = vst [vmem:[%s6530_s29 + $0x2f8] sm:$0xff] (%p4565_p3), %v3542_v13 }
 0x303   : > { %v3343_v45 = vmul.f32 %v4456_v28, %v3342_v63  ;;  %3547 = vst [vmem:[%s6530_s29 + $0x348] sm:$0xff] (%p4565_p3), %v3546_v2 }
 0x304   : > { %v3367_v24 = vor.u32 1.1754944e-38, %v3366_v20  ;;  %vm3365_vm12 = vcmp.eq.f32.partialorder %v3364_v25, 8.507059e+37  ;;  %3551 = vst [vmem:[%s6530_s29 + $0x398] sm:$0xff] (%p4565_p3), %v3550_v35 }
 0x305   : > { %v3344_v46 = vadd.f32 %v4456_v28, %v3343_v45  ;;  %3553 = vst [vmem:[%s6530_s29 + $0x3c0] sm:$0xff] (%p4565_p3), %v3552_v41 }
 0x306   : > { %3555 = vst [vmem:[%s6530_s29 + $0x3e8] sm:$0xff] (%p4565_p3), %v3554_v34 }
 0x307   : > { %v3348_v16 = vsel %vm3347_vm7, %v4456_v28, %v3344_v46  ;;  %3557 = vst [vmem:[%s6530_s29 + $0x410] sm:$0xff] (%p4565_p3), %v3556_v55 }
 0x308   : > { %v4460_v7 = vpop.eup %4459  ;;  %v3353_v50 = vsel %vm3350_vm8, %v3352_v22, %v3348_v16  ;;  %v3562_v5 = vld [vmem:[%s6019_s22 + $0xe8] sm:$0xff] (%p4565_p3)  ;;  %3559 = vst [vmem:[%s6530_s29 + $0x438] sm:$0xff] (%p4565_p3), %v3558_v43 }
 0x309   : > { %3401 = vst.msk [vmem:[%s6019_s22 + $0xf0] sm:$0xff] %vm3370_vm4, %v3353_v50  ;;  %v3356_v0 = vmul.f32 %v4460_v7, %v2889_v14  ;;  %vm3361_vm9 = vweird.f32 %v4460_v7 }
 0x30a   : > { %vm3362_vm11 = vmor %vm3360_vm10, %vm3361_vm9  ;;  %3561 = vst [vmem:[%s6530_s29 + $0x460] sm:$0xff] (%p4565_p3), %v3560_v52 }
 0x30b   : > { %v3357_v39 = vsub.f32 1.0, %v3356_v0  ;;  %3563 = vst [vmem:[%s6530_s29 + $0x488] sm:$0xff] (%p4565_p3), %v3562_v5 }
 0x30d   : > { %v3358_v54 = vmul.f32 %v4460_v7, %v3357_v39 }
 0x30f   : > { %v3359_v21 = vadd.f32 %v4460_v7, %v3358_v54  ;;  %3409 = sbr.rel (!%p4565_p3) target bundleno = 796 (0x31c), region = 40 }
 0x310   : > { %v3564_v3 = vld [vmem:[%s6019_s22 + $0xf0] sm:$0xff] (%p4565_p3) }
 0x311   : > { %v3363_v27 = vsel %vm3362_vm11, %v4460_v7, %v3359_v21  ;;  %3565 = vst [vmem:[%s6530_s29 + $0x4b0] sm:$0xff] (%p4565_p3), %v3564_v3 }
 0x312   : > { %v3368_v61 = vsel %vm3365_vm12, %v3367_v24, %v3363_v27 }
 0x313   : > { %3402 = vst.msk [vmem:[%s6019_s22 + $0xf8] sm:$0xff] %vm3370_vm4, %v3368_v61 }
 0x31a   : > { %v3566_v17 = vld [vmem:[%s6019_s22 + $0xf8] sm:$0xff] }
 0x31b   : > { %3567 = vst [vmem:[%s6530_s29 + $0x4d8] sm:$0xff] %v3566_v17 }
 0x31c PF: > { %s14_s19 = sadd.s32 1, %s4499_s19   ;;  %s6649_s15 = smov %s4487_s16 }
 0x31d   : > { %p11_p9 = scmp.ge.s32.totalorder %s14_s19, 7   ;;  %s6650_s16 = smov %s4574_s25 }
 0x31e   : > { %s6651_s17 = smov %s4495_s18  ;;  %s6652_s18 = smov %s6654_s21 }
 0x31f   :  { %13 = sbr.rel (!%p11_p9) target bundleno = 3 (0x3), region = 110 }

</bundles_post_ra>
